<compile_context>
chip_gen: v7x
topology: tpu7x:2x2x1
jax: 0.10.0
libtpu: 0.0.40
codegen_flags: <defaults>
</compile_context>

<pallas_src>
import functools

import numpy as np
import jax
import jax.numpy as jnp
from jax.experimental import pallas as pl
from jax.experimental.pallas import tpu as pltpu


_KSIZE = 4
_STRIDE = 2
_PAD = 2

BASE_CHNS = 32
MAX_CHNS = 512


def _round_up(x, m):
    return (x + m - 1) // m * m


# Generation-aware VMEM budget: ~3/4 of physical (96 MiB on v5e/v6e's 128 MiB,
# 48 MiB on v7x's 64 MiB); conservative fallback if the query is unavailable.
try:
    _VMEM_LIMIT = int(min(pltpu.get_tpu_info().vmem_capacity_bytes * 3 // 4,
                          96 * 1024 * 1024))
except Exception:  # pragma: no cover - depends on runtime/hardware
    _VMEM_LIMIT = 48 * 1024 * 1024


# ----------------------------------------------------------------------------
# Pallas kernel 1: fused DownBlock conv (k=4, s=2, p=2) + bias + LeakyReLU
#   ph_ref : (m_pad, 4*Cp) bf16  flattened stride-2 phase decomposition,
#            ph[p*Q + q, (di*2+dj)*Cp + c] = xpad[2p+di, 2q+dj, c]
#   w_ref  : (16*Cp, Cout) bf16  rows ordered (a, b2, di, dj, c), tap (i,j)=(2a+di, 2b2+dj)
#   b_ref  : (1, Cout) f32
#   o_ref  : (Ho*Q, Cout) bf16   (row r = oh*Q + ow'; column ow'=Q-1 is garbage, sliced off)
# Four statically-offset slices of ph feed four MXU dots (the in-VMEM "im2col").
# ----------------------------------------------------------------------------
def _downblock_kernel(ph_ref, w_ref, b_ref, o_ref, *, q_cols, negative_slope):
    m_out, cout = o_ref.shape
    c4 = ph_ref.shape[-1]
    acc = None
    for a in range(2):
        for b2 in range(2):
            off = a * q_cols + b2                       # static row offset
            xs = ph_ref[off:off + m_out, :]             # (m_out, 4*Cp) bf16
            t0 = (a * 2 + b2) * c4
            wt = w_ref[t0:t0 + c4, :]                   # (4*Cp, Cout) bf16
            t = jnp.dot(xs, wt, preferred_element_type=jnp.float32)
            acc = t if acc is None else acc + t
    acc = acc + b_ref[...]
    acc = jnp.where(acc >= 0, acc, negative_slope * acc)
    o_ref[...] = acc.astype(o_ref.dtype)


def downblock(x, wmat, bias, negative_slope=0.2):
    """Fused Conv2d(ksize=4, stride=2, pad=2) + LeakyReLU.  x: (B, H, W, C) NHWC."""
    B, H, W, C = x.shape
    kk_cp, cout = wmat.shape
    cp = kk_cp // (_KSIZE * _KSIZE)
    c4 = 4 * cp
    ho, wo = H // 2 + 1, W // 2 + 1
    p_rows, q_cols = ho + 1, wo + 1

    xb = x.astype(jnp.bfloat16)
    if C < cp:                                          # zero channels match zero weight rows
        xb = jnp.pad(xb, ((0, 0), (0, 0), (0, 0), (0, cp - C)))
    # pad to exactly (2*P, 2*Q) so the stride-2 space-to-depth is a pure reshape/transpose
    xb = jnp.pad(xb, ((0, 0), (_PAD, 2 * ho - H), (_PAD, 2 * wo - W), (0, 0)))
    ph = (xb.reshape(B, p_rows, 2, q_cols, 2, cp)
            .transpose(0, 1, 3, 2, 4, 5)
            .reshape(B, p_rows * q_cols, c4))
    m_rows = p_rows * q_cols
    m_pad = _round_up(m_rows + 1, 8)                    # +1: max static offset is Q+1
    ph = jnp.pad(ph, ((0, 0), (0, m_pad - m_rows), (0, 0)))
    m_out = ho * q_cols

    flops = 2 * B * m_out * (_KSIZE * _KSIZE * cp) * cout
    bytes_accessed = (B * m_pad * c4 * 2 + kk_cp * cout * 2
                      + B * m_out * cout * 2 + cout * 4)

    out = pl.pallas_call(
        functools.partial(_downblock_kernel, q_cols=q_cols,
                          negative_slope=negative_slope),
        out_shape=jax.ShapeDtypeStruct((B, m_out, cout), jnp.bfloat16),
        grid_spec=pltpu.PrefetchScalarGridSpec(
            num_scalar_prefetch=0,
            grid=(B,),
            in_specs=[
                pl.BlockSpec((None, m_pad, c4), lambda b: (b, 0, 0)),
                pl.BlockSpec((kk_cp, cout), lambda b: (0, 0)),   # resident, fetched once
                pl.BlockSpec((1, cout), lambda b: (0, 0)),
            ],
            out_specs=pl.BlockSpec((None, m_out, cout), lambda b: (b, 0, 0)),
        ),
        compiler_params=pltpu.CompilerParams(
            dimension_semantics=("parallel",),
            vmem_limit_bytes=_VMEM_LIMIT,
        ),
        cost_estimate=pl.CostEstimate(flops=int(flops), transcendentals=0,
                                      bytes_accessed=int(bytes_accessed)),
    )(ph, wmat, bias)

    # drop the one garbage column per output row (ow' == Q-1)
    return out.reshape(B, ho, q_cols, cout)[:, :, :wo, :]


# ----------------------------------------------------------------------------
# Pallas kernel 2: Cout=1 logits head (Conv2d(C,1,4,stride=1,pad=2)), fused gather,
# lane-dense (Ho, Wo) output with W in the lane dim (no (M,1) masked stores).
# ----------------------------------------------------------------------------
def _head_kernel(x_ref, w_ref, b_ref, o_ref):
    ho, wo = o_ref.shape
    acc = None
    for i in range(_KSIZE):
        for j in range(_KSIZE):
            xs = x_ref[i:i + ho, j:j + wo, :].astype(jnp.float32)      # (ho, wo, Cp)
            t = i * _KSIZE + j
            wt = w_ref[t:t + 1, :].astype(jnp.float32)                 # (1, Cp)
            term = jnp.sum(xs * wt, axis=-1)                           # (ho, wo)
            acc = term if acc is None else acc + term
    o_ref[...] = acc + b_ref[...]


def logits_head(feat, wmat, bias):
    """Conv2d(C, 1, ksize=4, stride=1, pad=2).  feat: (B, H, W, C) -> (B, H+1, W+1, 1)."""
    B, H, W, C = feat.shape
    cp = wmat.shape[1]
    ho, wo = H + 1, W + 1
    hp, wp = H + 2 * _PAD, W + 2 * _PAD
    xb = feat.astype(jnp.bfloat16)
    if C < cp:
        xb = jnp.pad(xb, ((0, 0), (0, 0), (0, 0), (0, cp - C)))
    xb = jnp.pad(xb, ((0, 0), (_PAD, _PAD), (_PAD, _PAD), (0, 0)))

    out = pl.pallas_call(
        _head_kernel,
        out_shape=jax.ShapeDtypeStruct((B, ho, wo), jnp.float32),
        grid_spec=pltpu.PrefetchScalarGridSpec(
            num_scalar_prefetch=0,
            grid=(B,),
            in_specs=[
                pl.BlockSpec((None, hp, wp, cp), lambda b: (b, 0, 0, 0)),
                pl.BlockSpec((_KSIZE * _KSIZE, cp), lambda b: (0, 0)),
                pl.BlockSpec((1, 1), lambda b: (0, 0)),
            ],
            out_specs=pl.BlockSpec((None, ho, wo), lambda b: (b, 0, 0)),
        ),
        compiler_params=pltpu.CompilerParams(
            dimension_semantics=("parallel",),
            vmem_limit_bytes=_VMEM_LIMIT,
        ),
    )(xb, wmat, bias)
    return out[..., None]                                               # (B, ho, wo, 1)


# ----------------------------------------------------------------------------
# Pallas kernel 3: separable Gaussian blur fused with stride-s decimation (VPU),
# layout (B*C, H, W) so W is the lane dim; grid over B*C planes ("parallel").
# ----------------------------------------------------------------------------
def _blur_down_kernel(ph_ref, o_ref, *, g, s):
    """ph_ref: (s*s, Hs, Ws) f32 with ph[di*s+dj, p, q] = xpad[s*p+di, s*q+dj].
    o_ref: (ho, wo) with out[oh, ow] = sum_{i,j} g[i] g[j] xpad[s*oh+i, s*ow+j]."""
    ho, wo = o_ref.shape
    k = len(g)
    rowsums = []
    for di in range(s):                                  # W pass, only at strided columns
        acc = None
        for j in range(k):
            dj, off = j % s, j // s
            v = ph_ref[di * s + dj, :, off:off + wo]     # (Hs, wo)
            term = g[j] * v
            acc = term if acc is None else acc + term
        rowsums.append(acc)
    out = None
    for i in range(k):                                   # H pass, only at strided rows
        di, off = i % s, i // s
        v = rowsums[di][off:off + ho, :]                 # (ho, wo)
        term = g[i] * v
        out = term if out is None else out + term
    o_ref[...] = out


def _gaussian_1d(kernel_size, sigma):
    ax = np.arange(kernel_size, dtype=np.float64)
    mean = (kernel_size - 1) / 2.0
    g = np.exp(-((ax - mean) ** 2) / (2.0 * sigma ** 2))
    return (g / g.sum()).astype(np.float32)


def anti_alias_downsample(x, inv_scale):
    """AntiAliasDownsample2d(scale = 1/inv_scale).  x: (B, H, W, C) f32 NHWC."""
    if inv_scale == 1:
        return x
    s = int(inv_scale)
    sigma = (inv_scale - 1) / 2.0
    ksize = 2 * round(sigma * 4) + 1
    pad = ksize // 2                                     # == max(get_padding_for_same), odd ksize
    g = tuple(float(v) for v in _gaussian_1d(ksize, sigma))

    B, H, W, C = x.shape
    ho, wo = -(-H // s), -(-W // s)                      # matches out[:, :, ::s, ::s]
    n = B * C
    xn = jnp.transpose(x, (0, 3, 1, 2)).reshape(n, H, W)
    hp = _round_up(H + 2 * pad, s)
    wp = _round_up(W + 2 * pad, s)
    xp = jnp.pad(xn, ((0, 0), (pad, hp - H - pad), (pad, wp - W - pad)))
    # stride-s phase decomposition; kernel indices never reach the round-up padding.
    ph = jnp.stack([xp[:, di::s, dj::s] for di in range(s) for dj in range(s)], axis=1)
    hs, ws = hp // s, wp // s

    out = pl.pallas_call(
        functools.partial(_blur_down_kernel, g=g, s=s),
        out_shape=jax.ShapeDtypeStruct((n, ho, wo), jnp.float32),
        grid_spec=pltpu.PrefetchScalarGridSpec(
            num_scalar_prefetch=0,
            grid=(n,),
            in_specs=[pl.BlockSpec((None, s * s, hs, ws), lambda i: (i, 0, 0, 0))],
            out_specs=pl.BlockSpec((None, ho, wo), lambda i: (i, 0, 0)),
        ),
        compiler_params=pltpu.CompilerParams(
            dimension_semantics=("parallel",),
            vmem_limit_bytes=_VMEM_LIMIT,
        ),
    )(ph)
    return jnp.transpose(out.reshape(B, C, ho, wo), (0, 2, 3, 1))


# ----------------------------------------------------------------------------
# Parameters (pre-packed / channel-padded / pre-cast to bf16 once at init)
# ----------------------------------------------------------------------------
def _disc_channels(num_blocks, shrink_ratio):
    nf = max(int(BASE_CHNS * shrink_ratio), 16)
    return [1 + 3 + 1] + [min(nf * 2 ** i, MAX_CHNS) for i in range(num_blocks)]


def _pack_downblock_weight(w):
    """w: (4, 4, cin, cout) HWIO -> (16*Cp, cout) bf16, rows ordered (a, b2, di, dj, c)."""
    kh, kw, cin, cout = w.shape
    cp = _round_up(cin, 8)
    w = jnp.pad(w, ((0, 0), (0, 0), (0, cp - cin), (0, 0)))
    w = w.reshape(2, 2, 2, 2, cp, cout).transpose(0, 2, 1, 3, 4, 5)   # (a, b2, di, dj, c, o)
    return w.reshape(_KSIZE * _KSIZE * cp, cout).astype(jnp.bfloat16)


def _pack_head_weight(w):
    """w: (4, 4, cin, 1) -> (16, Cp) bf16, row t = i*4 + j."""
    kh, kw, cin, _ = w.shape
    cp = _round_up(cin, 8)
    w = jnp.pad(w, ((0, 0), (0, 0), (0, cp - cin), (0, 0)))
    return w.reshape(_KSIZE * _KSIZE, cp).astype(jnp.bfloat16)


def init_discriminator_params(key, logits_layers, num_blocks=4, shrink_ratio=1):
    chns = _disc_channels(num_blocks, shrink_ratio)
    params = {"blocks": [], "heads": []}
    for i in range(num_blocks):
        key, kw_, kb_ = jax.random.split(key, 3)
        cin, cout = chns[i], chns[i + 1]
        scale = 1.0 / np.sqrt(cin * _KSIZE * _KSIZE)
        w = jax.random.normal(kw_, (_KSIZE, _KSIZE, cin, cout), jnp.float32) * scale
        params["blocks"].append({
            "w": _pack_downblock_weight(w),
            "b": jax.random.normal(kb_, (1, cout), jnp.float32) * 0.01,
        })
    for li in logits_layers:
        assert li < 0, "logits_layer index should be negative, counting backwards."
        cin = chns[li]
        key, kw_, kb_ = jax.random.split(key, 3)
        scale = 1.0 / np.sqrt(cin * _KSIZE * _KSIZE)
        w = jax.random.normal(kw_, (_KSIZE, _KSIZE, cin, 1), jnp.float32) * scale
        params["heads"].append({
            "w": _pack_head_weight(w),
            "b": jax.random.normal(kb_, (1, 1), jnp.float32) * 0.01,
        })
    return params


# ----------------------------------------------------------------------------
# Discriminator / MultiScaleDiscriminator forward
# ----------------------------------------------------------------------------
def discriminator_forward(params, xc, logits_layers):
    """xc: already-concatenated [x, condition] NHWC.  dropout=False -> no-op."""
    out = xc
    feats = []
    for blk in params["blocks"]:
        out = downblock(out, blk["w"], blk["b"], negative_slope=0.2)
        feats.append(out)
    logits = [logits_head(feats[j], head["w"], head["b"])
              for head, j in zip(params["heads"], logits_layers)]
    return feats, logits


def multiscale_discriminator_forward(params_by_scale, x, condition, *,
                                     scales, logits_layers):
    # concat once (condition detached); blur+decimate the concatenation once per scale.
    xc = jnp.concatenate([x, jax.lax.stop_gradient(condition)], axis=-1)
    all_feats, all_logits = [], []
    for scale_name in scales:
        inv = int(scale_name.replace("x", ""))
        xc_s = anti_alias_downsample(xc, inv)
        feats_s, logits_s = discriminator_forward(
            params_by_scale[scale_name], xc_s, logits_layers)
        all_feats += feats_s
        all_logits += logits_s
    return all_feats, all_logits


# ----------------------------------------------------------------------------
if __name__ == "__main__":
    key = jax.random.PRNGKey(0)
    kx, kc, kp = jax.random.split(key, 3)

    B, H, W = 2, 16, 16
    # PyTorch-style NCHW inputs: image (3 ch) + condition heatmaps (2 ch) -> 5 input ch
    x_nchw = jax.random.normal(kx, (B, 3, H, W), jnp.float32)
    cond_nchw = jax.random.normal(kc, (B, 2, H, W), jnp.float32)

    # transpose to the kernels' NHWC layout at the wrapper boundary
    x = jnp.transpose(x_nchw, (0, 2, 3, 1))
    condition = jnp.transpose(cond_nchw, (0, 2, 3, 1))

    scales = ("x1", "x2")
    logits_layers = (-1,)
    num_blocks = 4

    scale_keys = jax.random.split(kp, len(scales))
    params_by_scale = {
        s: init_discriminator_params(k, logits_layers, num_blocks=num_blocks,
                                     shrink_ratio=1)
        for s, k in zip(scales, scale_keys)
    }

    fwd = jax.jit(functools.partial(multiscale_discriminator_forward,
                                    scales=scales, logits_layers=logits_layers))
    feats, logits = fwd(params_by_scale, x, condition)

    for t in feats + logits:
        jax.block_until_ready(t)

    print("KERNEL_OK")
</pallas_src>

<mosaic_0001>
module attributes {stable_mosaic.version = 11 : i64} {
  func.func @_downblock_kernel(%arg0: i32, %arg1: memref<1x104x32xbf16, #tpu.memory_space<vmem>>, %arg2: memref<128x32xbf16, #tpu.memory_space<vmem>>, %arg3: memref<1x32xf32, #tpu.memory_space<vmem>>, %arg4: memref<1x90x32xbf16, #tpu.memory_space<vmem>>) attributes {dimension_semantics = [#tpu.dimension_semantics<parallel>], iteration_bounds = array<i64: 2>, scalar_prefetch = 0 : i64, scratch_operands = 0 : i64, tpu.core_type = #tpu.core_type<tc>, window_params = [{transform_indices = @transform_0, window_bounds = array<i64: 1, 104, 32>}, {pipeline_mode = #tpu.pipeline_mode<synchronous>, transform_indices = @transform_1, window_bounds = array<i64: 128, 32>}, {pipeline_mode = #tpu.pipeline_mode<synchronous>, transform_indices = @transform_2, window_bounds = array<i64: 1, 32>}, {transform_indices = @transform_3, window_bounds = array<i64: 1, 90, 32>}]} {
    %c0 = arith.constant 0 : index
    %c0_0 = arith.constant 0 : index
    %c0_1 = arith.constant 0 : index
    %0 = vector.load %arg1[%c0, %c0_0, %c0_1] : memref<1x104x32xbf16, #tpu.memory_space<vmem>>, vector<1x90x32xbf16>
    %1 = vector.shape_cast %0 : vector<1x90x32xbf16> to vector<90x32xbf16>
    %c0_2 = arith.constant 0 : index
    %c0_3 = arith.constant 0 : index
    %2 = vector.load %arg2[%c0_2, %c0_3] : memref<128x32xbf16, #tpu.memory_space<vmem>>, vector<32x32xbf16>
    %cst = arith.constant dense<0.000000e+00> : vector<90x32xf32>
    %3 = tpu.matmul %1, %2, %cst {dimension_numbers = #tpu.dot_dimension_numbers<[1], [0], [0], [1], [0, 0, 1, 1], [], []>} : vector<90x32xbf16>, vector<32x32xbf16>, vector<90x32xf32> -> vector<90x32xf32>
    %c0_4 = arith.constant 0 : index
    %c1 = arith.constant 1 : index
    %c0_5 = arith.constant 0 : index
    %4 = vector.load %arg1[%c0_4, %c1, %c0_5] : memref<1x104x32xbf16, #tpu.memory_space<vmem>>, vector<1x90x32xbf16>
    %5 = vector.shape_cast %4 : vector<1x90x32xbf16> to vector<90x32xbf16>
    %c32 = arith.constant 32 : index
    %c0_6 = arith.constant 0 : index
    %6 = vector.load %arg2[%c32, %c0_6] : memref<128x32xbf16, #tpu.memory_space<vmem>>, vector<32x32xbf16>
    %cst_7 = arith.constant dense<0.000000e+00> : vector<90x32xf32>
    %7 = tpu.matmul %5, %6, %cst_7 {dimension_numbers = #tpu.dot_dimension_numbers<[1], [0], [0], [1], [0, 0, 1, 1], [], []>} : vector<90x32xbf16>, vector<32x32xbf16>, vector<90x32xf32> -> vector<90x32xf32>
    %8 = arith.addf %3, %7 : vector<90x32xf32>
    %c0_8 = arith.constant 0 : index
    %c10 = arith.constant 10 : index
    %c0_9 = arith.constant 0 : index
    %9 = vector.load %arg1[%c0_8, %c10, %c0_9] : memref<1x104x32xbf16, #tpu.memory_space<vmem>>, vector<1x90x32xbf16>
    %10 = vector.shape_cast %9 : vector<1x90x32xbf16> to vector<90x32xbf16>
    %c64 = arith.constant 64 : index
    %c0_10 = arith.constant 0 : index
    %11 = vector.load %arg2[%c64, %c0_10] : memref<128x32xbf16, #tpu.memory_space<vmem>>, vector<32x32xbf16>
    %cst_11 = arith.constant dense<0.000000e+00> : vector<90x32xf32>
    %12 = tpu.matmul %10, %11, %cst_11 {dimension_numbers = #tpu.dot_dimension_numbers<[1], [0], [0], [1], [0, 0, 1, 1], [], []>} : vector<90x32xbf16>, vector<32x32xbf16>, vector<90x32xf32> -> vector<90x32xf32>
    %13 = arith.addf %8, %12 : vector<90x32xf32>
    %c0_12 = arith.constant 0 : index
    %c11 = arith.constant 11 : index
    %c0_13 = arith.constant 0 : index
    %14 = vector.load %arg1[%c0_12, %c11, %c0_13] : memref<1x104x32xbf16, #tpu.memory_space<vmem>>, vector<1x90x32xbf16>
    %15 = vector.shape_cast %14 : vector<1x90x32xbf16> to vector<90x32xbf16>
    %c96 = arith.constant 96 : index
    %c0_14 = arith.constant 0 : index
    %16 = vector.load %arg2[%c96, %c0_14] : memref<128x32xbf16, #tpu.memory_space<vmem>>, vector<32x32xbf16>
    %cst_15 = arith.constant dense<0.000000e+00> : vector<90x32xf32>
    %17 = tpu.matmul %15, %16, %cst_15 {dimension_numbers = #tpu.dot_dimension_numbers<[1], [0], [0], [1], [0, 0, 1, 1], [], []>} : vector<90x32xbf16>, vector<32x32xbf16>, vector<90x32xf32> -> vector<90x32xf32>
    %18 = arith.addf %13, %17 : vector<90x32xf32>
    %c0_16 = arith.constant 0 : index
    %c0_17 = arith.constant 0 : index
    %19 = vector.load %arg3[%c0_16, %c0_17] : memref<1x32xf32, #tpu.memory_space<vmem>>, vector<1x32xf32>
    %20 = vector.broadcast %19 : vector<1x32xf32> to vector<90x32xf32>
    %21 = arith.addf %18, %20 : vector<90x32xf32>
    %cst_18 = arith.constant 0.000000e+00 : f32
    %22 = vector.broadcast %cst_18 : f32 to vector<90x32xf32>
    %23 = arith.cmpf oge, %21, %22 : vector<90x32xf32>
    %cst_19 = arith.constant 2.000000e-01 : f32
    %24 = vector.broadcast %cst_19 : f32 to vector<90x32xf32>
    %25 = arith.mulf %24, %21 : vector<90x32xf32>
    %26 = arith.select %23, %21, %25 : vector<90x32xi1>, vector<90x32xf32>
    %27 = arith.truncf %26 : vector<90x32xf32> to vector<90x32xbf16>
    %c0_20 = arith.constant 0 : index
    %c0_21 = arith.constant 0 : index
    %c0_22 = arith.constant 0 : index
    %28 = vector.load %arg4[%c0_20, %c0_21, %c0_22] : memref<1x90x32xbf16, #tpu.memory_space<vmem>>, vector<1x90x32xbf16>
    %29 = vector.shape_cast %28 : vector<1x90x32xbf16> to vector<90x32xbf16>
    %30 = vector.shape_cast %27 : vector<90x32xbf16> to vector<1x90x32xbf16>
    tpu.vector_store %arg4[%c0_20, %c0_21, %c0_22], %30 {strides = array<i32>} : memref<1x90x32xbf16, #tpu.memory_space<vmem>>, vector<1x90x32xbf16>,
    return
  }
  func.func @transform_0(%arg0: i32) -> (i32, i32, i32) {
    %c0_i32 = arith.constant 0 : i32
    %c0_i32_0 = arith.constant 0 : i32
    %c0_i32_1 = arith.constant 0 : i32
    return %arg0, %c0_i32, %c0_i32_0 : i32, i32, i32
  }
  func.func @transform_1(%arg0: i32) -> (i32, i32) {
    %c0_i32 = arith.constant 0 : i32
    %c0_i32_0 = arith.constant 0 : i32
    %c0_i32_1 = arith.constant 0 : i32
    return %c0_i32, %c0_i32_0 : i32, i32
  }
  func.func @transform_2(%arg0: i32) -> (i32, i32) {
    %c0_i32 = arith.constant 0 : i32
    %c0_i32_0 = arith.constant 0 : i32
    %c0_i32_1 = arith.constant 0 : i32
    return %c0_i32, %c0_i32_0 : i32, i32
  }
  func.func @transform_3(%arg0: i32) -> (i32, i32, i32) {
    %c0_i32 = arith.constant 0 : i32
    %c0_i32_0 = arith.constant 0 : i32
    %c0_i32_1 = arith.constant 0 : i32
    return %arg0, %c0_i32, %c0_i32_0 : i32, i32, i32
  }
}

module attributes {stable_mosaic.version = 11 : i64} {
  func.func @_downblock_kernel(%arg0: i32, %arg1: memref<1x40x128xbf16, #tpu.memory_space<vmem>>, %arg2: memref<512x64xbf16, #tpu.memory_space<vmem>>, %arg3: memref<1x64xf32, #tpu.memory_space<vmem>>, %arg4: memref<1x30x64xbf16, #tpu.memory_space<vmem>>) attributes {dimension_semantics = [#tpu.dimension_semantics<parallel>], iteration_bounds = array<i64: 2>, scalar_prefetch = 0 : i64, scratch_operands = 0 : i64, tpu.core_type = #tpu.core_type<tc>, window_params = [{transform_indices = @transform_0, window_bounds = array<i64: 1, 40, 128>}, {pipeline_mode = #tpu.pipeline_mode<synchronous>, transform_indices = @transform_1, window_bounds = array<i64: 512, 64>}, {pipeline_mode = #tpu.pipeline_mode<synchronous>, transform_indices = @transform_2, window_bounds = array<i64: 1, 64>}, {transform_indices = @transform_3, window_bounds = array<i64: 1, 30, 64>}]} {
    %c0 = arith.constant 0 : index
    %c0_0 = arith.constant 0 : index
    %c0_1 = arith.constant 0 : index
    %0 = vector.load %arg1[%c0, %c0_0, %c0_1] : memref<1x40x128xbf16, #tpu.memory_space<vmem>>, vector<1x30x128xbf16>
    %1 = vector.shape_cast %0 : vector<1x30x128xbf16> to vector<30x128xbf16>
    %c0_2 = arith.constant 0 : index
    %c0_3 = arith.constant 0 : index
    %2 = vector.load %arg2[%c0_2, %c0_3] : memref<512x64xbf16, #tpu.memory_space<vmem>>, vector<128x64xbf16>
    %cst = arith.constant dense<0.000000e+00> : vector<30x64xf32>
    %3 = tpu.matmul %1, %2, %cst {dimension_numbers = #tpu.dot_dimension_numbers<[1], [0], [0], [1], [0, 0, 1, 1], [], []>} : vector<30x128xbf16>, vector<128x64xbf16>, vector<30x64xf32> -> vector<30x64xf32>
    %c0_4 = arith.constant 0 : index
    %c1 = arith.constant 1 : index
    %c0_5 = arith.constant 0 : index
    %4 = vector.load %arg1[%c0_4, %c1, %c0_5] : memref<1x40x128xbf16, #tpu.memory_space<vmem>>, vector<1x30x128xbf16>
    %5 = vector.shape_cast %4 : vector<1x30x128xbf16> to vector<30x128xbf16>
    %c128 = arith.constant 128 : index
    %c0_6 = arith.constant 0 : index
    %6 = vector.load %arg2[%c128, %c0_6] : memref<512x64xbf16, #tpu.memory_space<vmem>>, vector<128x64xbf16>
    %cst_7 = arith.constant dense<0.000000e+00> : vector<30x64xf32>
    %7 = tpu.matmul %5, %6, %cst_7 {dimension_numbers = #tpu.dot_dimension_numbers<[1], [0], [0], [1], [0, 0, 1, 1], [], []>} : vector<30x128xbf16>, vector<128x64xbf16>, vector<30x64xf32> -> vector<30x64xf32>
    %8 = arith.addf %3, %7 : vector<30x64xf32>
    %c0_8 = arith.constant 0 : index
    %c6 = arith.constant 6 : index
    %c0_9 = arith.constant 0 : index
    %9 = vector.load %arg1[%c0_8, %c6, %c0_9] : memref<1x40x128xbf16, #tpu.memory_space<vmem>>, vector<1x30x128xbf16>
    %10 = vector.shape_cast %9 : vector<1x30x128xbf16> to vector<30x128xbf16>
    %c256 = arith.constant 256 : index
    %c0_10 = arith.constant 0 : index
    %11 = vector.load %arg2[%c256, %c0_10] : memref<512x64xbf16, #tpu.memory_space<vmem>>, vector<128x64xbf16>
    %cst_11 = arith.constant dense<0.000000e+00> : vector<30x64xf32>
    %12 = tpu.matmul %10, %11, %cst_11 {dimension_numbers = #tpu.dot_dimension_numbers<[1], [0], [0], [1], [0, 0, 1, 1], [], []>} : vector<30x128xbf16>, vector<128x64xbf16>, vector<30x64xf32> -> vector<30x64xf32>
    %13 = arith.addf %8, %12 : vector<30x64xf32>
    %c0_12 = arith.constant 0 : index
    %c7 = arith.constant 7 : index
    %c0_13 = arith.constant 0 : index
    %14 = vector.load %arg1[%c0_12, %c7, %c0_13] : memref<1x40x128xbf16, #tpu.memory_space<vmem>>, vector<1x30x128xbf16>
    %15 = vector.shape_cast %14 : vector<1x30x128xbf16> to vector<30x128xbf16>
    %c384 = arith.constant 384 : index
    %c0_14 = arith.constant 0 : index
    %16 = vector.load %arg2[%c384, %c0_14] : memref<512x64xbf16, #tpu.memory_space<vmem>>, vector<128x64xbf16>
    %cst_15 = arith.constant dense<0.000000e+00> : vector<30x64xf32>
    %17 = tpu.matmul %15, %16, %cst_15 {dimension_numbers = #tpu.dot_dimension_numbers<[1], [0], [0], [1], [0, 0, 1, 1], [], []>} : vector<30x128xbf16>, vector<128x64xbf16>, vector<30x64xf32> -> vector<30x64xf32>
    %18 = arith.addf %13, %17 : vector<30x64xf32>
    %c0_16 = arith.constant 0 : index
    %c0_17 = arith.constant 0 : index
    %19 = vector.load %arg3[%c0_16, %c0_17] : memref<1x64xf32, #tpu.memory_space<vmem>>, vector<1x64xf32>
    %20 = vector.broadcast %19 : vector<1x64xf32> to vector<30x64xf32>
    %21 = arith.addf %18, %20 : vector<30x64xf32>
    %cst_18 = arith.constant 0.000000e+00 : f32
    %22 = vector.broadcast %cst_18 : f32 to vector<30x64xf32>
    %23 = arith.cmpf oge, %21, %22 : vector<30x64xf32>
    %cst_19 = arith.constant 2.000000e-01 : f32
    %24 = vector.broadcast %cst_19 : f32 to vector<30x64xf32>
    %25 = arith.mulf %24, %21 : vector<30x64xf32>
    %26 = arith.select %23, %21, %25 : vector<30x64xi1>, vector<30x64xf32>
    %27 = arith.truncf %26 : vector<30x64xf32> to vector<30x64xbf16>
    %c0_20 = arith.constant 0 : index
    %c0_21 = arith.constant 0 : index
    %c0_22 = arith.constant 0 : index
    %28 = vector.load %arg4[%c0_20, %c0_21, %c0_22] : memref<1x30x64xbf16, #tpu.memory_space<vmem>>, vector<1x30x64xbf16>
    %29 = vector.shape_cast %28 : vector<1x30x64xbf16> to vector<30x64xbf16>
    %30 = vector.shape_cast %27 : vector<30x64xbf16> to vector<1x30x64xbf16>
    tpu.vector_store %arg4[%c0_20, %c0_21, %c0_22], %30 {strides = array<i32>} : memref<1x30x64xbf16, #tpu.memory_space<vmem>>, vector<1x30x64xbf16>,
    return
  }
  func.func @transform_0(%arg0: i32) -> (i32, i32, i32) {
    %c0_i32 = arith.constant 0 : i32
    %c0_i32_0 = arith.constant 0 : i32
    %c0_i32_1 = arith.constant 0 : i32
    return %arg0, %c0_i32, %c0_i32_0 : i32, i32, i32
  }
  func.func @transform_1(%arg0: i32) -> (i32, i32) {
    %c0_i32 = arith.constant 0 : i32
    %c0_i32_0 = arith.constant 0 : i32
    %c0_i32_1 = arith.constant 0 : i32
    return %c0_i32, %c0_i32_0 : i32, i32
  }
  func.func @transform_2(%arg0: i32) -> (i32, i32) {
    %c0_i32 = arith.constant 0 : i32
    %c0_i32_0 = arith.constant 0 : i32
    %c0_i32_1 = arith.constant 0 : i32
    return %c0_i32, %c0_i32_0 : i32, i32
  }
  func.func @transform_3(%arg0: i32) -> (i32, i32, i32) {
    %c0_i32 = arith.constant 0 : i32
    %c0_i32_0 = arith.constant 0 : i32
    %c0_i32_1 = arith.constant 0 : i32
    return %arg0, %c0_i32, %c0_i32_0 : i32, i32, i32
  }
}

module attributes {stable_mosaic.version = 11 : i64} {
  func.func @_downblock_kernel(%arg0: i32, %arg1: memref<1x24x256xbf16, #tpu.memory_space<vmem>>, %arg2: memref<1024x128xbf16, #tpu.memory_space<vmem>>, %arg3: memref<1x128xf32, #tpu.memory_space<vmem>>, %arg4: memref<1x12x128xbf16, #tpu.memory_space<vmem>>) attributes {dimension_semantics = [#tpu.dimension_semantics<parallel>], iteration_bounds = array<i64: 2>, scalar_prefetch = 0 : i64, scratch_operands = 0 : i64, tpu.core_type = #tpu.core_type<tc>, window_params = [{transform_indices = @transform_0, window_bounds = array<i64: 1, 24, 256>}, {pipeline_mode = #tpu.pipeline_mode<synchronous>, transform_indices = @transform_1, window_bounds = array<i64: 1024, 128>}, {pipeline_mode = #tpu.pipeline_mode<synchronous>, transform_indices = @transform_2, window_bounds = array<i64: 1, 128>}, {transform_indices = @transform_3, window_bounds = array<i64: 1, 12, 128>}]} {
    %c0 = arith.constant 0 : index
    %c0_0 = arith.constant 0 : index
    %c0_1 = arith.constant 0 : index
    %0 = vector.load %arg1[%c0, %c0_0, %c0_1] : memref<1x24x256xbf16, #tpu.memory_space<vmem>>, vector<1x12x256xbf16>
    %1 = vector.shape_cast %0 : vector<1x12x256xbf16> to vector<12x256xbf16>
    %c0_2 = arith.constant 0 : index
    %c0_3 = arith.constant 0 : index
    %2 = vector.load %arg2[%c0_2, %c0_3] : memref<1024x128xbf16, #tpu.memory_space<vmem>>, vector<256x128xbf16>
    %cst = arith.constant dense<0.000000e+00> : vector<12x128xf32>
    %3 = tpu.matmul %1, %2, %cst {dimension_numbers = #tpu.dot_dimension_numbers<[1], [0], [0], [1], [0, 0, 1, 1], [], []>} : vector<12x256xbf16>, vector<256x128xbf16>, vector<12x128xf32> -> vector<12x128xf32>
    %c0_4 = arith.constant 0 : index
    %c1 = arith.constant 1 : index
    %c0_5 = arith.constant 0 : index
    %4 = vector.load %arg1[%c0_4, %c1, %c0_5] : memref<1x24x256xbf16, #tpu.memory_space<vmem>>, vector<1x12x256xbf16>
    %5 = vector.shape_cast %4 : vector<1x12x256xbf16> to vector<12x256xbf16>
    %c256 = arith.constant 256 : index
    %c0_6 = arith.constant 0 : index
    %6 = vector.load %arg2[%c256, %c0_6] : memref<1024x128xbf16, #tpu.memory_space<vmem>>, vector<256x128xbf16>
    %cst_7 = arith.constant dense<0.000000e+00> : vector<12x128xf32>
    %7 = tpu.matmul %5, %6, %cst_7 {dimension_numbers = #tpu.dot_dimension_numbers<[1], [0], [0], [1], [0, 0, 1, 1], [], []>} : vector<12x256xbf16>, vector<256x128xbf16>, vector<12x128xf32> -> vector<12x128xf32>
    %8 = arith.addf %3, %7 : vector<12x128xf32>
    %c0_8 = arith.constant 0 : index
    %c4 = arith.constant 4 : index
    %c0_9 = arith.constant 0 : index
    %9 = vector.load %arg1[%c0_8, %c4, %c0_9] : memref<1x24x256xbf16, #tpu.memory_space<vmem>>, vector<1x12x256xbf16>
    %10 = vector.shape_cast %9 : vector<1x12x256xbf16> to vector<12x256xbf16>
    %c512 = arith.constant 512 : index
    %c0_10 = arith.constant 0 : index
    %11 = vector.load %arg2[%c512, %c0_10] : memref<1024x128xbf16, #tpu.memory_space<vmem>>, vector<256x128xbf16>
    %cst_11 = arith.constant dense<0.000000e+00> : vector<12x128xf32>
    %12 = tpu.matmul %10, %11, %cst_11 {dimension_numbers = #tpu.dot_dimension_numbers<[1], [0], [0], [1], [0, 0, 1, 1], [], []>} : vector<12x256xbf16>, vector<256x128xbf16>, vector<12x128xf32> -> vector<12x128xf32>
    %13 = arith.addf %8, %12 : vector<12x128xf32>
    %c0_12 = arith.constant 0 : index
    %c5 = arith.constant 5 : index
    %c0_13 = arith.constant 0 : index
    %14 = vector.load %arg1[%c0_12, %c5, %c0_13] : memref<1x24x256xbf16, #tpu.memory_space<vmem>>, vector<1x12x256xbf16>
    %15 = vector.shape_cast %14 : vector<1x12x256xbf16> to vector<12x256xbf16>
    %c768 = arith.constant 768 : index
    %c0_14 = arith.constant 0 : index
    %16 = vector.load %arg2[%c768, %c0_14] : memref<1024x128xbf16, #tpu.memory_space<vmem>>, vector<256x128xbf16>
    %cst_15 = arith.constant dense<0.000000e+00> : vector<12x128xf32>
    %17 = tpu.matmul %15, %16, %cst_15 {dimension_numbers = #tpu.dot_dimension_numbers<[1], [0], [0], [1], [0, 0, 1, 1], [], []>} : vector<12x256xbf16>, vector<256x128xbf16>, vector<12x128xf32> -> vector<12x128xf32>
    %18 = arith.addf %13, %17 : vector<12x128xf32>
    %c0_16 = arith.constant 0 : index
    %c0_17 = arith.constant 0 : index
    %19 = vector.load %arg3[%c0_16, %c0_17] : memref<1x128xf32, #tpu.memory_space<vmem>>, vector<1x128xf32>
    %20 = vector.broadcast %19 : vector<1x128xf32> to vector<12x128xf32>
    %21 = arith.addf %18, %20 : vector<12x128xf32>
    %cst_18 = arith.constant 0.000000e+00 : f32
    %22 = vector.broadcast %cst_18 : f32 to vector<12x128xf32>
    %23 = arith.cmpf oge, %21, %22 : vector<12x128xf32>
    %cst_19 = arith.constant 2.000000e-01 : f32
    %24 = vector.broadcast %cst_19 : f32 to vector<12x128xf32>
    %25 = arith.mulf %24, %21 : vector<12x128xf32>
    %26 = arith.select %23, %21, %25 : vector<12x128xi1>, vector<12x128xf32>
    %27 = arith.truncf %26 : vector<12x128xf32> to vector<12x128xbf16>
    %c0_20 = arith.constant 0 : index
    %c0_21 = arith.constant 0 : index
    %c0_22 = arith.constant 0 : index
    %28 = vector.load %arg4[%c0_20, %c0_21, %c0_22] : memref<1x12x128xbf16, #tpu.memory_space<vmem>>, vector<1x12x128xbf16>
    %29 = vector.shape_cast %28 : vector<1x12x128xbf16> to vector<12x128xbf16>
    %30 = vector.shape_cast %27 : vector<12x128xbf16> to vector<1x12x128xbf16>
    tpu.vector_store %arg4[%c0_20, %c0_21, %c0_22], %30 {strides = array<i32>} : memref<1x12x128xbf16, #tpu.memory_space<vmem>>, vector<1x12x128xbf16>,
    return
  }
  func.func @transform_0(%arg0: i32) -> (i32, i32, i32) {
    %c0_i32 = arith.constant 0 : i32
    %c0_i32_0 = arith.constant 0 : i32
    %c0_i32_1 = arith.constant 0 : i32
    return %arg0, %c0_i32, %c0_i32_0 : i32, i32, i32
  }
  func.func @transform_1(%arg0: i32) -> (i32, i32) {
    %c0_i32 = arith.constant 0 : i32
    %c0_i32_0 = arith.constant 0 : i32
    %c0_i32_1 = arith.constant 0 : i32
    return %c0_i32, %c0_i32_0 : i32, i32
  }
  func.func @transform_2(%arg0: i32) -> (i32, i32) {
    %c0_i32 = arith.constant 0 : i32
    %c0_i32_0 = arith.constant 0 : i32
    %c0_i32_1 = arith.constant 0 : i32
    return %c0_i32, %c0_i32_0 : i32, i32
  }
  func.func @transform_3(%arg0: i32) -> (i32, i32, i32) {
    %c0_i32 = arith.constant 0 : i32
    %c0_i32_0 = arith.constant 0 : i32
    %c0_i32_1 = arith.constant 0 : i32
    return %arg0, %c0_i32, %c0_i32_0 : i32, i32, i32
  }
}

module attributes {stable_mosaic.version = 11 : i64} {
  func.func @_downblock_kernel(%arg0: i32, %arg1: memref<1x16x512xbf16, #tpu.memory_space<vmem>>, %arg2: memref<2048x256xbf16, #tpu.memory_space<vmem>>, %arg3: memref<1x256xf32, #tpu.memory_space<vmem>>, %arg4: memref<1x6x256xbf16, #tpu.memory_space<vmem>>) attributes {dimension_semantics = [#tpu.dimension_semantics<parallel>], iteration_bounds = array<i64: 2>, scalar_prefetch = 0 : i64, scratch_operands = 0 : i64, tpu.core_type = #tpu.core_type<tc>, window_params = [{transform_indices = @transform_0, window_bounds = array<i64: 1, 16, 512>}, {pipeline_mode = #tpu.pipeline_mode<synchronous>, transform_indices = @transform_1, window_bounds = array<i64: 2048, 256>}, {pipeline_mode = #tpu.pipeline_mode<synchronous>, transform_indices = @transform_2, window_bounds = array<i64: 1, 256>}, {transform_indices = @transform_3, window_bounds = array<i64: 1, 6, 256>}]} {
    %c0 = arith.constant 0 : index
    %c0_0 = arith.constant 0 : index
    %c0_1 = arith.constant 0 : index
    %0 = vector.load %arg1[%c0, %c0_0, %c0_1] : memref<1x16x512xbf16, #tpu.memory_space<vmem>>, vector<1x6x512xbf16>
    %1 = vector.shape_cast %0 : vector<1x6x512xbf16> to vector<6x512xbf16>
    %c0_2 = arith.constant 0 : index
    %c0_3 = arith.constant 0 : index
    %2 = vector.load %arg2[%c0_2, %c0_3] : memref<2048x256xbf16, #tpu.memory_space<vmem>>, vector<512x256xbf16>
    %cst = arith.constant dense<0.000000e+00> : vector<6x256xf32>
    %3 = tpu.matmul %1, %2, %cst {dimension_numbers = #tpu.dot_dimension_numbers<[1], [0], [0], [1], [0, 0, 1, 1], [], []>} : vector<6x512xbf16>, vector<512x256xbf16>, vector<6x256xf32> -> vector<6x256xf32>
    %c0_4 = arith.constant 0 : index
    %c1 = arith.constant 1 : index
    %c0_5 = arith.constant 0 : index
    %4 = vector.load %arg1[%c0_4, %c1, %c0_5] : memref<1x16x512xbf16, #tpu.memory_space<vmem>>, vector<1x6x512xbf16>
    %5 = vector.shape_cast %4 : vector<1x6x512xbf16> to vector<6x512xbf16>
    %c512 = arith.constant 512 : index
    %c0_6 = arith.constant 0 : index
    %6 = vector.load %arg2[%c512, %c0_6] : memref<2048x256xbf16, #tpu.memory_space<vmem>>, vector<512x256xbf16>
    %cst_7 = arith.constant dense<0.000000e+00> : vector<6x256xf32>
    %7 = tpu.matmul %5, %6, %cst_7 {dimension_numbers = #tpu.dot_dimension_numbers<[1], [0], [0], [1], [0, 0, 1, 1], [], []>} : vector<6x512xbf16>, vector<512x256xbf16>, vector<6x256xf32> -> vector<6x256xf32>
    %8 = arith.addf %3, %7 : vector<6x256xf32>
    %c0_8 = arith.constant 0 : index
    %c3 = arith.constant 3 : index
    %c0_9 = arith.constant 0 : index
    %9 = vector.load %arg1[%c0_8, %c3, %c0_9] : memref<1x16x512xbf16, #tpu.memory_space<vmem>>, vector<1x6x512xbf16>
    %10 = vector.shape_cast %9 : vector<1x6x512xbf16> to vector<6x512xbf16>
    %c1024 = arith.constant 1024 : index
    %c0_10 = arith.constant 0 : index
    %11 = vector.load %arg2[%c1024, %c0_10] : memref<2048x256xbf16, #tpu.memory_space<vmem>>, vector<512x256xbf16>
    %cst_11 = arith.constant dense<0.000000e+00> : vector<6x256xf32>
    %12 = tpu.matmul %10, %11, %cst_11 {dimension_numbers = #tpu.dot_dimension_numbers<[1], [0], [0], [1], [0, 0, 1, 1], [], []>} : vector<6x512xbf16>, vector<512x256xbf16>, vector<6x256xf32> -> vector<6x256xf32>
    %13 = arith.addf %8, %12 : vector<6x256xf32>
    %c0_12 = arith.constant 0 : index
    %c4 = arith.constant 4 : index
    %c0_13 = arith.constant 0 : index
    %14 = vector.load %arg1[%c0_12, %c4, %c0_13] : memref<1x16x512xbf16, #tpu.memory_space<vmem>>, vector<1x6x512xbf16>
    %15 = vector.shape_cast %14 : vector<1x6x512xbf16> to vector<6x512xbf16>
    %c1536 = arith.constant 1536 : index
    %c0_14 = arith.constant 0 : index
    %16 = vector.load %arg2[%c1536, %c0_14] : memref<2048x256xbf16, #tpu.memory_space<vmem>>, vector<512x256xbf16>
    %cst_15 = arith.constant dense<0.000000e+00> : vector<6x256xf32>
    %17 = tpu.matmul %15, %16, %cst_15 {dimension_numbers = #tpu.dot_dimension_numbers<[1], [0], [0], [1], [0, 0, 1, 1], [], []>} : vector<6x512xbf16>, vector<512x256xbf16>, vector<6x256xf32> -> vector<6x256xf32>
    %18 = arith.addf %13, %17 : vector<6x256xf32>
    %c0_16 = arith.constant 0 : index
    %c0_17 = arith.constant 0 : index
    %19 = vector.load %arg3[%c0_16, %c0_17] : memref<1x256xf32, #tpu.memory_space<vmem>>, vector<1x256xf32>
    %20 = vector.broadcast %19 : vector<1x256xf32> to vector<6x256xf32>
    %21 = arith.addf %18, %20 : vector<6x256xf32>
    %cst_18 = arith.constant 0.000000e+00 : f32
    %22 = vector.broadcast %cst_18 : f32 to vector<6x256xf32>
    %23 = arith.cmpf oge, %21, %22 : vector<6x256xf32>
    %cst_19 = arith.constant 2.000000e-01 : f32
    %24 = vector.broadcast %cst_19 : f32 to vector<6x256xf32>
    %25 = arith.mulf %24, %21 : vector<6x256xf32>
    %26 = arith.select %23, %21, %25 : vector<6x256xi1>, vector<6x256xf32>
    %27 = arith.truncf %26 : vector<6x256xf32> to vector<6x256xbf16>
    %c0_20 = arith.constant 0 : index
    %c0_21 = arith.constant 0 : index
    %c0_22 = arith.constant 0 : index
    %28 = vector.load %arg4[%c0_20, %c0_21, %c0_22] : memref<1x6x256xbf16, #tpu.memory_space<vmem>>, vector<1x6x256xbf16>
    %29 = vector.shape_cast %28 : vector<1x6x256xbf16> to vector<6x256xbf16>
    %30 = vector.shape_cast %27 : vector<6x256xbf16> to vector<1x6x256xbf16>
    tpu.vector_store %arg4[%c0_20, %c0_21, %c0_22], %30 {strides = array<i32>} : memref<1x6x256xbf16, #tpu.memory_space<vmem>>, vector<1x6x256xbf16>,
    return
  }
  func.func @transform_0(%arg0: i32) -> (i32, i32, i32) {
    %c0_i32 = arith.constant 0 : i32
    %c0_i32_0 = arith.constant 0 : i32
    %c0_i32_1 = arith.constant 0 : i32
    return %arg0, %c0_i32, %c0_i32_0 : i32, i32, i32
  }
  func.func @transform_1(%arg0: i32) -> (i32, i32) {
    %c0_i32 = arith.constant 0 : i32
    %c0_i32_0 = arith.constant 0 : i32
    %c0_i32_1 = arith.constant 0 : i32
    return %c0_i32, %c0_i32_0 : i32, i32
  }
  func.func @transform_2(%arg0: i32) -> (i32, i32) {
    %c0_i32 = arith.constant 0 : i32
    %c0_i32_0 = arith.constant 0 : i32
    %c0_i32_1 = arith.constant 0 : i32
    return %c0_i32, %c0_i32_0 : i32, i32
  }
  func.func @transform_3(%arg0: i32) -> (i32, i32, i32) {
    %c0_i32 = arith.constant 0 : i32
    %c0_i32_0 = arith.constant 0 : i32
    %c0_i32_1 = arith.constant 0 : i32
    return %arg0, %c0_i32, %c0_i32_0 : i32, i32, i32
  }
}

module attributes {stable_mosaic.version = 11 : i64} {
  func.func @_blur_down_kernel(%arg0: i32, %arg1: memref<1x4x10x10xf32, #tpu.memory_space<vmem>>, %arg2: memref<1x8x8xf32, #tpu.memory_space<vmem>>) attributes {dimension_semantics = [#tpu.dimension_semantics<parallel>], iteration_bounds = array<i64: 10>, scalar_prefetch = 0 : i64, scratch_operands = 0 : i64, tpu.core_type = #tpu.core_type<tc>, window_params = [{transform_indices = @transform_0, window_bounds = array<i64: 1, 4, 10, 10>}, {transform_indices = @transform_1, window_bounds = array<i64: 1, 8, 8>}]} {
    %c0 = arith.constant 0 : index
    %c0_0 = arith.constant 0 : index
    %c0_1 = arith.constant 0 : index
    %c0_2 = arith.constant 0 : index
    %0 = vector.load %arg1[%c0, %c0_0, %c0_1, %c0_2] : memref<1x4x10x10xf32, #tpu.memory_space<vmem>>, vector<1x1x10x8xf32>
    %1 = vector.shape_cast %0 : vector<1x1x10x8xf32> to vector<10x8xf32>
    %cst = arith.constant 2.63865077E-4 : f32
    %2 = vector.broadcast %cst : f32 to vector<10x8xf32>
    %3 = arith.mulf %2, %1 : vector<10x8xf32>
    %c0_3 = arith.constant 0 : index
    %c1 = arith.constant 1 : index
    %c0_4 = arith.constant 0 : index
    %c0_5 = arith.constant 0 : index
    %4 = vector.load %arg1[%c0_3, %c1, %c0_4, %c0_5] : memref<1x4x10x10xf32, #tpu.memory_space<vmem>>, vector<1x1x10x8xf32>
    %5 = vector.shape_cast %4 : vector<1x1x10x8xf32> to vector<10x8xf32>
    %cst_6 = arith.constant 0.106450774 : f32
    %6 = vector.broadcast %cst_6 : f32 to vector<10x8xf32>
    %7 = arith.mulf %6, %5 : vector<10x8xf32>
    %8 = arith.addf %3, %7 : vector<10x8xf32>
    %c0_7 = arith.constant 0 : index
    %c0_8 = arith.constant 0 : index
    %c0_9 = arith.constant 0 : index
    %c1_10 = arith.constant 1 : index
    %9 = vector.load %arg1[%c0_7, %c0_8, %c0_9, %c1_10] : memref<1x4x10x10xf32, #tpu.memory_space<vmem>>, vector<1x1x10x8xf32>
    %10 = vector.shape_cast %9 : vector<1x1x10x8xf32> to vector<10x8xf32>
    %cst_11 = arith.constant 0.786570727 : f32
    %11 = vector.broadcast %cst_11 : f32 to vector<10x8xf32>
    %12 = arith.mulf %11, %10 : vector<10x8xf32>
    %13 = arith.addf %8, %12 : vector<10x8xf32>
    %c0_12 = arith.constant 0 : index
    %c1_13 = arith.constant 1 : index
    %c0_14 = arith.constant 0 : index
    %c1_15 = arith.constant 1 : index
    %14 = vector.load %arg1[%c0_12, %c1_13, %c0_14, %c1_15] : memref<1x4x10x10xf32, #tpu.memory_space<vmem>>, vector<1x1x10x8xf32>
    %15 = vector.shape_cast %14 : vector<1x1x10x8xf32> to vector<10x8xf32>
    %cst_16 = arith.constant 0.106450774 : f32
    %16 = vector.broadcast %cst_16 : f32 to vector<10x8xf32>
    %17 = arith.mulf %16, %15 : vector<10x8xf32>
    %18 = arith.addf %13, %17 : vector<10x8xf32>
    %c0_17 = arith.constant 0 : index
    %c0_18 = arith.constant 0 : index
    %c0_19 = arith.constant 0 : index
    %c2 = arith.constant 2 : index
    %19 = vector.load %arg1[%c0_17, %c0_18, %c0_19, %c2] : memref<1x4x10x10xf32, #tpu.memory_space<vmem>>, vector<1x1x10x8xf32>
    %20 = vector.shape_cast %19 : vector<1x1x10x8xf32> to vector<10x8xf32>
    %cst_20 = arith.constant 2.63865077E-4 : f32
    %21 = vector.broadcast %cst_20 : f32 to vector<10x8xf32>
    %22 = arith.mulf %21, %20 : vector<10x8xf32>
    %23 = arith.addf %18, %22 : vector<10x8xf32>
    %c0_21 = arith.constant 0 : index
    %c2_22 = arith.constant 2 : index
    %c0_23 = arith.constant 0 : index
    %c0_24 = arith.constant 0 : index
    %24 = vector.load %arg1[%c0_21, %c2_22, %c0_23, %c0_24] : memref<1x4x10x10xf32, #tpu.memory_space<vmem>>, vector<1x1x10x8xf32>
    %25 = vector.shape_cast %24 : vector<1x1x10x8xf32> to vector<10x8xf32>
    %cst_25 = arith.constant 2.63865077E-4 : f32
    %26 = vector.broadcast %cst_25 : f32 to vector<10x8xf32>
    %27 = arith.mulf %26, %25 : vector<10x8xf32>
    %c0_26 = arith.constant 0 : index
    %c3 = arith.constant 3 : index
    %c0_27 = arith.constant 0 : index
    %c0_28 = arith.constant 0 : index
    %28 = vector.load %arg1[%c0_26, %c3, %c0_27, %c0_28] : memref<1x4x10x10xf32, #tpu.memory_space<vmem>>, vector<1x1x10x8xf32>
    %29 = vector.shape_cast %28 : vector<1x1x10x8xf32> to vector<10x8xf32>
    %cst_29 = arith.constant 0.106450774 : f32
    %30 = vector.broadcast %cst_29 : f32 to vector<10x8xf32>
    %31 = arith.mulf %30, %29 : vector<10x8xf32>
    %32 = arith.addf %27, %31 : vector<10x8xf32>
    %c0_30 = arith.constant 0 : index
    %c2_31 = arith.constant 2 : index
    %c0_32 = arith.constant 0 : index
    %c1_33 = arith.constant 1 : index
    %33 = vector.load %arg1[%c0_30, %c2_31, %c0_32, %c1_33] : memref<1x4x10x10xf32, #tpu.memory_space<vmem>>, vector<1x1x10x8xf32>
    %34 = vector.shape_cast %33 : vector<1x1x10x8xf32> to vector<10x8xf32>
    %cst_34 = arith.constant 0.786570727 : f32
    %35 = vector.broadcast %cst_34 : f32 to vector<10x8xf32>
    %36 = arith.mulf %35, %34 : vector<10x8xf32>
    %37 = arith.addf %32, %36 : vector<10x8xf32>
    %c0_35 = arith.constant 0 : index
    %c3_36 = arith.constant 3 : index
    %c0_37 = arith.constant 0 : index
    %c1_38 = arith.constant 1 : index
    %38 = vector.load %arg1[%c0_35, %c3_36, %c0_37, %c1_38] : memref<1x4x10x10xf32, #tpu.memory_space<vmem>>, vector<1x1x10x8xf32>
    %39 = vector.shape_cast %38 : vector<1x1x10x8xf32> to vector<10x8xf32>
    %cst_39 = arith.constant 0.106450774 : f32
    %40 = vector.broadcast %cst_39 : f32 to vector<10x8xf32>
    %41 = arith.mulf %40, %39 : vector<10x8xf32>
    %42 = arith.addf %37, %41 : vector<10x8xf32>
    %c0_40 = arith.constant 0 : index
    %c2_41 = arith.constant 2 : index
    %c0_42 = arith.constant 0 : index
    %c2_43 = arith.constant 2 : index
    %43 = vector.load %arg1[%c0_40, %c2_41, %c0_42, %c2_43] : memref<1x4x10x10xf32, #tpu.memory_space<vmem>>, vector<1x1x10x8xf32>
    %44 = vector.shape_cast %43 : vector<1x1x10x8xf32> to vector<10x8xf32>
    %cst_44 = arith.constant 2.63865077E-4 : f32
    %45 = vector.broadcast %cst_44 : f32 to vector<10x8xf32>
    %46 = arith.mulf %45, %44 : vector<10x8xf32>
    %47 = arith.addf %42, %46 : vector<10x8xf32>
    %48 = vector.extract_strided_slice %23 {offsets = [0, 0], sizes = [8, 8], strides = [1, 1]} : vector<10x8xf32> to vector<8x8xf32>
    %cst_45 = arith.constant 2.63865077E-4 : f32
    %49 = vector.broadcast %cst_45 : f32 to vector<8x8xf32>
    %50 = arith.mulf %49, %48 : vector<8x8xf32>
    %51 = vector.extract_strided_slice %47 {offsets = [0, 0], sizes = [8, 8], strides = [1, 1]} : vector<10x8xf32> to vector<8x8xf32>
    %cst_46 = arith.constant 0.106450774 : f32
    %52 = vector.broadcast %cst_46 : f32 to vector<8x8xf32>
    %53 = arith.mulf %52, %51 : vector<8x8xf32>
    %54 = arith.addf %50, %53 : vector<8x8xf32>
    %55 = vector.extract_strided_slice %23 {offsets = [1, 0], sizes = [8, 8], strides = [1, 1]} : vector<10x8xf32> to vector<8x8xf32>
    %cst_47 = arith.constant 0.786570727 : f32
    %56 = vector.broadcast %cst_47 : f32 to vector<8x8xf32>
    %57 = arith.mulf %56, %55 : vector<8x8xf32>
    %58 = arith.addf %54, %57 : vector<8x8xf32>
    %59 = vector.extract_strided_slice %47 {offsets = [1, 0], sizes = [8, 8], strides = [1, 1]} : vector<10x8xf32> to vector<8x8xf32>
    %cst_48 = arith.constant 0.106450774 : f32
    %60 = vector.broadcast %cst_48 : f32 to vector<8x8xf32>
    %61 = arith.mulf %60, %59 : vector<8x8xf32>
    %62 = arith.addf %58, %61 : vector<8x8xf32>
    %63 = vector.extract_strided_slice %23 {offsets = [2, 0], sizes = [8, 8], strides = [1, 1]} : vector<10x8xf32> to vector<8x8xf32>
    %cst_49 = arith.constant 2.63865077E-4 : f32
    %64 = vector.broadcast %cst_49 : f32 to vector<8x8xf32>
    %65 = arith.mulf %64, %63 : vector<8x8xf32>
    %66 = arith.addf %62, %65 : vector<8x8xf32>
    %c0_50 = arith.constant 0 : index
    %c0_51 = arith.constant 0 : index
    %c0_52 = arith.constant 0 : index
    %67 = vector.load %arg2[%c0_50, %c0_51, %c0_52] : memref<1x8x8xf32, #tpu.memory_space<vmem>>, vector<1x8x8xf32>
    %68 = vector.shape_cast %67 : vector<1x8x8xf32> to vector<8x8xf32>
    %69 = vector.shape_cast %66 : vector<8x8xf32> to vector<1x8x8xf32>
    tpu.vector_store %arg2[%c0_50, %c0_51, %c0_52], %69 {strides = array<i32>} : memref<1x8x8xf32, #tpu.memory_space<vmem>>, vector<1x8x8xf32>,
    return
  }
  func.func @transform_0(%arg0: i32) -> (i32, i32, i32, i32) {
    %c0_i32 = arith.constant 0 : i32
    %c0_i32_0 = arith.constant 0 : i32
    %c0_i32_1 = arith.constant 0 : i32
    %c0_i32_2 = arith.constant 0 : i32
    return %arg0, %c0_i32, %c0_i32_0, %c0_i32_1 : i32, i32, i32, i32
  }
  func.func @transform_1(%arg0: i32) -> (i32, i32, i32) {
    %c0_i32 = arith.constant 0 : i32
    %c0_i32_0 = arith.constant 0 : i32
    %c0_i32_1 = arith.constant 0 : i32
    return %arg0, %c0_i32, %c0_i32_0 : i32, i32, i32
  }
}

module attributes {stable_mosaic.version = 11 : i64} {
  func.func @_downblock_kernel(%arg0: i32, %arg1: memref<1x40x32xbf16, #tpu.memory_space<vmem>>, %arg2: memref<128x32xbf16, #tpu.memory_space<vmem>>, %arg3: memref<1x32xf32, #tpu.memory_space<vmem>>, %arg4: memref<1x30x32xbf16, #tpu.memory_space<vmem>>) attributes {dimension_semantics = [#tpu.dimension_semantics<parallel>], iteration_bounds = array<i64: 2>, scalar_prefetch = 0 : i64, scratch_operands = 0 : i64, tpu.core_type = #tpu.core_type<tc>, window_params = [{transform_indices = @transform_0, window_bounds = array<i64: 1, 40, 32>}, {pipeline_mode = #tpu.pipeline_mode<synchronous>, transform_indices = @transform_1, window_bounds = array<i64: 128, 32>}, {pipeline_mode = #tpu.pipeline_mode<synchronous>, transform_indices = @transform_2, window_bounds = array<i64: 1, 32>}, {transform_indices = @transform_3, window_bounds = array<i64: 1, 30, 32>}]} {
    %c0 = arith.constant 0 : index
    %c0_0 = arith.constant 0 : index
    %c0_1 = arith.constant 0 : index
    %0 = vector.load %arg1[%c0, %c0_0, %c0_1] : memref<1x40x32xbf16, #tpu.memory_space<vmem>>, vector<1x30x32xbf16>
    %1 = vector.shape_cast %0 : vector<1x30x32xbf16> to vector<30x32xbf16>
    %c0_2 = arith.constant 0 : index
    %c0_3 = arith.constant 0 : index
    %2 = vector.load %arg2[%c0_2, %c0_3] : memref<128x32xbf16, #tpu.memory_space<vmem>>, vector<32x32xbf16>
    %cst = arith.constant dense<0.000000e+00> : vector<30x32xf32>
    %3 = tpu.matmul %1, %2, %cst {dimension_numbers = #tpu.dot_dimension_numbers<[1], [0], [0], [1], [0, 0, 1, 1], [], []>} : vector<30x32xbf16>, vector<32x32xbf16>, vector<30x32xf32> -> vector<30x32xf32>
    %c0_4 = arith.constant 0 : index
    %c1 = arith.constant 1 : index
    %c0_5 = arith.constant 0 : index
    %4 = vector.load %arg1[%c0_4, %c1, %c0_5] : memref<1x40x32xbf16, #tpu.memory_space<vmem>>, vector<1x30x32xbf16>
    %5 = vector.shape_cast %4 : vector<1x30x32xbf16> to vector<30x32xbf16>
    %c32 = arith.constant 32 : index
    %c0_6 = arith.constant 0 : index
    %6 = vector.load %arg2[%c32, %c0_6] : memref<128x32xbf16, #tpu.memory_space<vmem>>, vector<32x32xbf16>
    %cst_7 = arith.constant dense<0.000000e+00> : vector<30x32xf32>
    %7 = tpu.matmul %5, %6, %cst_7 {dimension_numbers = #tpu.dot_dimension_numbers<[1], [0], [0], [1], [0, 0, 1, 1], [], []>} : vector<30x32xbf16>, vector<32x32xbf16>, vector<30x32xf32> -> vector<30x32xf32>
    %8 = arith.addf %3, %7 : vector<30x32xf32>
    %c0_8 = arith.constant 0 : index
    %c6 = arith.constant 6 : index
    %c0_9 = arith.constant 0 : index
    %9 = vector.load %arg1[%c0_8, %c6, %c0_9] : memref<1x40x32xbf16, #tpu.memory_space<vmem>>, vector<1x30x32xbf16>
    %10 = vector.shape_cast %9 : vector<1x30x32xbf16> to vector<30x32xbf16>
    %c64 = arith.constant 64 : index
    %c0_10 = arith.constant 0 : index
    %11 = vector.load %arg2[%c64, %c0_10] : memref<128x32xbf16, #tpu.memory_space<vmem>>, vector<32x32xbf16>
    %cst_11 = arith.constant dense<0.000000e+00> : vector<30x32xf32>
    %12 = tpu.matmul %10, %11, %cst_11 {dimension_numbers = #tpu.dot_dimension_numbers<[1], [0], [0], [1], [0, 0, 1, 1], [], []>} : vector<30x32xbf16>, vector<32x32xbf16>, vector<30x32xf32> -> vector<30x32xf32>
    %13 = arith.addf %8, %12 : vector<30x32xf32>
    %c0_12 = arith.constant 0 : index
    %c7 = arith.constant 7 : index
    %c0_13 = arith.constant 0 : index
    %14 = vector.load %arg1[%c0_12, %c7, %c0_13] : memref<1x40x32xbf16, #tpu.memory_space<vmem>>, vector<1x30x32xbf16>
    %15 = vector.shape_cast %14 : vector<1x30x32xbf16> to vector<30x32xbf16>
    %c96 = arith.constant 96 : index
    %c0_14 = arith.constant 0 : index
    %16 = vector.load %arg2[%c96, %c0_14] : memref<128x32xbf16, #tpu.memory_space<vmem>>, vector<32x32xbf16>
    %cst_15 = arith.constant dense<0.000000e+00> : vector<30x32xf32>
    %17 = tpu.matmul %15, %16, %cst_15 {dimension_numbers = #tpu.dot_dimension_numbers<[1], [0], [0], [1], [0, 0, 1, 1], [], []>} : vector<30x32xbf16>, vector<32x32xbf16>, vector<30x32xf32> -> vector<30x32xf32>
    %18 = arith.addf %13, %17 : vector<30x32xf32>
    %c0_16 = arith.constant 0 : index
    %c0_17 = arith.constant 0 : index
    %19 = vector.load %arg3[%c0_16, %c0_17] : memref<1x32xf32, #tpu.memory_space<vmem>>, vector<1x32xf32>
    %20 = vector.broadcast %19 : vector<1x32xf32> to vector<30x32xf32>
    %21 = arith.addf %18, %20 : vector<30x32xf32>
    %cst_18 = arith.constant 0.000000e+00 : f32
    %22 = vector.broadcast %cst_18 : f32 to vector<30x32xf32>
    %23 = arith.cmpf oge, %21, %22 : vector<30x32xf32>
    %cst_19 = arith.constant 2.000000e-01 : f32
    %24 = vector.broadcast %cst_19 : f32 to vector<30x32xf32>
    %25 = arith.mulf %24, %21 : vector<30x32xf32>
    %26 = arith.select %23, %21, %25 : vector<30x32xi1>, vector<30x32xf32>
    %27 = arith.truncf %26 : vector<30x32xf32> to vector<30x32xbf16>
    %c0_20 = arith.constant 0 : index
    %c0_21 = arith.constant 0 : index
    %c0_22 = arith.constant 0 : index
    %28 = vector.load %arg4[%c0_20, %c0_21, %c0_22] : memref<1x30x32xbf16, #tpu.memory_space<vmem>>, vector<1x30x32xbf16>
    %29 = vector.shape_cast %28 : vector<1x30x32xbf16> to vector<30x32xbf16>
    %30 = vector.shape_cast %27 : vector<30x32xbf16> to vector<1x30x32xbf16>
    tpu.vector_store %arg4[%c0_20, %c0_21, %c0_22], %30 {strides = array<i32>} : memref<1x30x32xbf16, #tpu.memory_space<vmem>>, vector<1x30x32xbf16>,
    return
  }
  func.func @transform_0(%arg0: i32) -> (i32, i32, i32) {
    %c0_i32 = arith.constant 0 : i32
    %c0_i32_0 = arith.constant 0 : i32
    %c0_i32_1 = arith.constant 0 : i32
    return %arg0, %c0_i32, %c0_i32_0 : i32, i32, i32
  }
  func.func @transform_1(%arg0: i32) -> (i32, i32) {
    %c0_i32 = arith.constant 0 : i32
    %c0_i32_0 = arith.constant 0 : i32
    %c0_i32_1 = arith.constant 0 : i32
    return %c0_i32, %c0_i32_0 : i32, i32
  }
  func.func @transform_2(%arg0: i32) -> (i32, i32) {
    %c0_i32 = arith.constant 0 : i32
    %c0_i32_0 = arith.constant 0 : i32
    %c0_i32_1 = arith.constant 0 : i32
    return %c0_i32, %c0_i32_0 : i32, i32
  }
  func.func @transform_3(%arg0: i32) -> (i32, i32, i32) {
    %c0_i32 = arith.constant 0 : i32
    %c0_i32_0 = arith.constant 0 : i32
    %c0_i32_1 = arith.constant 0 : i32
    return %arg0, %c0_i32, %c0_i32_0 : i32, i32, i32
  }
}

module attributes {stable_mosaic.version = 11 : i64} {
  func.func @_downblock_kernel(%arg0: i32, %arg1: memref<1x24x128xbf16, #tpu.memory_space<vmem>>, %arg2: memref<512x64xbf16, #tpu.memory_space<vmem>>, %arg3: memref<1x64xf32, #tpu.memory_space<vmem>>, %arg4: memref<1x12x64xbf16, #tpu.memory_space<vmem>>) attributes {dimension_semantics = [#tpu.dimension_semantics<parallel>], iteration_bounds = array<i64: 2>, scalar_prefetch = 0 : i64, scratch_operands = 0 : i64, tpu.core_type = #tpu.core_type<tc>, window_params = [{transform_indices = @transform_0, window_bounds = array<i64: 1, 24, 128>}, {pipeline_mode = #tpu.pipeline_mode<synchronous>, transform_indices = @transform_1, window_bounds = array<i64: 512, 64>}, {pipeline_mode = #tpu.pipeline_mode<synchronous>, transform_indices = @transform_2, window_bounds = array<i64: 1, 64>}, {transform_indices = @transform_3, window_bounds = array<i64: 1, 12, 64>}]} {
    %c0 = arith.constant 0 : index
    %c0_0 = arith.constant 0 : index
    %c0_1 = arith.constant 0 : index
    %0 = vector.load %arg1[%c0, %c0_0, %c0_1] : memref<1x24x128xbf16, #tpu.memory_space<vmem>>, vector<1x12x128xbf16>
    %1 = vector.shape_cast %0 : vector<1x12x128xbf16> to vector<12x128xbf16>
    %c0_2 = arith.constant 0 : index
    %c0_3 = arith.constant 0 : index
    %2 = vector.load %arg2[%c0_2, %c0_3] : memref<512x64xbf16, #tpu.memory_space<vmem>>, vector<128x64xbf16>
    %cst = arith.constant dense<0.000000e+00> : vector<12x64xf32>
    %3 = tpu.matmul %1, %2, %cst {dimension_numbers = #tpu.dot_dimension_numbers<[1], [0], [0], [1], [0, 0, 1, 1], [], []>} : vector<12x128xbf16>, vector<128x64xbf16>, vector<12x64xf32> -> vector<12x64xf32>
    %c0_4 = arith.constant 0 : index
    %c1 = arith.constant 1 : index
    %c0_5 = arith.constant 0 : index
    %4 = vector.load %arg1[%c0_4, %c1, %c0_5] : memref<1x24x128xbf16, #tpu.memory_space<vmem>>, vector<1x12x128xbf16>
    %5 = vector.shape_cast %4 : vector<1x12x128xbf16> to vector<12x128xbf16>
    %c128 = arith.constant 128 : index
    %c0_6 = arith.constant 0 : index
    %6 = vector.load %arg2[%c128, %c0_6] : memref<512x64xbf16, #tpu.memory_space<vmem>>, vector<128x64xbf16>
    %cst_7 = arith.constant dense<0.000000e+00> : vector<12x64xf32>
    %7 = tpu.matmul %5, %6, %cst_7 {dimension_numbers = #tpu.dot_dimension_numbers<[1], [0], [0], [1], [0, 0, 1, 1], [], []>} : vector<12x128xbf16>, vector<128x64xbf16>, vector<12x64xf32> -> vector<12x64xf32>
    %8 = arith.addf %3, %7 : vector<12x64xf32>
    %c0_8 = arith.constant 0 : index
    %c4 = arith.constant 4 : index
    %c0_9 = arith.constant 0 : index
    %9 = vector.load %arg1[%c0_8, %c4, %c0_9] : memref<1x24x128xbf16, #tpu.memory_space<vmem>>, vector<1x12x128xbf16>
    %10 = vector.shape_cast %9 : vector<1x12x128xbf16> to vector<12x128xbf16>
    %c256 = arith.constant 256 : index
    %c0_10 = arith.constant 0 : index
    %11 = vector.load %arg2[%c256, %c0_10] : memref<512x64xbf16, #tpu.memory_space<vmem>>, vector<128x64xbf16>
    %cst_11 = arith.constant dense<0.000000e+00> : vector<12x64xf32>
    %12 = tpu.matmul %10, %11, %cst_11 {dimension_numbers = #tpu.dot_dimension_numbers<[1], [0], [0], [1], [0, 0, 1, 1], [], []>} : vector<12x128xbf16>, vector<128x64xbf16>, vector<12x64xf32> -> vector<12x64xf32>
    %13 = arith.addf %8, %12 : vector<12x64xf32>
    %c0_12 = arith.constant 0 : index
    %c5 = arith.constant 5 : index
    %c0_13 = arith.constant 0 : index
    %14 = vector.load %arg1[%c0_12, %c5, %c0_13] : memref<1x24x128xbf16, #tpu.memory_space<vmem>>, vector<1x12x128xbf16>
    %15 = vector.shape_cast %14 : vector<1x12x128xbf16> to vector<12x128xbf16>
    %c384 = arith.constant 384 : index
    %c0_14 = arith.constant 0 : index
    %16 = vector.load %arg2[%c384, %c0_14] : memref<512x64xbf16, #tpu.memory_space<vmem>>, vector<128x64xbf16>
    %cst_15 = arith.constant dense<0.000000e+00> : vector<12x64xf32>
    %17 = tpu.matmul %15, %16, %cst_15 {dimension_numbers = #tpu.dot_dimension_numbers<[1], [0], [0], [1], [0, 0, 1, 1], [], []>} : vector<12x128xbf16>, vector<128x64xbf16>, vector<12x64xf32> -> vector<12x64xf32>
    %18 = arith.addf %13, %17 : vector<12x64xf32>
    %c0_16 = arith.constant 0 : index
    %c0_17 = arith.constant 0 : index
    %19 = vector.load %arg3[%c0_16, %c0_17] : memref<1x64xf32, #tpu.memory_space<vmem>>, vector<1x64xf32>
    %20 = vector.broadcast %19 : vector<1x64xf32> to vector<12x64xf32>
    %21 = arith.addf %18, %20 : vector<12x64xf32>
    %cst_18 = arith.constant 0.000000e+00 : f32
    %22 = vector.broadcast %cst_18 : f32 to vector<12x64xf32>
    %23 = arith.cmpf oge, %21, %22 : vector<12x64xf32>
    %cst_19 = arith.constant 2.000000e-01 : f32
    %24 = vector.broadcast %cst_19 : f32 to vector<12x64xf32>
    %25 = arith.mulf %24, %21 : vector<12x64xf32>
    %26 = arith.select %23, %21, %25 : vector<12x64xi1>, vector<12x64xf32>
    %27 = arith.truncf %26 : vector<12x64xf32> to vector<12x64xbf16>
    %c0_20 = arith.constant 0 : index
    %c0_21 = arith.constant 0 : index
    %c0_22 = arith.constant 0 : index
    %28 = vector.load %arg4[%c0_20, %c0_21, %c0_22] : memref<1x12x64xbf16, #tpu.memory_space<vmem>>, vector<1x12x64xbf16>
    %29 = vector.shape_cast %28 : vector<1x12x64xbf16> to vector<12x64xbf16>
    %30 = vector.shape_cast %27 : vector<12x64xbf16> to vector<1x12x64xbf16>
    tpu.vector_store %arg4[%c0_20, %c0_21, %c0_22], %30 {strides = array<i32>} : memref<1x12x64xbf16, #tpu.memory_space<vmem>>, vector<1x12x64xbf16>,
    return
  }
  func.func @transform_0(%arg0: i32) -> (i32, i32, i32) {
    %c0_i32 = arith.constant 0 : i32
    %c0_i32_0 = arith.constant 0 : i32
    %c0_i32_1 = arith.constant 0 : i32
    return %arg0, %c0_i32, %c0_i32_0 : i32, i32, i32
  }
  func.func @transform_1(%arg0: i32) -> (i32, i32) {
    %c0_i32 = arith.constant 0 : i32
    %c0_i32_0 = arith.constant 0 : i32
    %c0_i32_1 = arith.constant 0 : i32
    return %c0_i32, %c0_i32_0 : i32, i32
  }
  func.func @transform_2(%arg0: i32) -> (i32, i32) {
    %c0_i32 = arith.constant 0 : i32
    %c0_i32_0 = arith.constant 0 : i32
    %c0_i32_1 = arith.constant 0 : i32
    return %c0_i32, %c0_i32_0 : i32, i32
  }
  func.func @transform_3(%arg0: i32) -> (i32, i32, i32) {
    %c0_i32 = arith.constant 0 : i32
    %c0_i32_0 = arith.constant 0 : i32
    %c0_i32_1 = arith.constant 0 : i32
    return %arg0, %c0_i32, %c0_i32_0 : i32, i32, i32
  }
}

module attributes {stable_mosaic.version = 11 : i64} {
  func.func @_downblock_kernel(%arg0: i32, %arg1: memref<1x16x256xbf16, #tpu.memory_space<vmem>>, %arg2: memref<1024x128xbf16, #tpu.memory_space<vmem>>, %arg3: memref<1x128xf32, #tpu.memory_space<vmem>>, %arg4: memref<1x6x128xbf16, #tpu.memory_space<vmem>>) attributes {dimension_semantics = [#tpu.dimension_semantics<parallel>], iteration_bounds = array<i64: 2>, scalar_prefetch = 0 : i64, scratch_operands = 0 : i64, tpu.core_type = #tpu.core_type<tc>, window_params = [{transform_indices = @transform_0, window_bounds = array<i64: 1, 16, 256>}, {pipeline_mode = #tpu.pipeline_mode<synchronous>, transform_indices = @transform_1, window_bounds = array<i64: 1024, 128>}, {pipeline_mode = #tpu.pipeline_mode<synchronous>, transform_indices = @transform_2, window_bounds = array<i64: 1, 128>}, {transform_indices = @transform_3, window_bounds = array<i64: 1, 6, 128>}]} {
    %c0 = arith.constant 0 : index
    %c0_0 = arith.constant 0 : index
    %c0_1 = arith.constant 0 : index
    %0 = vector.load %arg1[%c0, %c0_0, %c0_1] : memref<1x16x256xbf16, #tpu.memory_space<vmem>>, vector<1x6x256xbf16>
    %1 = vector.shape_cast %0 : vector<1x6x256xbf16> to vector<6x256xbf16>
    %c0_2 = arith.constant 0 : index
    %c0_3 = arith.constant 0 : index
    %2 = vector.load %arg2[%c0_2, %c0_3] : memref<1024x128xbf16, #tpu.memory_space<vmem>>, vector<256x128xbf16>
    %cst = arith.constant dense<0.000000e+00> : vector<6x128xf32>
    %3 = tpu.matmul %1, %2, %cst {dimension_numbers = #tpu.dot_dimension_numbers<[1], [0], [0], [1], [0, 0, 1, 1], [], []>} : vector<6x256xbf16>, vector<256x128xbf16>, vector<6x128xf32> -> vector<6x128xf32>
    %c0_4 = arith.constant 0 : index
    %c1 = arith.constant 1 : index
    %c0_5 = arith.constant 0 : index
    %4 = vector.load %arg1[%c0_4, %c1, %c0_5] : memref<1x16x256xbf16, #tpu.memory_space<vmem>>, vector<1x6x256xbf16>
    %5 = vector.shape_cast %4 : vector<1x6x256xbf16> to vector<6x256xbf16>
    %c256 = arith.constant 256 : index
    %c0_6 = arith.constant 0 : index
    %6 = vector.load %arg2[%c256, %c0_6] : memref<1024x128xbf16, #tpu.memory_space<vmem>>, vector<256x128xbf16>
    %cst_7 = arith.constant dense<0.000000e+00> : vector<6x128xf32>
    %7 = tpu.matmul %5, %6, %cst_7 {dimension_numbers = #tpu.dot_dimension_numbers<[1], [0], [0], [1], [0, 0, 1, 1], [], []>} : vector<6x256xbf16>, vector<256x128xbf16>, vector<6x128xf32> -> vector<6x128xf32>
    %8 = arith.addf %3, %7 : vector<6x128xf32>
    %c0_8 = arith.constant 0 : index
    %c3 = arith.constant 3 : index
    %c0_9 = arith.constant 0 : index
    %9 = vector.load %arg1[%c0_8, %c3, %c0_9] : memref<1x16x256xbf16, #tpu.memory_space<vmem>>, vector<1x6x256xbf16>
    %10 = vector.shape_cast %9 : vector<1x6x256xbf16> to vector<6x256xbf16>
    %c512 = arith.constant 512 : index
    %c0_10 = arith.constant 0 : index
    %11 = vector.load %arg2[%c512, %c0_10] : memref<1024x128xbf16, #tpu.memory_space<vmem>>, vector<256x128xbf16>
    %cst_11 = arith.constant dense<0.000000e+00> : vector<6x128xf32>
    %12 = tpu.matmul %10, %11, %cst_11 {dimension_numbers = #tpu.dot_dimension_numbers<[1], [0], [0], [1], [0, 0, 1, 1], [], []>} : vector<6x256xbf16>, vector<256x128xbf16>, vector<6x128xf32> -> vector<6x128xf32>
    %13 = arith.addf %8, %12 : vector<6x128xf32>
    %c0_12 = arith.constant 0 : index
    %c4 = arith.constant 4 : index
    %c0_13 = arith.constant 0 : index
    %14 = vector.load %arg1[%c0_12, %c4, %c0_13] : memref<1x16x256xbf16, #tpu.memory_space<vmem>>, vector<1x6x256xbf16>
    %15 = vector.shape_cast %14 : vector<1x6x256xbf16> to vector<6x256xbf16>
    %c768 = arith.constant 768 : index
    %c0_14 = arith.constant 0 : index
    %16 = vector.load %arg2[%c768, %c0_14] : memref<1024x128xbf16, #tpu.memory_space<vmem>>, vector<256x128xbf16>
    %cst_15 = arith.constant dense<0.000000e+00> : vector<6x128xf32>
    %17 = tpu.matmul %15, %16, %cst_15 {dimension_numbers = #tpu.dot_dimension_numbers<[1], [0], [0], [1], [0, 0, 1, 1], [], []>} : vector<6x256xbf16>, vector<256x128xbf16>, vector<6x128xf32> -> vector<6x128xf32>
    %18 = arith.addf %13, %17 : vector<6x128xf32>
    %c0_16 = arith.constant 0 : index
    %c0_17 = arith.constant 0 : index
    %19 = vector.load %arg3[%c0_16, %c0_17] : memref<1x128xf32, #tpu.memory_space<vmem>>, vector<1x128xf32>
    %20 = vector.broadcast %19 : vector<1x128xf32> to vector<6x128xf32>
    %21 = arith.addf %18, %20 : vector<6x128xf32>
    %cst_18 = arith.constant 0.000000e+00 : f32
    %22 = vector.broadcast %cst_18 : f32 to vector<6x128xf32>
    %23 = arith.cmpf oge, %21, %22 : vector<6x128xf32>
    %cst_19 = arith.constant 2.000000e-01 : f32
    %24 = vector.broadcast %cst_19 : f32 to vector<6x128xf32>
    %25 = arith.mulf %24, %21 : vector<6x128xf32>
    %26 = arith.select %23, %21, %25 : vector<6x128xi1>, vector<6x128xf32>
    %27 = arith.truncf %26 : vector<6x128xf32> to vector<6x128xbf16>
    %c0_20 = arith.constant 0 : index
    %c0_21 = arith.constant 0 : index
    %c0_22 = arith.constant 0 : index
    %28 = vector.load %arg4[%c0_20, %c0_21, %c0_22] : memref<1x6x128xbf16, #tpu.memory_space<vmem>>, vector<1x6x128xbf16>
    %29 = vector.shape_cast %28 : vector<1x6x128xbf16> to vector<6x128xbf16>
    %30 = vector.shape_cast %27 : vector<6x128xbf16> to vector<1x6x128xbf16>
    tpu.vector_store %arg4[%c0_20, %c0_21, %c0_22], %30 {strides = array<i32>} : memref<1x6x128xbf16, #tpu.memory_space<vmem>>, vector<1x6x128xbf16>,
    return
  }
  func.func @transform_0(%arg0: i32) -> (i32, i32, i32) {
    %c0_i32 = arith.constant 0 : i32
    %c0_i32_0 = arith.constant 0 : i32
    %c0_i32_1 = arith.constant 0 : i32
    return %arg0, %c0_i32, %c0_i32_0 : i32, i32, i32
  }
  func.func @transform_1(%arg0: i32) -> (i32, i32) {
    %c0_i32 = arith.constant 0 : i32
    %c0_i32_0 = arith.constant 0 : i32
    %c0_i32_1 = arith.constant 0 : i32
    return %c0_i32, %c0_i32_0 : i32, i32
  }
  func.func @transform_2(%arg0: i32) -> (i32, i32) {
    %c0_i32 = arith.constant 0 : i32
    %c0_i32_0 = arith.constant 0 : i32
    %c0_i32_1 = arith.constant 0 : i32
    return %c0_i32, %c0_i32_0 : i32, i32
  }
  func.func @transform_3(%arg0: i32) -> (i32, i32, i32) {
    %c0_i32 = arith.constant 0 : i32
    %c0_i32_0 = arith.constant 0 : i32
    %c0_i32_1 = arith.constant 0 : i32
    return %arg0, %c0_i32, %c0_i32_0 : i32, i32, i32
  }
}

module attributes {stable_mosaic.version = 11 : i64} {
  func.func @_head_kernel(%arg0: i32, %arg1: memref<1x6x6x256xbf16, #tpu.memory_space<vmem>>, %arg2: memref<16x256xbf16, #tpu.memory_space<vmem>>, %arg3: memref<1x1xf32, #tpu.memory_space<vmem>>, %arg4: memref<1x3x3xf32, #tpu.memory_space<vmem>>) attributes {dimension_semantics = [#tpu.dimension_semantics<parallel>], iteration_bounds = array<i64: 2>, scalar_prefetch = 0 : i64, scratch_operands = 0 : i64, tpu.core_type = #tpu.core_type<tc>, window_params = [{transform_indices = @transform_0, window_bounds = array<i64: 1, 6, 6, 256>}, {pipeline_mode = #tpu.pipeline_mode<synchronous>, transform_indices = @transform_1, window_bounds = array<i64: 16, 256>}, {pipeline_mode = #tpu.pipeline_mode<synchronous>, transform_indices = @transform_2, window_bounds = array<i64: 1, 1>}, {transform_indices = @transform_3, window_bounds = array<i64: 1, 3, 3>}]} {
    %c0 = arith.constant 0 : index
    %c0_0 = arith.constant 0 : index
    %c0_1 = arith.constant 0 : index
    %c0_2 = arith.constant 0 : index
    %0 = vector.load %arg1[%c0, %c0_0, %c0_1, %c0_2] : memref<1x6x6x256xbf16, #tpu.memory_space<vmem>>, vector<1x3x3x256xbf16>
    %1 = vector.shape_cast %0 : vector<1x3x3x256xbf16> to vector<3x3x256xbf16>
    %2 = arith.extf %1 : vector<3x3x256xbf16> to vector<3x3x256xf32>
    %c0_3 = arith.constant 0 : index
    %c0_4 = arith.constant 0 : index
    %3 = vector.load %arg2[%c0_3, %c0_4] : memref<16x256xbf16, #tpu.memory_space<vmem>>, vector<1x256xbf16>
    %4 = arith.extf %3 : vector<1x256xbf16> to vector<1x256xf32>
    %5 = vector.shape_cast %4 : vector<1x256xf32> to vector<1x1x256xf32>
    %6 = vector.broadcast %5 : vector<1x1x256xf32> to vector<3x3x256xf32>
    %7 = arith.mulf %2, %6 : vector<3x3x256xf32>
    %cst = arith.constant dense<0.000000e+00> : vector<3x3xf32>
    %8 = vector.multi_reduction <add>, %7, %cst [2] : vector<3x3x256xf32> to vector<3x3xf32>
    %c0_5 = arith.constant 0 : index
    %c0_6 = arith.constant 0 : index
    %c1 = arith.constant 1 : index
    %c0_7 = arith.constant 0 : index
    %9 = vector.load %arg1[%c0_5, %c0_6, %c1, %c0_7] : memref<1x6x6x256xbf16, #tpu.memory_space<vmem>>, vector<1x3x3x256xbf16>
    %10 = vector.shape_cast %9 : vector<1x3x3x256xbf16> to vector<3x3x256xbf16>
    %11 = arith.extf %10 : vector<3x3x256xbf16> to vector<3x3x256xf32>
    %c1_8 = arith.constant 1 : index
    %c0_9 = arith.constant 0 : index
    %12 = vector.load %arg2[%c1_8, %c0_9] : memref<16x256xbf16, #tpu.memory_space<vmem>>, vector<1x256xbf16>
    %13 = arith.extf %12 : vector<1x256xbf16> to vector<1x256xf32>
    %14 = vector.shape_cast %13 : vector<1x256xf32> to vector<1x1x256xf32>
    %15 = vector.broadcast %14 : vector<1x1x256xf32> to vector<3x3x256xf32>
    %16 = arith.mulf %11, %15 : vector<3x3x256xf32>
    %cst_10 = arith.constant dense<0.000000e+00> : vector<3x3xf32>
    %17 = vector.multi_reduction <add>, %16, %cst_10 [2] : vector<3x3x256xf32> to vector<3x3xf32>
    %18 = arith.addf %8, %17 : vector<3x3xf32>
    %c0_11 = arith.constant 0 : index
    %c0_12 = arith.constant 0 : index
    %c2 = arith.constant 2 : index
    %c0_13 = arith.constant 0 : index
    %19 = vector.load %arg1[%c0_11, %c0_12, %c2, %c0_13] : memref<1x6x6x256xbf16, #tpu.memory_space<vmem>>, vector<1x3x3x256xbf16>
    %20 = vector.shape_cast %19 : vector<1x3x3x256xbf16> to vector<3x3x256xbf16>
    %21 = arith.extf %20 : vector<3x3x256xbf16> to vector<3x3x256xf32>
    %c2_14 = arith.constant 2 : index
    %c0_15 = arith.constant 0 : index
    %22 = vector.load %arg2[%c2_14, %c0_15] : memref<16x256xbf16, #tpu.memory_space<vmem>>, vector<1x256xbf16>
    %23 = arith.extf %22 : vector<1x256xbf16> to vector<1x256xf32>
    %24 = vector.shape_cast %23 : vector<1x256xf32> to vector<1x1x256xf32>
    %25 = vector.broadcast %24 : vector<1x1x256xf32> to vector<3x3x256xf32>
    %26 = arith.mulf %21, %25 : vector<3x3x256xf32>
    %cst_16 = arith.constant dense<0.000000e+00> : vector<3x3xf32>
    %27 = vector.multi_reduction <add>, %26, %cst_16 [2] : vector<3x3x256xf32> to vector<3x3xf32>
    %28 = arith.addf %18, %27 : vector<3x3xf32>
    %c0_17 = arith.constant 0 : index
    %c0_18 = arith.constant 0 : index
    %c3 = arith.constant 3 : index
    %c0_19 = arith.constant 0 : index
    %29 = vector.load %arg1[%c0_17, %c0_18, %c3, %c0_19] : memref<1x6x6x256xbf16, #tpu.memory_space<vmem>>, vector<1x3x3x256xbf16>
    %30 = vector.shape_cast %29 : vector<1x3x3x256xbf16> to vector<3x3x256xbf16>
    %31 = arith.extf %30 : vector<3x3x256xbf16> to vector<3x3x256xf32>
    %c3_20 = arith.constant 3 : index
    %c0_21 = arith.constant 0 : index
    %32 = vector.load %arg2[%c3_20, %c0_21] : memref<16x256xbf16, #tpu.memory_space<vmem>>, vector<1x256xbf16>
    %33 = arith.extf %32 : vector<1x256xbf16> to vector<1x256xf32>
    %34 = vector.shape_cast %33 : vector<1x256xf32> to vector<1x1x256xf32>
    %35 = vector.broadcast %34 : vector<1x1x256xf32> to vector<3x3x256xf32>
    %36 = arith.mulf %31, %35 : vector<3x3x256xf32>
    %cst_22 = arith.constant dense<0.000000e+00> : vector<3x3xf32>
    %37 = vector.multi_reduction <add>, %36, %cst_22 [2] : vector<3x3x256xf32> to vector<3x3xf32>
    %38 = arith.addf %28, %37 : vector<3x3xf32>
    %c0_23 = arith.constant 0 : index
    %c1_24 = arith.constant 1 : index
    %c0_25 = arith.constant 0 : index
    %c0_26 = arith.constant 0 : index
    %39 = vector.load %arg1[%c0_23, %c1_24, %c0_25, %c0_26] : memref<1x6x6x256xbf16, #tpu.memory_space<vmem>>, vector<1x3x3x256xbf16>
    %40 = vector.shape_cast %39 : vector<1x3x3x256xbf16> to vector<3x3x256xbf16>
    %41 = arith.extf %40 : vector<3x3x256xbf16> to vector<3x3x256xf32>
    %c4 = arith.constant 4 : index
    %c0_27 = arith.constant 0 : index
    %42 = vector.load %arg2[%c4, %c0_27] : memref<16x256xbf16, #tpu.memory_space<vmem>>, vector<1x256xbf16>
    %43 = arith.extf %42 : vector<1x256xbf16> to vector<1x256xf32>
    %44 = vector.shape_cast %43 : vector<1x256xf32> to vector<1x1x256xf32>
    %45 = vector.broadcast %44 : vector<1x1x256xf32> to vector<3x3x256xf32>
    %46 = arith.mulf %41, %45 : vector<3x3x256xf32>
    %cst_28 = arith.constant dense<0.000000e+00> : vector<3x3xf32>
    %47 = vector.multi_reduction <add>, %46, %cst_28 [2] : vector<3x3x256xf32> to vector<3x3xf32>
    %48 = arith.addf %38, %47 : vector<3x3xf32>
    %c0_29 = arith.constant 0 : index
    %c1_30 = arith.constant 1 : index
    %c1_31 = arith.constant 1 : index
    %c0_32 = arith.constant 0 : index
    %49 = vector.load %arg1[%c0_29, %c1_30, %c1_31, %c0_32] : memref<1x6x6x256xbf16, #tpu.memory_space<vmem>>, vector<1x3x3x256xbf16>
    %50 = vector.shape_cast %49 : vector<1x3x3x256xbf16> to vector<3x3x256xbf16>
    %51 = arith.extf %50 : vector<3x3x256xbf16> to vector<3x3x256xf32>
    %c5 = arith.constant 5 : index
    %c0_33 = arith.constant 0 : index
    %52 = vector.load %arg2[%c5, %c0_33] : memref<16x256xbf16, #tpu.memory_space<vmem>>, vector<1x256xbf16>
    %53 = arith.extf %52 : vector<1x256xbf16> to vector<1x256xf32>
    %54 = vector.shape_cast %53 : vector<1x256xf32> to vector<1x1x256xf32>
    %55 = vector.broadcast %54 : vector<1x1x256xf32> to vector<3x3x256xf32>
    %56 = arith.mulf %51, %55 : vector<3x3x256xf32>
    %cst_34 = arith.constant dense<0.000000e+00> : vector<3x3xf32>
    %57 = vector.multi_reduction <add>, %56, %cst_34 [2] : vector<3x3x256xf32> to vector<3x3xf32>
    %58 = arith.addf %48, %57 : vector<3x3xf32>
    %c0_35 = arith.constant 0 : index
    %c1_36 = arith.constant 1 : index
    %c2_37 = arith.constant 2 : index
    %c0_38 = arith.constant 0 : index
    %59 = vector.load %arg1[%c0_35, %c1_36, %c2_37, %c0_38] : memref<1x6x6x256xbf16, #tpu.memory_space<vmem>>, vector<1x3x3x256xbf16>
    %60 = vector.shape_cast %59 : vector<1x3x3x256xbf16> to vector<3x3x256xbf16>
    %61 = arith.extf %60 : vector<3x3x256xbf16> to vector<3x3x256xf32>
    %c6 = arith.constant 6 : index
    %c0_39 = arith.constant 0 : index
    %62 = vector.load %arg2[%c6, %c0_39] : memref<16x256xbf16, #tpu.memory_space<vmem>>, vector<1x256xbf16>
    %63 = arith.extf %62 : vector<1x256xbf16> to vector<1x256xf32>
    %64 = vector.shape_cast %63 : vector<1x256xf32> to vector<1x1x256xf32>
    %65 = vector.broadcast %64 : vector<1x1x256xf32> to vector<3x3x256xf32>
    %66 = arith.mulf %61, %65 : vector<3x3x256xf32>
    %cst_40 = arith.constant dense<0.000000e+00> : vector<3x3xf32>
    %67 = vector.multi_reduction <add>, %66, %cst_40 [2] : vector<3x3x256xf32> to vector<3x3xf32>
    %68 = arith.addf %58, %67 : vector<3x3xf32>
    %c0_41 = arith.constant 0 : index
    %c1_42 = arith.constant 1 : index
    %c3_43 = arith.constant 3 : index
    %c0_44 = arith.constant 0 : index
    %69 = vector.load %arg1[%c0_41, %c1_42, %c3_43, %c0_44] : memref<1x6x6x256xbf16, #tpu.memory_space<vmem>>, vector<1x3x3x256xbf16>
    %70 = vector.shape_cast %69 : vector<1x3x3x256xbf16> to vector<3x3x256xbf16>
    %71 = arith.extf %70 : vector<3x3x256xbf16> to vector<3x3x256xf32>
    %c7 = arith.constant 7 : index
    %c0_45 = arith.constant 0 : index
    %72 = vector.load %arg2[%c7, %c0_45] : memref<16x256xbf16, #tpu.memory_space<vmem>>, vector<1x256xbf16>
    %73 = arith.extf %72 : vector<1x256xbf16> to vector<1x256xf32>
    %74 = vector.shape_cast %73 : vector<1x256xf32> to vector<1x1x256xf32>
    %75 = vector.broadcast %74 : vector<1x1x256xf32> to vector<3x3x256xf32>
    %76 = arith.mulf %71, %75 : vector<3x3x256xf32>
    %cst_46 = arith.constant dense<0.000000e+00> : vector<3x3xf32>
    %77 = vector.multi_reduction <add>, %76, %cst_46 [2] : vector<3x3x256xf32> to vector<3x3xf32>
    %78 = arith.addf %68, %77 : vector<3x3xf32>
    %c0_47 = arith.constant 0 : index
    %c2_48 = arith.constant 2 : index
    %c0_49 = arith.constant 0 : index
    %c0_50 = arith.constant 0 : index
    %79 = vector.load %arg1[%c0_47, %c2_48, %c0_49, %c0_50] : memref<1x6x6x256xbf16, #tpu.memory_space<vmem>>, vector<1x3x3x256xbf16>
    %80 = vector.shape_cast %79 : vector<1x3x3x256xbf16> to vector<3x3x256xbf16>
    %81 = arith.extf %80 : vector<3x3x256xbf16> to vector<3x3x256xf32>
    %c8 = arith.constant 8 : index
    %c0_51 = arith.constant 0 : index
    %82 = vector.load %arg2[%c8, %c0_51] : memref<16x256xbf16, #tpu.memory_space<vmem>>, vector<1x256xbf16>
    %83 = arith.extf %82 : vector<1x256xbf16> to vector<1x256xf32>
    %84 = vector.shape_cast %83 : vector<1x256xf32> to vector<1x1x256xf32>
    %85 = vector.broadcast %84 : vector<1x1x256xf32> to vector<3x3x256xf32>
    %86 = arith.mulf %81, %85 : vector<3x3x256xf32>
    %cst_52 = arith.constant dense<0.000000e+00> : vector<3x3xf32>
    %87 = vector.multi_reduction <add>, %86, %cst_52 [2] : vector<3x3x256xf32> to vector<3x3xf32>
    %88 = arith.addf %78, %87 : vector<3x3xf32>
    %c0_53 = arith.constant 0 : index
    %c2_54 = arith.constant 2 : index
    %c1_55 = arith.constant 1 : index
    %c0_56 = arith.constant 0 : index
    %89 = vector.load %arg1[%c0_53, %c2_54, %c1_55, %c0_56] : memref<1x6x6x256xbf16, #tpu.memory_space<vmem>>, vector<1x3x3x256xbf16>
    %90 = vector.shape_cast %89 : vector<1x3x3x256xbf16> to vector<3x3x256xbf16>
    %91 = arith.extf %90 : vector<3x3x256xbf16> to vector<3x3x256xf32>
    %c9 = arith.constant 9 : index
    %c0_57 = arith.constant 0 : index
    %92 = vector.load %arg2[%c9, %c0_57] : memref<16x256xbf16, #tpu.memory_space<vmem>>, vector<1x256xbf16>
    %93 = arith.extf %92 : vector<1x256xbf16> to vector<1x256xf32>
    %94 = vector.shape_cast %93 : vector<1x256xf32> to vector<1x1x256xf32>
    %95 = vector.broadcast %94 : vector<1x1x256xf32> to vector<3x3x256xf32>
    %96 = arith.mulf %91, %95 : vector<3x3x256xf32>
    %cst_58 = arith.constant dense<0.000000e+00> : vector<3x3xf32>
    %97 = vector.multi_reduction <add>, %96, %cst_58 [2] : vector<3x3x256xf32> to vector<3x3xf32>
    %98 = arith.addf %88, %97 : vector<3x3xf32>
    %c0_59 = arith.constant 0 : index
    %c2_60 = arith.constant 2 : index
    %c2_61 = arith.constant 2 : index
    %c0_62 = arith.constant 0 : index
    %99 = vector.load %arg1[%c0_59, %c2_60, %c2_61, %c0_62] : memref<1x6x6x256xbf16, #tpu.memory_space<vmem>>, vector<1x3x3x256xbf16>
    %100 = vector.shape_cast %99 : vector<1x3x3x256xbf16> to vector<3x3x256xbf16>
    %101 = arith.extf %100 : vector<3x3x256xbf16> to vector<3x3x256xf32>
    %c10 = arith.constant 10 : index
    %c0_63 = arith.constant 0 : index
    %102 = vector.load %arg2[%c10, %c0_63] : memref<16x256xbf16, #tpu.memory_space<vmem>>, vector<1x256xbf16>
    %103 = arith.extf %102 : vector<1x256xbf16> to vector<1x256xf32>
    %104 = vector.shape_cast %103 : vector<1x256xf32> to vector<1x1x256xf32>
    %105 = vector.broadcast %104 : vector<1x1x256xf32> to vector<3x3x256xf32>
    %106 = arith.mulf %101, %105 : vector<3x3x256xf32>
    %cst_64 = arith.constant dense<0.000000e+00> : vector<3x3xf32>
    %107 = vector.multi_reduction <add>, %106, %cst_64 [2] : vector<3x3x256xf32> to vector<3x3xf32>
    %108 = arith.addf %98, %107 : vector<3x3xf32>
    %c0_65 = arith.constant 0 : index
    %c2_66 = arith.constant 2 : index
    %c3_67 = arith.constant 3 : index
    %c0_68 = arith.constant 0 : index
    %109 = vector.load %arg1[%c0_65, %c2_66, %c3_67, %c0_68] : memref<1x6x6x256xbf16, #tpu.memory_space<vmem>>, vector<1x3x3x256xbf16>
    %110 = vector.shape_cast %109 : vector<1x3x3x256xbf16> to vector<3x3x256xbf16>
    %111 = arith.extf %110 : vector<3x3x256xbf16> to vector<3x3x256xf32>
    %c11 = arith.constant 11 : index
    %c0_69 = arith.constant 0 : index
    %112 = vector.load %arg2[%c11, %c0_69] : memref<16x256xbf16, #tpu.memory_space<vmem>>, vector<1x256xbf16>
    %113 = arith.extf %112 : vector<1x256xbf16> to vector<1x256xf32>
    %114 = vector.shape_cast %113 : vector<1x256xf32> to vector<1x1x256xf32>
    %115 = vector.broadcast %114 : vector<1x1x256xf32> to vector<3x3x256xf32>
    %116 = arith.mulf %111, %115 : vector<3x3x256xf32>
    %cst_70 = arith.constant dense<0.000000e+00> : vector<3x3xf32>
    %117 = vector.multi_reduction <add>, %116, %cst_70 [2] : vector<3x3x256xf32> to vector<3x3xf32>
    %118 = arith.addf %108, %117 : vector<3x3xf32>
    %c0_71 = arith.constant 0 : index
    %c3_72 = arith.constant 3 : index
    %c0_73 = arith.constant 0 : index
    %c0_74 = arith.constant 0 : index
    %119 = vector.load %arg1[%c0_71, %c3_72, %c0_73, %c0_74] : memref<1x6x6x256xbf16, #tpu.memory_space<vmem>>, vector<1x3x3x256xbf16>
    %120 = vector.shape_cast %119 : vector<1x3x3x256xbf16> to vector<3x3x256xbf16>
    %121 = arith.extf %120 : vector<3x3x256xbf16> to vector<3x3x256xf32>
    %c12 = arith.constant 12 : index
    %c0_75 = arith.constant 0 : index
    %122 = vector.load %arg2[%c12, %c0_75] : memref<16x256xbf16, #tpu.memory_space<vmem>>, vector<1x256xbf16>
    %123 = arith.extf %122 : vector<1x256xbf16> to vector<1x256xf32>
    %124 = vector.shape_cast %123 : vector<1x256xf32> to vector<1x1x256xf32>
    %125 = vector.broadcast %124 : vector<1x1x256xf32> to vector<3x3x256xf32>
    %126 = arith.mulf %121, %125 : vector<3x3x256xf32>
    %cst_76 = arith.constant dense<0.000000e+00> : vector<3x3xf32>
    %127 = vector.multi_reduction <add>, %126, %cst_76 [2] : vector<3x3x256xf32> to vector<3x3xf32>
    %128 = arith.addf %118, %127 : vector<3x3xf32>
    %c0_77 = arith.constant 0 : index
    %c3_78 = arith.constant 3 : index
    %c1_79 = arith.constant 1 : index
    %c0_80 = arith.constant 0 : index
    %129 = vector.load %arg1[%c0_77, %c3_78, %c1_79, %c0_80] : memref<1x6x6x256xbf16, #tpu.memory_space<vmem>>, vector<1x3x3x256xbf16>
    %130 = vector.shape_cast %129 : vector<1x3x3x256xbf16> to vector<3x3x256xbf16>
    %131 = arith.extf %130 : vector<3x3x256xbf16> to vector<3x3x256xf32>
    %c13 = arith.constant 13 : index
    %c0_81 = arith.constant 0 : index
    %132 = vector.load %arg2[%c13, %c0_81] : memref<16x256xbf16, #tpu.memory_space<vmem>>, vector<1x256xbf16>
    %133 = arith.extf %132 : vector<1x256xbf16> to vector<1x256xf32>
    %134 = vector.shape_cast %133 : vector<1x256xf32> to vector<1x1x256xf32>
    %135 = vector.broadcast %134 : vector<1x1x256xf32> to vector<3x3x256xf32>
    %136 = arith.mulf %131, %135 : vector<3x3x256xf32>
    %cst_82 = arith.constant dense<0.000000e+00> : vector<3x3xf32>
    %137 = vector.multi_reduction <add>, %136, %cst_82 [2] : vector<3x3x256xf32> to vector<3x3xf32>
    %138 = arith.addf %128, %137 : vector<3x3xf32>
    %c0_83 = arith.constant 0 : index
    %c3_84 = arith.constant 3 : index
    %c2_85 = arith.constant 2 : index
    %c0_86 = arith.constant 0 : index
    %139 = vector.load %arg1[%c0_83, %c3_84, %c2_85, %c0_86] : memref<1x6x6x256xbf16, #tpu.memory_space<vmem>>, vector<1x3x3x256xbf16>
    %140 = vector.shape_cast %139 : vector<1x3x3x256xbf16> to vector<3x3x256xbf16>
    %141 = arith.extf %140 : vector<3x3x256xbf16> to vector<3x3x256xf32>
    %c14 = arith.constant 14 : index
    %c0_87 = arith.constant 0 : index
    %142 = vector.load %arg2[%c14, %c0_87] : memref<16x256xbf16, #tpu.memory_space<vmem>>, vector<1x256xbf16>
    %143 = arith.extf %142 : vector<1x256xbf16> to vector<1x256xf32>
    %144 = vector.shape_cast %143 : vector<1x256xf32> to vector<1x1x256xf32>
    %145 = vector.broadcast %144 : vector<1x1x256xf32> to vector<3x3x256xf32>
    %146 = arith.mulf %141, %145 : vector<3x3x256xf32>
    %cst_88 = arith.constant dense<0.000000e+00> : vector<3x3xf32>
    %147 = vector.multi_reduction <add>, %146, %cst_88 [2] : vector<3x3x256xf32> to vector<3x3xf32>
    %148 = arith.addf %138, %147 : vector<3x3xf32>
    %c0_89 = arith.constant 0 : index
    %c3_90 = arith.constant 3 : index
    %c3_91 = arith.constant 3 : index
    %c0_92 = arith.constant 0 : index
    %149 = vector.load %arg1[%c0_89, %c3_90, %c3_91, %c0_92] : memref<1x6x6x256xbf16, #tpu.memory_space<vmem>>, vector<1x3x3x256xbf16>
    %150 = vector.shape_cast %149 : vector<1x3x3x256xbf16> to vector<3x3x256xbf16>
    %151 = arith.extf %150 : vector<3x3x256xbf16> to vector<3x3x256xf32>
    %c15 = arith.constant 15 : index
    %c0_93 = arith.constant 0 : index
    %152 = vector.load %arg2[%c15, %c0_93] : memref<16x256xbf16, #tpu.memory_space<vmem>>, vector<1x256xbf16>
    %153 = arith.extf %152 : vector<1x256xbf16> to vector<1x256xf32>
    %154 = vector.shape_cast %153 : vector<1x256xf32> to vector<1x1x256xf32>
    %155 = vector.broadcast %154 : vector<1x1x256xf32> to vector<3x3x256xf32>
    %156 = arith.mulf %151, %155 : vector<3x3x256xf32>
    %cst_94 = arith.constant dense<0.000000e+00> : vector<3x3xf32>
    %157 = vector.multi_reduction <add>, %156, %cst_94 [2] : vector<3x3x256xf32> to vector<3x3xf32>
    %158 = arith.addf %148, %157 : vector<3x3xf32>
    %c0_95 = arith.constant 0 : index
    %c0_96 = arith.constant 0 : index
    %159 = vector.load %arg3[%c0_95, %c0_96] : memref<1x1xf32, #tpu.memory_space<vmem>>, vector<1x1xf32>
    %160 = vector.broadcast %159 : vector<1x1xf32> to vector<3x3xf32>
    %161 = arith.addf %158, %160 : vector<3x3xf32>
    %c0_97 = arith.constant 0 : index
    %c0_98 = arith.constant 0 : index
    %c0_99 = arith.constant 0 : index
    %162 = vector.load %arg4[%c0_97, %c0_98, %c0_99] : memref<1x3x3xf32, #tpu.memory_space<vmem>>, vector<1x3x3xf32>
    %163 = vector.shape_cast %162 : vector<1x3x3xf32> to vector<3x3xf32>
    %164 = vector.shape_cast %161 : vector<3x3xf32> to vector<1x3x3xf32>
    tpu.vector_store %arg4[%c0_97, %c0_98, %c0_99], %164 {strides = array<i32>} : memref<1x3x3xf32, #tpu.memory_space<vmem>>, vector<1x3x3xf32>,
    return
  }
  func.func @transform_0(%arg0: i32) -> (i32, i32, i32, i32) {
    %c0_i32 = arith.constant 0 : i32
    %c0_i32_0 = arith.constant 0 : i32
    %c0_i32_1 = arith.constant 0 : i32
    %c0_i32_2 = arith.constant 0 : i32
    return %arg0, %c0_i32, %c0_i32_0, %c0_i32_1 : i32, i32, i32, i32
  }
  func.func @transform_1(%arg0: i32) -> (i32, i32) {
    %c0_i32 = arith.constant 0 : i32
    %c0_i32_0 = arith.constant 0 : i32
    %c0_i32_1 = arith.constant 0 : i32
    return %c0_i32, %c0_i32_0 : i32, i32
  }
  func.func @transform_2(%arg0: i32) -> (i32, i32) {
    %c0_i32 = arith.constant 0 : i32
    %c0_i32_0 = arith.constant 0 : i32
    %c0_i32_1 = arith.constant 0 : i32
    return %c0_i32, %c0_i32_0 : i32, i32
  }
  func.func @transform_3(%arg0: i32) -> (i32, i32, i32) {
    %c0_i32 = arith.constant 0 : i32
    %c0_i32_0 = arith.constant 0 : i32
    %c0_i32_1 = arith.constant 0 : i32
    return %arg0, %c0_i32, %c0_i32_0 : i32, i32, i32
  }
}

</mosaic_0001>

<bundles_post_ra>
// kernel: multiscale_discriminator_forward.11
= control target key start
LH: loop header
LB: loop body
LE: loop exit
PB: predicated region body
PF: predicated region fallthrough
CT: control target
= control target key end

     0   :  { %s1302_s12 = smov 0   ;;  %s1504_s0 = inlined_call_operand.vmem [shape: bf16[2,104,32], index: 0, kind: input, shape index: {}]   ;;  %s1505_s1 = inlined_call_operand.vmem [shape: bf16[128,32], index: 1, kind: input, shape index: {}]   ;;  %s1506_s2 = inlined_call_operand.vmem [shape: f32[1,32], index: 2, kind: input, shape index: {}]   ;;  %s1507_s3 = inlined_call_operand.vmem [shape: bf16[2,90,32], index: 3, kind: output, shape index: {}]  }
   0x1 LB: > { %s1030_s13 = sadd.s32 4294967295, %s1280_s12   ;;  %p1034_p0 = scmp.ge.s32.totalorder %s1280_s12, 1  ;;  %s1280_s12 = sphi %s1302_s12, %s13_s12  }
   0x2   : > { %p137_p1 = scmp.lt.s32.totalorder %s1280_s12, 3 }
   0x4   : > { %p138_p2 = pnand %p1034_p0, %p137_p1 }
   0x5   : > { %v1252_v0 = vld [vmem:[%s1505_s1 + $0x20] sm:$0xff] (!%p138_p2)   ;;  %p161_p3 = scmp.lt.s32.totalorder (!%p138_p2), %s1030_s13, 1  ;;  %v1253_v1 = vld [vmem:[%s1505_s1 + $0x10] sm:$0xff] (!%p138_p2)   ;;  %v1254_v2 = vld [vmem:[%s1505_s1 + $0x28] sm:$0xff] (!%p138_p2)   ;;  %vm283_vm0 = vcmask (!%p138_p2), 261120   ;;  %vm538_vm2 = vcmask (!%p138_p2), 1046528  }
   0x6   : > { %141 = sbr.rel (%p138_p2) target bundleno = 292 (0x124), region = 32  ;;  %1174 = vmatprep.subr.bf16.mxu0 (!%p138_p2), %v1252_v0  ;;  %1142 = vmatprep.subr.bf16.mxu1 (!%p138_p2), %v1253_v1  ;;  %v1255_v3 = vld [vmem:[%s1505_s1 + $0x18] sm:$0xff] (!%p138_p2)   ;;  %v1328_v4 = vld [vmem:[%s1505_s1] sm:$0xff] (!%p138_p2)   ;;  %v1262_v5 = vld [vmem:[%s1505_s1 + $0x30] sm:$0xff] (!%p138_p2)   ;;  %vm223_vm1 = vsmask.f32 (!%p138_p2), 7424 }
   0x7   : > { %1175 = vmatpush3.bf16.msra.mxu0 (!%p138_p2), %v1252_v0  ;;  %1143 = vmatpush3.bf16.msra.mxu1 (!%p138_p2), %v1253_v1  ;;  %v1271_v37 = vld [vmem:[%s1505_s1 + $0x38] sm:$0xff] (!%p138_p2)   ;;  %v1268_v40 = vld [vmem:[%s1505_s1 + $0x8] sm:$0xff] (!%p138_p2)   ;;  %vm681_vm3 = vsmask.f32 (!%p138_p2), 6400  ;;  %vm961_vm6 = vcmask (!%p138_p2), 257024  }
   0x8   : > { %1176 = vmatprep.subr.bf16.mxu0 (!%p138_p2), %v1254_v2  ;;  %1144 = vmatprep.subr.bf16.mxu1 (!%p138_p2), %v1255_v3 }
   0xb   : > { %1177 = vmatpush3.bf16.msra.mxu0 (!%p138_p2), %v1254_v2  ;;  %1145 = vmatpush3.bf16.msra.mxu1 (!%p138_p2), %v1255_v3 }
   0xc   : > { %1190 = vmatprep.subr.bf16.mxu0 (!%p138_p2), %v1262_v5  ;;  %1158 = vmatprep.subr.bf16.mxu1 (!%p138_p2), %v1328_v4 }
   0xd   : > { %s1509_s13 = smov (!%p161_p3, %s1030_s13), 1 }
   0xe   : > { %s1242_s22 = smul.u32 52, %s1509_s13 }
   0xf   : > { %s1243_s9 = smul.u32 48, %s1509_s13 }
  0x10   : > { %s1333_s27 = scalar_lea.vmem %s1504_s0, %s1242_s22 }
  0x11   : > { %v1339_v6 = vld [vmem:[%s1333_s27 + $0x4] sm:$0xfe]   ;;  %v1342_v7 = vld [vmem:[%s1333_s27 + $0xc] sm:$0xff]   ;;  %v1345_v8 = vld [vmem:[%s1333_s27 + $0x14] sm:$0xff]   ;;  %s1468_s13 = scalar_lea.vmem %s1507_s3, %s1243_s9 }
  0x12   : > { %v539_v9 = vrot.slane %v1339_v6, 1  ;;  %v540_v10 = vrot.slane %v1342_v7, 1  ;;  %v542_v11 = vrot.slane %v1345_v8, 1  ;;  %v1352_v12 = vld [vmem:[%s1333_s27] sm:$0xff]   ;;  %v1356_v14 = vld [vmem:[%s1333_s27 + $0x8] sm:$0xff]   ;;  %v1363_v18 = vld [vmem:[%s1333_s27 + $0x10] sm:$0xff]  }
  0x13   : > { %v225_v16 = vshrl.u32 %v1352_v12, 16  ;;  %v227_v17 = vshll.u32 %v1352_v12, 16  ;;  %v1366_v19 = vld [vmem:[%s1333_s27 + $0x1c] sm:$0xff]   ;;  %v232_v20 = vshll.u32 %v1356_v14, 16  ;;  %v236_v21 = vshrl.u32 %v1356_v14, 16  ;;  %v1374_v25 = vld [vmem:[%s1333_s27 + $0x24] sm:$0xff]  }
  0x14   : > { %v541_v13 = vsel %vm538_vm2, %v539_v9, %v540_v10  ;;  %v543_v15 = vsel %vm538_vm2, %v540_v10, %v542_v11  ;;  %v240_v23 = vshll.u32 %v1363_v18, 16  ;;  %v544_v24 = vrot.slane %v1366_v19, 1  ;;  %v1377_v27 = vld [vmem:[%s1333_s27 + $0x18] sm:$0xff]   ;;  %v1385_v35 = vld [vmem:[%s1333_s27 + $0x20] sm:$0xff]   ;;  %v502_v41 = vld [vmem:[%s1333_s27 + $0x2c] sm:$0xf] }
  0x15   : > { %1178 = vmatprep.mubr.msk.bf16.mxu0 %vm283_vm0, %v541_v13  ;;  %v229_v22 = vrot.slane %v227_v17, 1  ;;  %v234_v26 = vrot.slane %v232_v20, 1  ;;  %v546_v31 = vrot.slane %v1374_v25, 1  ;;  %v244_v33 = vshrl.u32 %v1363_v18, 16  ;;  %v503_v42 = vld [vmem:[%s1333_s27 + $0x30] sm:$0x3] }
  0x16   : > { %1179 = vmatmul.mubr.msk.bf16.vlgmr.msra.gmra.mrb[0].mxu0 %vm283_vm0, %v543_v15  ;;  %v242_v29 = vrot.slane %v240_v23, 1  ;;  %v545_v30 = vsel %vm538_vm2, %v542_v11, %v544_v24  ;;  %v248_v34 = vshll.u32 %v1377_v27, 16  ;;  %v252_v36 = vshrl.u32 %v1377_v27, 16  ;;  %v1404_v49 = vld [vmem:[%s1333_s27 + $0x28] sm:$0xf] }
  0x17   : > { %1191 = vmatpush3.bf16.msra.mxu0 %v1262_v5  ;;  %v230_v28 = vor.u32 %v229_v22, %v225_v16  ;;  %v238_v32 = vor.u32 %v236_v21, %v234_v26  ;;  %1182 = vmatprep.mubr.msk.bf16.mxu0 %vm283_vm0, %v545_v30  ;;  %v547_v39 = vsel %vm538_vm2, %v544_v24, %v546_v31  ;;  %v683_v43 = vshrl.u32 %v1339_v6, 16  ;;  %v188_v50 = vld [vmem:[%s1333_s27 + $0x2c] sm:$0x3]  ;;  %v673_v61 = vld [vmem:[%s1333_s27 + $0x30] sm:$0x7] }
  0x18   : > { %v246_v45 = vor.u32 %v244_v33, %v242_v29  ;;  %v250_v46 = vrot.slane %v248_v34, 1  ;;  %v256_v47 = vshll.u32 %v1385_v35, 16  ;;  %1192 = vmatprep.subr.bf16.mxu0 %v1271_v37  ;;  %v1065_v48 = vcombine.low %v502_v41, %v503_v42 }
  0x19   : > { %v235_v38 = vsel %vm223_vm1, %v230_v28, %v234_v26  ;;  %v243_v44 = vsel %vm223_vm1, %v238_v32, %v242_v29  ;;  %v260_v51 = vshrl.u32 %v1385_v35, 16  ;;  %v1042_v55 = vcombine.low %v1404_v49, %v188_v50 }
  0x1a   : > { %1146 = vmatprep.mubr.msk.bf16.mxu1 %vm283_vm0, %v235_v38  ;;  %v251_v52 = vsel %vm223_vm1, %v246_v45, %v250_v46  ;;  %v254_v53 = vor.u32 %v252_v36, %v250_v46  ;;  %v258_v54 = vrot.slane %v256_v47, 1  ;;  %v548_v56 = vrot.slane %v1065_v48, 1 }
  0x1b   : > { %1147 = vmatmul.mubr.msk.bf16.vlgmr.msra.gmra.mrb[0].mxu1 %vm283_vm0, %v243_v44  ;;  %1193 = vmatpush3.bf16.msra.mxu0 %v1271_v37  ;;  %v685_v57 = vrot.slane %v683_v43, 1  ;;  %v686_v58 = vshll.u32 %v1339_v6, 16  ;;  %v691_v59 = vshrl.u32 %v1342_v7, 16  ;;  %v264_v63 = vshll.u32 %v1042_v55, 16 }
  0x1c   : > { %1159 = vmatpush3.bf16.msra.mxu1 %v1328_v4  ;;  %1150 = vmatprep.mubr.msk.bf16.mxu1 %vm283_vm0, %v251_v52  ;;  %v259_v60 = vsel %vm223_vm1, %v254_v53, %v258_v54  ;;  %v262_v62 = vor.u32 %v260_v51, %v258_v54  ;;  %v549_v0 = vsel %vm538_vm2, %v546_v31, %v548_v56  ;;  %v694_v3 = vshll.u32 %v1342_v7, 16 }
  0x1d   : > { %1160 = vmatprep.subr.bf16.mxu1 %v1268_v40  ;;  %v688_v1 = vrot.slane %v686_v58, 2  ;;  %v693_v2 = vrot.slane %v691_v59, 1  ;;  %v266_v4 = vrot.slane %v264_v63, 1  ;;  %v700_v5 = vshrl.u32 %v1345_v8, 16 }
  0x1e   : > { %1183 = vmatmul.mubr.msk.bf16.gmra.mrb[4].mxu0 %vm283_vm0, %v547_v39  ;;  %v703_v6 = vshll.u32 %v1345_v8, 16  ;;  %v709_v9 = vshrl.u32 %v1366_v19, 16  ;;  %v1074_v10 = vcombine.low %v502_v41, %v673_v61  ;;  %v696_v13 = vrot.slane %v694_v3, 2 }
  0x1f   : > { %1186 = vmatprep.mubr.msk.bf16.mxu0 %vm283_vm0, %v549_v0  ;;  %v689_v11 = vor.u32 %v688_v1, %v685_v57  ;;  %v712_v15 = vshll.u32 %v1366_v19, 16  ;;  %v267_v16 = vsel %vm223_vm1, %v262_v62, %v266_v4  ;;  %v702_v17 = vrot.slane %v700_v5, 1 }
  0x20   : > { %1161 = vmatpush3.bf16.msra.mxu1 %v1268_v40  ;;  %v705_v7 = vrot.slane %v703_v6, 2  ;;  %v268_v20 = vshrl.u32 %v1042_v55, 16  ;;  %v697_v21 = vor.u32 %v696_v13, %v693_v2  ;;  %v711_v22 = vrot.slane %v709_v9, 1 }
  0x21   : > { %v714_v23 = vrot.slane %v712_v15, 2  ;;  %v718_v19 = vshrl.u32 %v1374_v25, 16  ;;  %v721_v26 = vshll.u32 %v1374_v25, 16  ;;  %v727_v29 = vshrl.u32 %v1074_v10, 16 }
  0x22   : > { %v698_v8 = vsel %vm681_vm3, %v689_v11, %v697_v21  ;;  %v706_v24 = vor.u32 %v705_v7, %v702_v17  ;;  %v730_v30 = vshll.u32 %v1074_v10, 16  ;;  %v270_v31 = vor.u32 %v268_v20, %v266_v4 }
  0x23   : > { %1151 = vmatmul.mubr.msk.bf16.gmra.mrb[4].mxu1 %vm283_vm0, %v259_v60  ;;  %v715_v28 = vor.u32 %v714_v23, %v711_v22  ;;  %v720_v33 = vrot.slane %v718_v19, 1  ;;  %v723_v34 = vrot.slane %v721_v26, 2  ;;  %v729_v37 = vrot.slane %v727_v29, 1 }
  0x24   : > { %1154 = vmatprep.mubr.msk.bf16.mxu1 %vm283_vm0, %v267_v16  ;;  %v707_v32 = vsel %vm681_vm3, %v697_v21, %v706_v24  ;;  %v732_v38 = vrot.slane %v730_v30, 2  ;;  %vm973_vm1 = vcmask 253952  }
  0x25   : > { %v716_v36 = vsel %vm681_vm3, %v706_v24, %v715_v28  ;;  %v724_v25 = vor.u32 %v723_v34, %v720_v33 }
  0x26   : > { %1187 = vmatmul.mubr.msk.bf16.gmra.mrb[8].mxu0 %vm283_vm0, %v548_v56  ;;  %v733_v39 = vor.u32 %v732_v38, %v729_v37 }
  0x27   : > { %1194 = vmatprep.mubr.msk.bf16.mxu0 %vm283_vm0, %v698_v8  ;;  %v725_v40 = vsel %vm681_vm3, %v715_v28, %v724_v25 }
  0x28   : > { %v734_v41 = vsel %vm681_vm3, %v724_v25, %v733_v39 }
  0x2b   : > { %1155 = vmatmul.mubr.msk.bf16.gmra.mrb[8].mxu1 %vm283_vm0, %v270_v31 }
  0x2c   : > { %1162 = vmatprep.mubr.msk.bf16.mxu1 %vm283_vm0, %v1352_v12  ;;  %v183_v12 = vld [vmem:[%s1333_s27 + $0x2c] sm:$0x1] }
  0x2d   : > { %v1051_v42 = vcombine.low %v1404_v49, %v183_v12 }
  0x2e   : > { %1195 = vmatmul.mubr.msk.bf16.vlgmr.msra.gmra.mrb[0].mxu0 %vm283_vm0, %v707_v32 }
  0x2f   : > { %1198 = vmatprep.mubr.msk.bf16.mxu0 %vm283_vm0, %v716_v36 }
  0x33   : > { %1163 = vmatmul.mubr.msk.bf16.vlgmr.msra.gmra.mrb[0].mxu1 %vm283_vm0, %v1356_v14 }
  0x34   : > { %1166 = vmatprep.mubr.msk.bf16.mxu1 %vm283_vm0, %v1363_v18 }
  0x36   : > { %1199 = vmatmul.mubr.msk.bf16.gmra.mrb[4].mxu0 %vm283_vm0, %v725_v40 }
  0x37   : > { %1202 = vmatprep.mubr.msk.bf16.mxu0 %vm283_vm0, %v734_v41 }
  0x3b   : > { %1167 = vmatmul.mubr.msk.bf16.gmra.mrb[4].mxu1 %vm283_vm0, %v1377_v27  ;;  %v1458_v27 = vld [vmem:[%s1506_s2] ss:$0 sm:$0xff] }
  0x3c   : > { %1170 = vmatprep.mubr.msk.bf16.mxu1 %vm283_vm0, %v1385_v35 }
  0x3e   : > { %1203 = vmatmul.mubr.msk.bf16.gmra.mrb[8].mxu0 %vm283_vm0, %v733_v39 }
  0x43   : > { %1171 = vmatmul.mubr.msk.bf16.gmra.mrb[8].mxu1 %vm283_vm0, %v1051_v42 }
 0x101   : > { %v1196_v14 = vpop.f32.mrb[0].mxu0 }
 0x102   : > { %v799_v43 = vpop.f32.mrb[1].mxu0 }
 0x103   : > { %v1197_v44 = vpop.f32.mrb[2].mxu0 }
 0x104   : > { %v802_v18 = vpop.f32.mrb[3].mxu0 }
 0x106   : > { %v1164_v45 = vpop.f32.mrb[0].mxu1 }
 0x107   : > { %v1206_v46 = vadd.f32 %v1196_v14, %v1164_v45  ;;  %v445_v47 = vpop.f32.mrb[1].mxu1 }
 0x108   : > { %v1207_v35 = vadd.f32 %v799_v43, %v445_v47  ;;  %v1165_v50 = vpop.f32.mrb[2].mxu1 }
 0x109   : > { %v1200_v48 = vpop.f32.mrb[4].mxu0  ;;  %v867_v49 = vadd.f32 %v1206_v46, %v1458_v27  ;;  %v1208_v52 = vadd.f32 %v1197_v44, %v1165_v50  ;;  %v448_v53 = vpop.f32.mrb[3].mxu1 }
 0x10a   : > { %v815_v51 = vpop.f32.mrb[5].mxu0  ;;  %v865_v55 = vadd.f32 %v1207_v35, %v1458_v27  ;;  %v1209_v56 = vadd.f32 %v802_v18, %v448_v53 }
 0x10b   : > { %v1201_v54 = vpop.f32.mrb[6].mxu0  ;;  %vm879_vm4 = vcmp.ge.f32.partialorder %v867_v49, 0.0  ;;  %v891_v58 = vmul.f32 0.2, %v867_v49  ;;  %v868_v59 = vadd.f32 %v1208_v52, %v1458_v27 }
 0x10c   : > { %v818_v57 = vpop.f32.mrb[7].mxu0  ;;  %vm877_vm5 = vcmp.ge.f32.partialorder %v865_v55, 0.0  ;;  %v889_v60 = vmul.f32 0.2, %v865_v55  ;;  %v866_v61 = vadd.f32 %v1209_v56, %v1458_v27 }
 0x10d   : > { %v903_v62 = vsel %vm879_vm4, %v867_v49, %v891_v58  ;;  %vm880_vm7 = vcmp.ge.f32.partialorder %v868_v59, 0.0  ;;  %v892_v63 = vmul.f32 0.2, %v868_v59 }
 0x10e   : > { %v1100_v0 = vpack.c.bf16 %v903_v62, %v903_v62  ;;  %v901_v1 = vsel %vm877_vm5, %v865_v55, %v889_v60  ;;  %vm878_vm8 = vcmp.ge.f32.partialorder %v866_v61, 0.0  ;;  %v890_v2 = vmul.f32 0.2, %v866_v61  ;;  %v1168_v3 = vpop.f32.mrb[4].mxu1 }
 0x10f   : > { %v1098_v4 = vpack.c.bf16 %v901_v1, %v901_v1  ;;  %v904_v5 = vsel %vm880_vm7, %v868_v59, %v892_v63  ;;  %v1210_v6 = vadd.f32 %v1200_v48, %v1168_v3  ;;  %v461_v9 = vpop.f32.mrb[5].mxu1 }
 0x110   : > { %964 = vst.msk [vmem:[%s1468_s13 + $0x8] sm:$0xf] %vm961_vm6, %v1100_v0  ;;  %v1101_v11 = vpack.c.bf16 %v904_v5, %v904_v5  ;;  %v902_v13 = vsel %vm878_vm8, %v866_v61, %v890_v2  ;;  %v1211_v15 = vadd.f32 %v815_v51, %v461_v9  ;;  %v1169_v16 = vpop.f32.mrb[6].mxu1 }
 0x111   : > { %v1204_v10 = vpop.f32.mrb[8].mxu0  ;;  %962 = vst.msk [vmem:[%s1468_s13] sm:$0xf] %vm961_vm6, %v1098_v4  ;;  %v1099_v7 = vpack.c.bf16 %v902_v13, %v902_v13  ;;  %v871_v20 = vadd.f32 %v1210_v6, %v1458_v27  ;;  %v1212_v21 = vadd.f32 %v1201_v54, %v1169_v16  ;;  %v464_v22 = vpop.f32.mrb[7].mxu1 }
 0x112   : > { %v831_v17 = vpop.f32.mrb[9].mxu0  ;;  %965 = vst.msk [vmem:[%s1468_s13 + $0xc] sm:$0xf] %vm961_vm6, %v1101_v11  ;;  %v869_v8 = vadd.f32 %v1211_v15, %v1458_v27  ;;  %v1213_v24 = vadd.f32 %v818_v57, %v464_v22 }
 0x113   : > { %v1205_v23 = vpop.f32.mrb[10].mxu0  ;;  %963 = vst.msk [vmem:[%s1468_s13 + $0x4] sm:$0xf] %vm961_vm6, %v1099_v7  ;;  %vm883_vm9 = vcmp.ge.f32.partialorder %v871_v20, 0.0  ;;  %v895_v26 = vmul.f32 0.2, %v871_v20  ;;  %v872_v28 = vadd.f32 %v1212_v21, %v1458_v27 }
 0x114   : > { %v834_v19 = vpop.f32.mrb[11].mxu0  ;;  %vm881_vm10 = vcmp.ge.f32.partialorder %v869_v8, 0.0  ;;  %v893_v29 = vmul.f32 0.2, %v869_v8  ;;  %v870_v30 = vadd.f32 %v1213_v24, %v1458_v27 }
 0x115   : > { %v907_v31 = vsel %vm883_vm9, %v871_v20, %v895_v26  ;;  %vm884_vm11 = vcmp.ge.f32.partialorder %v872_v28, 0.0  ;;  %v896_v32 = vmul.f32 0.2, %v872_v28 }
 0x116   : > { %v1104_v33 = vpack.c.bf16 %v907_v31, %v907_v31  ;;  %v905_v34 = vsel %vm881_vm10, %v869_v8, %v893_v29  ;;  %vm882_vm12 = vcmp.ge.f32.partialorder %v870_v30, 0.0  ;;  %v894_v36 = vmul.f32 0.2, %v870_v30  ;;  %v1172_v37 = vpop.f32.mrb[8].mxu1 }
 0x117   : > { %v1102_v38 = vpack.c.bf16 %v905_v34, %v905_v34  ;;  %v908_v25 = vsel %vm884_vm11, %v872_v28, %v896_v32  ;;  %v1214_v39 = vadd.f32 %v1204_v10, %v1172_v37  ;;  %v477_v40 = vpop.f32.mrb[9].mxu1 }
 0x118   : > { %968 = vst.msk [vmem:[%s1468_s13 + $0x18] sm:$0xf] %vm961_vm6, %v1104_v33  ;;  %v1105_v41 = vpack.c.bf16 %v908_v25, %v908_v25  ;;  %v906_v12 = vsel %vm882_vm12, %v870_v30, %v894_v36  ;;  %v1215_v42 = vadd.f32 %v831_v17, %v477_v40  ;;  %v1173_v14 = vpop.f32.mrb[10].mxu1 }
 0x119   : > { %966 = vst.msk [vmem:[%s1468_s13 + $0x10] sm:$0xf] %vm961_vm6, %v1102_v38  ;;  %v1103_v43 = vpack.c.bf16 %v906_v12, %v906_v12  ;;  %v875_v44 = vadd.f32 %v1214_v39, %v1458_v27  ;;  %v1216_v18 = vadd.f32 %v1205_v23, %v1173_v14  ;;  %v480_v45 = vpop.f32.mrb[11].mxu1 }
 0x11a   : > { %969 = vst.msk [vmem:[%s1468_s13 + $0x1c] sm:$0xf] %vm961_vm6, %v1105_v41  ;;  %v873_v46 = vadd.f32 %v1215_v42, %v1458_v27  ;;  %v1217_v47 = vadd.f32 %v834_v19, %v480_v45 }
 0x11b   : > { %967 = vst.msk [vmem:[%s1468_s13 + $0x14] sm:$0xf] %vm961_vm6, %v1103_v43  ;;  %vm887_vm13 = vcmp.ge.f32.partialorder %v875_v44, 0.0  ;;  %v899_v48 = vmul.f32 0.2, %v875_v44  ;;  %v876_v35 = vadd.f32 %v1216_v18, %v1458_v27 }
 0x11c   : > { %vm885_vm14 = vcmp.ge.f32.partialorder %v873_v46, 0.0  ;;  %v897_v50 = vmul.f32 0.2, %v873_v46  ;;  %v874_v51 = vadd.f32 %v1217_v47, %v1458_v27 }
 0x11d   : > { %v911_v49 = vsel %vm887_vm13, %v875_v44, %v899_v48  ;;  %vm888_vm15 = vcmp.ge.f32.partialorder %v876_v35, 0.0  ;;  %v900_v52 = vmul.f32 0.2, %v876_v35 }
 0x11e   : > { %v1108_v53 = vpack.c.bf16 %v911_v49, %v911_v49  ;;  %v909_v54 = vsel %vm885_vm14, %v873_v46, %v897_v50  ;;  %vm886_vm0 = vcmp.ge.f32.partialorder %v874_v51, 0.0  ;;  %v898_v55 = vmul.f32 0.2, %v874_v51 }
 0x11f   : > { %v1106_v56 = vpack.c.bf16 %v909_v54, %v909_v54  ;;  %v912_v57 = vsel %vm888_vm15, %v876_v35, %v900_v52 }
 0x120   : > { %972 = vst.msk [vmem:[%s1468_s13 + $0x28] sm:$0xf] %vm961_vm6, %v1108_v53  ;;  %v1109_v58 = vpack.c.bf16 %v912_v57, %v912_v57  ;;  %v910_v59 = vsel %vm886_vm0, %v874_v51, %v898_v55 }
 0x121   : > { %970 = vst.msk [vmem:[%s1468_s13 + $0x20] sm:$0xf] %vm961_vm6, %v1106_v56  ;;  %v1107_v60 = vpack.c.bf16 %v910_v59, %v910_v59 }
 0x122   : > { %974 = vst.msk [vmem:[%s1468_s13 + $0x2c] sm:$0x1] %vm973_vm1, %v1109_v58 }
 0x123   : > { %971 = vst.msk [vmem:[%s1468_s13 + $0x24] sm:$0xf] %vm961_vm6, %v1107_v60 }
 0x124 PF: > { %s13_s12 = sadd.s32 1, %s1280_s12  }
 0x125   : > { %p10_p4 = scmp.ge.s32.totalorder %s13_s12, 4  }
 0x127   :  { %12 = sbr.rel (!%p10_p4) target bundleno = 1 (0x1), region = 62 }

// kernel: multiscale_discriminator_forward.12
= control target key start
LH: loop header
LB: loop body
LE: loop exit
PB: predicated region body
PF: predicated region fallthrough
CT: control target
= control target key end

     0   :  { %s1096_s12 = smov 0   ;;  %s1243_s0 = inlined_call_operand.vmem [shape: bf16[2,40,128], index: 0, kind: input, shape index: {}]   ;;  %s1244_s1 = inlined_call_operand.vmem [shape: bf16[512,64], index: 1, kind: input, shape index: {}]   ;;  %s1245_s2 = inlined_call_operand.vmem [shape: f32[1,64], index: 2, kind: input, shape index: {}]   ;;  %s1246_s3 = inlined_call_operand.vmem [shape: bf16[2,30,64], index: 3, kind: output, shape index: {}]  }
   0x1 LB: > { %s829_s13 = sadd.s32 4294967295, %s1074_s12   ;;  %p833_p0 = scmp.ge.s32.totalorder %s1074_s12, 1  ;;  %s1074_s12 = sphi %s1096_s12, %s13_s12  }
   0x2   : > { %p137_p1 = scmp.lt.s32.totalorder %s1074_s12, 3 }
   0x4   : > { %p138_p2 = pnand %p833_p0, %p137_p1 }
   0x5   : > { %v1029_v0 = vld [vmem:[%s1244_s1 + $0x40] sm:$0xff] (!%p138_p2)   ;;  %p161_p3 = scmp.lt.s32.totalorder (!%p138_p2), %s829_s13, 1  ;;  %v1031_v2 = vld [vmem:[%s1244_s1 + $0x48] sm:$0xff] (!%p138_p2)   ;;  %v1033_v4 = vld [vmem:[%s1244_s1 + $0x50] sm:$0xff] (!%p138_p2)   ;;  %vm470_vm0 = vcmask (!%p138_p2), 1044480   ;;  %vm768_vm5 = vcmask (!%p138_p2), 519168  }
   0x6   : > { %141 = sbr.rel (%p138_p2) target bundleno = 296 (0x128), region = 32  ;;  %v1030_v1 = vld [vmem:[%s1244_s1 + $0x80] sm:$0xff] (!%p138_p2)   ;;  %928 = vmatprep.subr.bf16.mxu1 (!%p138_p2), %v1029_v0  ;;  %v1032_v3 = vld [vmem:[%s1244_s1 + $0x88] sm:$0xff] (!%p138_p2)   ;;  %v1034_v5 = vld [vmem:[%s1244_s1 + $0x90] sm:$0xff] (!%p138_p2)   ;;  %vm219_vm1 = vsmask.f32 (!%p138_p2), 7424 }
   0x7   : > { %968 = vmatprep.subr.bf16.mxu0 (!%p138_p2), %v1030_v1  ;;  %929 = vmatpush3.bf16.msra.mxu1 (!%p138_p2), %v1029_v0  ;;  %v1035_v6 = vld [vmem:[%s1244_s1 + $0x58] sm:$0xff] (!%p138_p2)   ;;  %v1037_v8 = vld [vmem:[%s1244_s1 + $0x60] sm:$0xff] (!%p138_p2)   ;;  %v1039_v10 = vld [vmem:[%s1244_s1 + $0x68] sm:$0xff] (!%p138_p2)   ;;  %vm599_vm2 = vsmask.f32 (!%p138_p2), 4352  ;;  %vm772_vm8 = vcmask (!%p138_p2), 518144  }
   0x8   : > { %969 = vmatpush3.bf16.msra.mxu0 (!%p138_p2), %v1030_v1  ;;  %930 = vmatprep.subr.bf16.mxu1 (!%p138_p2), %v1031_v2  ;;  %v1036_v7 = vld [vmem:[%s1244_s1 + $0x98] sm:$0xff] (!%p138_p2)   ;;  %v1038_v9 = vld [vmem:[%s1244_s1 + $0xa0] sm:$0xff] (!%p138_p2)   ;;  %v1040_v12 = vld [vmem:[%s1244_s1 + $0xa8] sm:$0xff] (!%p138_p2)  }
   0x9   : > { %970 = vmatprep.subr.bf16.mxu0 (!%p138_p2), %v1032_v3  ;;  %v1041_v15 = vld [vmem:[%s1244_s1 + $0x70] sm:$0xff] (!%p138_p2)   ;;  %v1043_v27 = vld [vmem:[%s1244_s1 + $0x78] sm:$0xff] (!%p138_p2)   ;;  %v1047_v36 = vld [vmem:[%s1244_s1] sm:$0xff] (!%p138_p2)  }
   0xa   : > { %v1042_v22 = vld [vmem:[%s1244_s1 + $0xb0] sm:$0xff] (!%p138_p2)   ;;  %v1044_v31 = vld [vmem:[%s1244_s1 + $0xb8] sm:$0xff] (!%p138_p2)   ;;  %v1050_v38 = vld [vmem:[%s1244_s1 + $0xc0] sm:$0xff] (!%p138_p2)  }
   0xb   : > { %931 = vmatpush3.bf16.msra.mxu1 (!%p138_p2), %v1031_v2  ;;  %v1052_v45 = vld [vmem:[%s1244_s1 + $0x8] sm:$0xff] (!%p138_p2)   ;;  %v1054_v51 = vld [vmem:[%s1244_s1 + $0x10] sm:$0xff] (!%p138_p2)   ;;  %v1056_v54 = vld [vmem:[%s1244_s1 + $0x18] sm:$0xff] (!%p138_p2)  }
   0xc   : > { %971 = vmatpush3.bf16.msra.mxu0 (!%p138_p2), %v1032_v3  ;;  %932 = vmatprep.subr.bf16.mxu1 (!%p138_p2), %v1033_v4  ;;  %v1053_v47 = vld [vmem:[%s1244_s1 + $0xc8] sm:$0xff] (!%p138_p2)   ;;  %v1055_v52 = vld [vmem:[%s1244_s1 + $0xd0] sm:$0xff] (!%p138_p2)   ;;  %v1057_v55 = vld [vmem:[%s1244_s1 + $0xd8] sm:$0xff] (!%p138_p2)  }
   0xd   : > { %s1248_s13 = smov (!%p161_p3, %s829_s13), 1  ;;  %972 = vmatprep.subr.bf16.mxu0 %v1034_v5  ;;  %v1058_v56 = vld [vmem:[%s1244_s1 + $0x20] sm:$0xff]   ;;  %v1060_v58 = vld [vmem:[%s1244_s1 + $0x28] sm:$0xff]   ;;  %v1062_v61 = vld [vmem:[%s1244_s1 + $0x30] sm:$0xff]  }
   0xe   : > { %s1020_s30 = smul.u32 20, %s1248_s13  ;;  %v1059_v57 = vld [vmem:[%s1244_s1 + $0xe0] sm:$0xff]   ;;  %v1061_v60 = vld [vmem:[%s1244_s1 + $0xe8] sm:$0xff]   ;;  %v1063_v0 = vld [vmem:[%s1244_s1 + $0xf0] sm:$0xff]  }
   0xf   : > { %933 = vmatpush3.bf16.msra.mxu1 %v1033_v4  ;;  %v1064_v1 = vld [vmem:[%s1244_s1 + $0x38] sm:$0xff]  }
  0x10   : > { %973 = vmatpush3.bf16.msra.mxu0 %v1034_v5  ;;  %934 = vmatprep.subr.bf16.mxu1 %v1035_v6  ;;  %s1140_s10 = scalar_lea.vmem %s1243_s0, %s1020_s30  ;;  %v1065_v4 = vld [vmem:[%s1244_s1 + $0xf8] sm:$0xff]  }
  0x11   : > { %974 = vmatprep.subr.bf16.mxu0 %v1036_v7  ;;  %v1146_v11 = vld [vmem:[%s1140_s10 + $0x8] sm:$0xf]  ;;  %v192_v13 = vld [vmem:[%s1140_s10 + $0xc] sm:$0xf]  ;;  %v1153_v14 = vld [vmem:[%s1140_s10] sm:$0xff]  }
  0x12   : > { %v838_v16 = vcombine.low %v1146_v11, %v192_v13  ;;  %v221_v17 = vshrl.u32 %v1153_v14, 16  ;;  %v223_v18 = vshll.u32 %v1153_v14, 16  ;;  %v1048_v20 = vld [vmem:[%s1140_s10] sm:$0xf8]   ;;  %v1049_v21 = vld [vmem:[%s1140_s10 + $0x8] sm:$0xff]  }
  0x13   : > { %935 = vmatpush3.bf16.msra.mxu1 %v1035_v6  ;;  %v471_v25 = vrot.slane %v1048_v20, 3  ;;  %v472_v26 = vrot.slane %v1049_v21, 3  ;;  %v1051_v29 = vld [vmem:[%s1140_s10 + $0x10] ss:$0 sps:$4 sm:$0x33]   ;;  %v601_v34 = vshrl.u32 %v1048_v20, 16 }
  0x14   : > { %975 = vmatpush3.bf16.msra.mxu0 %v1036_v7  ;;  %936 = vmatprep.subr.bf16.mxu1 %v1037_v8  ;;  %v228_v19 = vshll.u32 %v838_v16, 16  ;;  %v225_v23 = vrot.slane %v223_v18, 1  ;;  %v232_v33 = vshrl.u32 %v838_v16, 16  ;;  %v604_v35 = vshll.u32 %v1048_v20, 16  ;;  %v175_v5 = vld [vmem:[%s1140_s10 + $0xc] sm:$0x7] }
  0x15   : > { %976 = vmatprep.subr.bf16.mxu0 %v1038_v9  ;;  %v473_v30 = vsel %vm470_vm0, %v471_v25, %v472_v26  ;;  %v474_v37 = vrot.slane %v1051_v29, 3  ;;  %v603_v39 = vrot.slane %v601_v34, 3  ;;  %v609_v42 = vshrl.u32 %v1049_v21, 16  ;;  %v1067_v59 = vld [vmem:[%s1140_s10 + $0x10] ss:$0 sps:$4 sm:$0x77]  }
  0x16   : > { %v230_v24 = vrot.slane %v228_v19, 1  ;;  %v226_v28 = vor.u32 %v225_v23, %v221_v17  ;;  %984 = vmatprep.mubr.bf16.mxu0 %v473_v30  ;;  %v606_v41 = vrot.slane %v604_v35, 4  ;;  %v612_v43 = vshll.u32 %v1049_v21, 16  ;;  %s883_s10 = sshll.u32 %s1248_s13, 4 }
  0x17   : > { %937 = vmatpush3.bf16.msra.mxu1 %v1037_v8  ;;  %v475_v44 = vsel %vm470_vm0, %v472_v26, %v474_v37  ;;  %v611_v46 = vrot.slane %v609_v42, 3  ;;  %v618_v62 = vshrl.u32 %v1067_v59, 16  ;;  %v621_v63 = vshll.u32 %v1067_v59, 16  ;;  %s170_s11 = scalar_lea.vmem %s1246_s3, %s883_s10 }
  0x18   : > { %977 = vmatpush3.bf16.msra.mxu0 %v1038_v9  ;;  %938 = vmatprep.subr.bf16.mxu1 %v1039_v10  ;;  %v231_v32 = vsel %vm219_vm1, %v226_v28, %v230_v24  ;;  %v234_v40 = vor.u32 %v232_v33, %v230_v24  ;;  %v614_v48 = vrot.slane %v612_v43, 4  ;;  %v607_v49 = vor.u32 %v606_v41, %v603_v39 }
  0x19   : > { %978 = vmatprep.subr.bf16.mxu0 %v1040_v12  ;;  %944 = vmatprep.mubr.bf16.mxu1 %v231_v32  ;;  %v620_v2 = vrot.slane %v618_v62, 3  ;;  %v623_v3 = vrot.slane %v621_v63, 4  ;;  %v847_v7 = vcombine.low %v1146_v11, %v175_v5 }
  0x1a   : > { %v615_v50 = vor.u32 %v614_v48, %v611_v46 }
  0x1b   : > { %939 = vmatpush3.bf16.msra.mxu1 %v1039_v10  ;;  %v624_v6 = vor.u32 %v623_v3, %v620_v2 }
  0x1c   : > { %979 = vmatpush3.bf16.msra.mxu0 %v1040_v12  ;;  %940 = vmatprep.subr.bf16.mxu1 %v1041_v15  ;;  %v616_v53 = vsel %vm599_vm2, %v607_v49, %v615_v50  ;;  %v876_v12 = vld [vmem:[%s1245_s2] ss:$0 sm:$0xff] }
  0x1d   : > { %980 = vmatprep.subr.bf16.mxu0 %v1042_v22  ;;  %v625_v8 = vsel %vm599_vm2, %v615_v50, %v624_v6 }
  0x1f   : > { %941 = vmatpush3.bf16.msra.mxu1 %v1041_v15 }
  0x20   : > { %981 = vmatpush3.bf16.msra.mxu0 %v1042_v22  ;;  %942 = vmatprep.subr.bf16.mxu1 %v1043_v27 }
  0x21   : > { %982 = vmatprep.subr.bf16.mxu0 %v1044_v31 }
  0x23   : > { %943 = vmatpush3.bf16.msra.mxu1 %v1043_v27 }
  0x24   : > { %983 = vmatpush3.bf16.msra.mxu0 %v1044_v31  ;;  %948 = vmatprep.subr.bf16.mxu1 %v1047_v36 }
  0x25   : > { %988 = vmatprep.subr.bf16.mxu0 %v1050_v38 }
  0x26   : > { %945 = vmatmul.mubr.bf16.vlgmr.msra.gmra.mrb[0].mxu1 %v234_v40 }
  0x27   : > { %949 = vmatpush3.bf16.msra.mxu1 %v1047_v36  ;;  %985 = vmatmul.mubr.bf16.vlgmr.msra.gmra.mrb[0].mxu0 %v475_v44 }
  0x28   : > { %989 = vmatpush3.bf16.msra.mxu0 %v1050_v38  ;;  %950 = vmatprep.subr.bf16.mxu1 %v1052_v45 }
  0x29   : > { %990 = vmatprep.subr.bf16.mxu0 %v1053_v47  ;;  %964 = vmatprep.mubr.bf16.mxu1 %v1153_v14 }
  0x2a   : > { %1004 = vmatprep.mubr.bf16.mxu0 %v616_v53 }
  0x2b   : > { %951 = vmatpush3.bf16.msra.mxu1 %v1052_v45 }
  0x2c   : > { %991 = vmatpush3.bf16.msra.mxu0 %v1053_v47  ;;  %952 = vmatprep.subr.bf16.mxu1 %v1054_v51 }
  0x2d   : > { %992 = vmatprep.subr.bf16.mxu0 %v1055_v52 }
  0x2f   : > { %953 = vmatpush3.bf16.msra.mxu1 %v1054_v51 }
  0x30   : > { %993 = vmatpush3.bf16.msra.mxu0 %v1055_v52  ;;  %954 = vmatprep.subr.bf16.mxu1 %v1056_v54 }
  0x31   : > { %994 = vmatprep.subr.bf16.mxu0 %v1057_v55 }
  0x33   : > { %955 = vmatpush3.bf16.msra.mxu1 %v1056_v54 }
  0x34   : > { %995 = vmatpush3.bf16.msra.mxu0 %v1057_v55  ;;  %956 = vmatprep.subr.bf16.mxu1 %v1058_v56 }
  0x35   : > { %996 = vmatprep.subr.bf16.mxu0 %v1059_v57 }
  0x37   : > { %957 = vmatpush3.bf16.msra.mxu1 %v1058_v56 }
  0x38   : > { %997 = vmatpush3.bf16.msra.mxu0 %v1059_v57  ;;  %958 = vmatprep.subr.bf16.mxu1 %v1060_v58 }
  0x39   : > { %998 = vmatprep.subr.bf16.mxu0 %v1061_v60 }
  0x3b   : > { %959 = vmatpush3.bf16.msra.mxu1 %v1060_v58 }
  0x3c   : > { %999 = vmatpush3.bf16.msra.mxu0 %v1061_v60  ;;  %960 = vmatprep.subr.bf16.mxu1 %v1062_v61 }
  0x3d   : > { %1000 = vmatprep.subr.bf16.mxu0 %v1063_v0 }
  0x3f   : > { %961 = vmatpush3.bf16.msra.mxu1 %v1062_v61 }
  0x40   : > { %1001 = vmatpush3.bf16.msra.mxu0 %v1063_v0  ;;  %962 = vmatprep.subr.bf16.mxu1 %v1064_v1 }
  0x41   : > { %1002 = vmatprep.subr.bf16.mxu0 %v1065_v4 }
  0x43   : > { %963 = vmatpush3.bf16.msra.mxu1 %v1064_v1 }
  0x44   : > { %1003 = vmatpush3.bf16.msra.mxu0 %v1065_v4 }
  0x46   : > { %965 = vmatmul.mubr.bf16.vlgmr.msra.gmra.mrb[0].mxu1 %v847_v7 }
  0x47   : > { %1005 = vmatmul.mubr.bf16.vlgmr.msra.gmra.mrb[0].mxu0 %v625_v8 }
 0x119   : > { %v966_v9 = vpop.f32.mrb[0].mxu1 }
 0x11a   : > { %v1006_v10 = vpop.f32.mrb[0].mxu0  ;;  %v421_v13 = vpop.f32.mrb[1].mxu1 }
 0x11b   : > { %v1008_v14 = vadd.f32 %v1006_v10, %v966_v9  ;;  %v710_v15 = vpop.f32.mrb[1].mxu0  ;;  %v967_v16 = vpop.f32.mrb[2].mxu1 }
 0x11c   : > { %v1009_v17 = vadd.f32 %v710_v15, %v421_v13  ;;  %v1007_v18 = vpop.f32.mrb[2].mxu0  ;;  %v424_v11 = vpop.f32.mrb[3].mxu1 }
 0x11d   : > { %v738_v19 = vadd.f32 %v1008_v14, %v876_v12  ;;  %v1010_v20 = vadd.f32 %v1007_v18, %v967_v16  ;;  %v713_v21 = vpop.f32.mrb[3].mxu0 }
 0x11e   : > { %v736_v22 = vadd.f32 %v1009_v17, %v876_v12  ;;  %v1011_v23 = vadd.f32 %v713_v21, %v424_v11 }
 0x11f   : > { %vm742_vm3 = vcmp.ge.f32.partialorder %v738_v19, 0.0  ;;  %v746_v24 = vmul.f32 0.2, %v738_v19  ;;  %v739_v25 = vadd.f32 %v1010_v20, %v876_v12 }
 0x120   : > { %vm740_vm4 = vcmp.ge.f32.partialorder %v736_v22, 0.0  ;;  %v744_v26 = vmul.f32 0.2, %v736_v22  ;;  %v737_v27 = vadd.f32 %v1011_v23, %v876_v12 }
 0x121   : > { %v750_v28 = vsel %vm742_vm3, %v738_v19, %v746_v24  ;;  %vm743_vm6 = vcmp.ge.f32.partialorder %v739_v25, 0.0  ;;  %v747_v29 = vmul.f32 0.2, %v739_v25 }
 0x122   : > { %v886_v30 = vpack.c.bf16 %v750_v28, %v750_v28  ;;  %v748_v31 = vsel %vm740_vm4, %v736_v22, %v744_v26  ;;  %vm741_vm7 = vcmp.ge.f32.partialorder %v737_v27, 0.0  ;;  %v745_v32 = vmul.f32 0.2, %v737_v27 }
 0x123   : > { %v884_v33 = vpack.c.bf16 %v748_v31, %v748_v31  ;;  %v751_v34 = vsel %vm743_vm6, %v739_v25, %v747_v29 }
 0x124   : > { %771 = vst.msk [vmem:[%s170_s11 + $0x8] sm:$0xf] %vm768_vm5, %v886_v30  ;;  %v887_v35 = vpack.c.bf16 %v751_v34, %v751_v34  ;;  %v749_v36 = vsel %vm741_vm7, %v737_v27, %v745_v32 }
 0x125   : > { %769 = vst.msk [vmem:[%s170_s11] sm:$0xf] %vm768_vm5, %v884_v33  ;;  %v885_v37 = vpack.c.bf16 %v749_v36, %v749_v36 }
 0x126   : > { %773 = vst.msk [vmem:[%s170_s11 + $0xc] sm:$0x7] %vm772_vm8, %v887_v35 }
 0x127   : > { %770 = vst.msk [vmem:[%s170_s11 + $0x4] sm:$0xf] %vm768_vm5, %v885_v37 }
 0x128 PF: > { %s13_s12 = sadd.s32 1, %s1074_s12  }
 0x129   : > { %p10_p4 = scmp.ge.s32.totalorder %s13_s12, 4  }
 0x12b   :  { %12 = sbr.rel (!%p10_p4) target bundleno = 1 (0x1), region = 62 }

// kernel: multiscale_discriminator_forward.13
= control target key start
LH: loop header
LB: loop body
LE: loop exit
PB: predicated region body
PF: predicated region fallthrough
CT: control target
= control target key end

     0   :  { %s1314_s12 = smov 0   ;;  %s1543_s0 = inlined_call_operand.vmem [shape: bf16[2,24,256], index: 0, kind: input, shape index: {}]   ;;  %s1544_s1 = inlined_call_operand.vmem [shape: bf16[1024,128], index: 1, kind: input, shape index: {}]   ;;  %s1545_s2 = inlined_call_operand.vmem [shape: f32[1,128], index: 2, kind: input, shape index: {}]   ;;  %s1546_s3 = inlined_call_operand.vmem [shape: bf16[2,12,128], index: 3, kind: output, shape index: {}]  }
   0x1 LB: > { %s1025_s13 = sadd.s32 4294967295, %s1292_s12   ;;  %p1029_p0 = scmp.ge.s32.totalorder %s1292_s12, 1  ;;  %s1292_s12 = sphi %s1314_s12, %s13_s12  }
   0x2   : > { %p137_p1 = scmp.lt.s32.totalorder %s1292_s12, 3 }
   0x4   : > { %p138_p2 = pnand %p1029_p0, %p137_p1 }
   0x5   : > { %v1212_v0 = vld [vmem:[%s1544_s1 + $0xc0] sm:$0xff] (!%p138_p2)   ;;  %v1216_v4 = vld [vmem:[%s1544_s1 + $0xc8] sm:$0xff] (!%p138_p2)   ;;  %v1220_v8 = vld [vmem:[%s1544_s1 + $0xd0] sm:$0xff] (!%p138_p2)   ;;  %p161_p3 = scmp.lt.s32.totalorder (!%p138_p2), %s1025_s13, 1  ;;  %vm777_vm0 = vsmask.f32 (!%p138_p2), 5376 }
   0x6   : > { %141 = sbr.rel (%p138_p2) target bundleno = 300 (0x12c), region = 32  ;;  %v1213_v1 = vld [vmem:[%s1544_s1 + $0x40] sm:$0xff] (!%p138_p2)   ;;  %1115 = vmatprep.subr.bf16.mxu0 (!%p138_p2), %v1212_v0  ;;  %v1217_v5 = vld [vmem:[%s1544_s1 + $0x48] sm:$0xff] (!%p138_p2)   ;;  %v1221_v9 = vld [vmem:[%s1544_s1 + $0x50] sm:$0xff] (!%p138_p2)  }
   0x7   : > { %v1214_v2 = vld [vmem:[%s1544_s1 + $0x80] sm:$0xff] (!%p138_p2)   ;;  %1137 = vmatprep.subr.bf16.mxu1 (!%p138_p2), %v1213_v1  ;;  %v1218_v6 = vld [vmem:[%s1544_s1 + $0x88] sm:$0xff] (!%p138_p2)   ;;  %v1222_v10 = vld [vmem:[%s1544_s1 + $0x90] sm:$0xff] (!%p138_p2)  }
   0x8   : > { %v1215_v3 = vld [vmem:[%s1544_s1] sm:$0xff] (!%p138_p2)   ;;  %1116 = vmatpush3.bf16.msra.mxu0 (!%p138_p2), %v1214_v2  ;;  %v1219_v7 = vld [vmem:[%s1544_s1 + $0x8] sm:$0xff] (!%p138_p2)   ;;  %v1223_v11 = vld [vmem:[%s1544_s1 + $0x10] sm:$0xff] (!%p138_p2)  }
   0x9   : > { %1138 = vmatpush3.bf16.msra.mxu1 (!%p138_p2), %v1215_v3  ;;  %1117 = vmatprep.subr.bf16.mxu0 (!%p138_p2), %v1216_v4  ;;  %v1224_v12 = vld [vmem:[%s1544_s1 + $0xd8] sm:$0xff] (!%p138_p2)   ;;  %v1228_v16 = vld [vmem:[%s1544_s1 + $0xe0] sm:$0xff] (!%p138_p2)   ;;  %v1232_v20 = vld [vmem:[%s1544_s1 + $0xe8] sm:$0xff] (!%p138_p2)  }
   0xa   : > { %1139 = vmatprep.subr.bf16.mxu1 (!%p138_p2), %v1217_v5  ;;  %v1225_v13 = vld [vmem:[%s1544_s1 + $0x58] sm:$0xff] (!%p138_p2)   ;;  %v1229_v17 = vld [vmem:[%s1544_s1 + $0x60] sm:$0xff] (!%p138_p2)   ;;  %v1233_v21 = vld [vmem:[%s1544_s1 + $0x68] sm:$0xff] (!%p138_p2)  }
   0xb   : > { %v1226_v14 = vld [vmem:[%s1544_s1 + $0x98] sm:$0xff] (!%p138_p2)   ;;  %v1230_v18 = vld [vmem:[%s1544_s1 + $0xa0] sm:$0xff] (!%p138_p2)   ;;  %v1234_v22 = vld [vmem:[%s1544_s1 + $0xa8] sm:$0xff] (!%p138_p2)  }
   0xc   : > { %1118 = vmatpush3.bf16.msra.mxu0 (!%p138_p2), %v1218_v6  ;;  %v1227_v15 = vld [vmem:[%s1544_s1 + $0x18] sm:$0xff] (!%p138_p2)   ;;  %v1231_v19 = vld [vmem:[%s1544_s1 + $0x20] sm:$0xff] (!%p138_p2)   ;;  %v1235_v23 = vld [vmem:[%s1544_s1 + $0x28] sm:$0xff] (!%p138_p2)  }
   0xd   : > { %1140 = vmatpush3.bf16.msra.mxu1 %v1219_v7  ;;  %1119 = vmatprep.subr.bf16.mxu0 %v1220_v8  ;;  %s1548_s13 = smov (!%p161_p3, %s1025_s13), 1  ;;  %v1236_v24 = vld [vmem:[%s1544_s1 + $0xf0] sm:$0xff]   ;;  %v1240_v28 = vld [vmem:[%s1544_s1 + $0xf8] sm:$0xff]   ;;  %v1248_v39 = vld [vmem:[%s1544_s1 + $0x140] sm:$0xff]  }
   0xe   : > { %1141 = vmatprep.subr.bf16.mxu1 %v1221_v9  ;;  %v1237_v25 = vld [vmem:[%s1544_s1 + $0x70] sm:$0xff]   ;;  %s1203_s16 = smul.u32 24, %s1548_s13  ;;  %v1241_v29 = vld [vmem:[%s1544_s1 + $0x78] sm:$0xff]   ;;  %v1249_v40 = vld [vmem:[%s1544_s1 + $0x1c0] sm:$0xff]   ;;  %s1112_s24 = sshll.u32 %s1548_s13, 3 }
   0xf   : > { %v1238_v26 = vld [vmem:[%s1544_s1 + $0xb0] sm:$0xff]   ;;  %v1242_v30 = vld [vmem:[%s1544_s1 + $0xb8] sm:$0xff]   ;;  %v1250_v47 = vld [vmem:[%s1544_s1 + $0x100] sm:$0xff]   ;;  %s170_s28 = scalar_lea.vmem %s1546_s3, %s1112_s24 }
  0x10   : > { %1120 = vmatpush3.bf16.msra.mxu0 %v1222_v10  ;;  %v1239_v27 = vld [vmem:[%s1544_s1 + $0x30] sm:$0xff]   ;;  %s1422_s27 = scalar_lea.vmem %s1543_s0, %s1203_s16  ;;  %v1243_v31 = vld [vmem:[%s1544_s1 + $0x38] sm:$0xff]   ;;  %v1251_v48 = vld [vmem:[%s1544_s1 + $0x180] sm:$0xff]  }
  0x11   : > { %1142 = vmatpush3.bf16.msra.mxu1 %v1223_v11  ;;  %1121 = vmatprep.subr.bf16.mxu0 %v1224_v12  ;;  %v172_v32 = vld [vmem:[%s1422_s27] sm:$0xff]  ;;  %v206_v33 = vld [vmem:[%s1422_s27 + $0x8] sm:$0x77]  ;;  %v1257_v55 = vld [vmem:[%s1544_s1 + $0x1d0] sm:$0xff]  }
  0x12   : > { %1143 = vmatprep.subr.bf16.mxu1 %v1225_v13  ;;  %v173_v34 = vld [vmem:[%s1422_s27 + $0x8] sm:$0x33]  ;;  %v1033_v35 = vcombine.low %v172_v32, %v206_v33  ;;  %v1034_v36 = vcombine.high %v172_v32, %v206_v33  ;;  %v1256_v56 = vld [vmem:[%s1544_s1 + $0x150] sm:$0xff]   ;;  %v1261_v59 = vld [vmem:[%s1544_s1 + $0x1d8] sm:$0xff]  }
  0x13   : > { %v1051_v37 = vcombine.low %v172_v32, %v173_v34  ;;  %v1052_v38 = vcombine.high %v172_v32, %v173_v34  ;;  %v1253_v51 = vld [vmem:[%s1544_s1 + $0x1c8] sm:$0xff]   ;;  %v1259_v57 = vld [vmem:[%s1544_s1 + $0x190] sm:$0xff]   ;;  %v1260_v60 = vld [vmem:[%s1544_s1 + $0x158] sm:$0xff]  }
  0x14   : > { %1122 = vmatpush3.bf16.msra.mxu0 %v1226_v14  ;;  %v255_v41 = vshrl.u32 %v1034_v36, 16  ;;  %v257_v42 = vshll.u32 %v1034_v36, 16  ;;  %v248_v43 = vshrl.u32 %v1033_v35, 16  ;;  %v250_v44 = vshll.u32 %v1033_v35, 16  ;;  %v1252_v52 = vld [vmem:[%s1544_s1 + $0x148] sm:$0xff]   ;;  %v1258_v58 = vld [vmem:[%s1544_s1 + $0x110] sm:$0xff]  }
  0x15   : > { %1144 = vmatpush3.bf16.msra.mxu1 %v1227_v15  ;;  %1123 = vmatprep.subr.bf16.mxu0 %v1228_v16  ;;  %v1255_v53 = vld [vmem:[%s1544_s1 + $0x188] sm:$0xff]   ;;  %v1263_v61 = vld [vmem:[%s1544_s1 + $0x198] sm:$0xff]   ;;  %v1265_v63 = vld [vmem:[%s1544_s1 + $0x1e0] sm:$0xff]  }
  0x16   : > { %1145 = vmatprep.subr.bf16.mxu1 %v1229_v17  ;;  %535 = vmatprep.mubr.bf16.mxu1 %v1052_v38  ;;  %v259_v45 = vrot.slane %v257_v42, 1  ;;  %v252_v46 = vrot.slane %v250_v44, 1  ;;  %v1254_v54 = vld [vmem:[%s1544_s1 + $0x108] sm:$0xff]   ;;  %v1262_v62 = vld [vmem:[%s1544_s1 + $0x118] sm:$0xff]   ;;  %v1264_v0 = vld [vmem:[%s1544_s1 + $0x160] sm:$0xff]  }
  0x17   : > { %v1267_v1 = vld [vmem:[%s1544_s1 + $0x1a0] sm:$0xff]   ;;  %v1269_v3 = vld [vmem:[%s1544_s1 + $0x1e8] sm:$0xff]   ;;  %v1273_v7 = vld [vmem:[%s1544_s1 + $0x1f0] sm:$0xff]  }
  0x18   : > { %1124 = vmatpush3.bf16.msra.mxu0 %v1230_v18  ;;  %v260_v49 = vor.u32 %v259_v45, %v255_v41  ;;  %v253_v50 = vor.u32 %v252_v46, %v248_v43  ;;  %v1266_v2 = vld [vmem:[%s1544_s1 + $0x120] sm:$0xff]   ;;  %v1268_v4 = vld [vmem:[%s1544_s1 + $0x168] sm:$0xff]   ;;  %v1272_v8 = vld [vmem:[%s1544_s1 + $0x170] sm:$0xff]  }
  0x19   : > { %1146 = vmatpush3.bf16.msra.mxu1 %v1231_v19  ;;  %1125 = vmatprep.subr.bf16.mxu0 %v1232_v20  ;;  %v1271_v5 = vld [vmem:[%s1544_s1 + $0x1a8] sm:$0xff]   ;;  %v1275_v9 = vld [vmem:[%s1544_s1 + $0x1b0] sm:$0xff]   ;;  %v1277_v11 = vld [vmem:[%s1544_s1 + $0x1f8] sm:$0xff]  }
  0x1a   : > { %1147 = vmatprep.subr.bf16.mxu1 %v1233_v21  ;;  %391 = vmatprep.mubr.bf16.mxu0 %v260_v49  ;;  %v1270_v6 = vld [vmem:[%s1544_s1 + $0x128] sm:$0xff]   ;;  %v1274_v10 = vld [vmem:[%s1544_s1 + $0x130] sm:$0xff]   ;;  %v1276_v12 = vld [vmem:[%s1544_s1 + $0x178] sm:$0xff]  }
  0x1b   : > { %v1279_v13 = vld [vmem:[%s1544_s1 + $0x1b8] sm:$0xff]   ;;  %v544_v14 = vld [vmem:[%s1422_s27] sm:$0xcc]  ;;  %v545_v15 = vld [vmem:[%s1422_s27 + $0x8] sm:$0xff] }
  0x1c   : > { %1126 = vmatpush3.bf16.msra.mxu0 %v1234_v22  ;;  %v729_v16 = vld [vmem:[%s1422_s27] sm:$0xcc]  ;;  %v731_v17 = vld [vmem:[%s1422_s27 + $0x10] sm:$0x11]  ;;  %v1278_v18 = vld [vmem:[%s1544_s1 + $0x138] sm:$0xff]   ;;  %v1069_v19 = vcombine.low %v544_v14, %v545_v15  ;;  %v1070_v20 = vcombine.high %v544_v14, %v545_v15 }
  0x1d   : > { %1148 = vmatpush3.bf16.msra.mxu1 %v1235_v23  ;;  %1127 = vmatprep.subr.bf16.mxu0 %v1236_v24  ;;  %v1088_v21 = vcombine.high %v729_v16, %v545_v15  ;;  %v1090_v22 = vcombine.high %v731_v17, %v731_v17  ;;  %v1087_v23 = vcombine.low %v729_v16, %v545_v15 }
  0x1e   : > { %1149 = vmatprep.subr.bf16.mxu1 %v1237_v25  ;;  %v1089_v24 = vcombine.low %v731_v17, %v731_v17  ;;  %v586_v25 = vrot.slane %v1069_v19, 2 }
  0x20   : > { %1128 = vmatpush3.bf16.msra.mxu0 %v1238_v26  ;;  %v587_v26 = vrot.slane %v1070_v20, 2  ;;  %v787_v32 = vshll.u32 %v1089_v24, 16 }
  0x21   : > { %1150 = vmatpush3.bf16.msra.mxu1 %v1239_v27  ;;  %1129 = vmatprep.subr.bf16.mxu0 %v1240_v28  ;;  %v792_v27 = vshrl.u32 %v1088_v21, 16  ;;  %v795_v28 = vshll.u32 %v1088_v21, 16 }
  0x22   : > { %1151 = vmatprep.subr.bf16.mxu1 %v1241_v29  ;;  %v800_v29 = vshll.u32 %v1090_v22, 16  ;;  %v789_v38 = vrot.slane %v787_v32, 3 }
  0x23   : > { %v794_v33 = vrot.slane %v792_v27, 2  ;;  %v797_v34 = vrot.slane %v795_v28, 3 }
  0x24   : > { %1130 = vmatpush3.bf16.msra.mxu0 %v1242_v30  ;;  %v779_v30 = vshrl.u32 %v1087_v23, 16  ;;  %v802_v35 = vrot.slane %v800_v29, 3 }
  0x25   : > { %1152 = vmatpush3.bf16.msra.mxu1 %v1243_v31  ;;  %1159 = vmatprep.subr.bf16.mxu0 %v1248_v39  ;;  %v782_v31 = vshll.u32 %v1087_v23, 16  ;;  %v798_v39 = vor.u32 %v797_v34, %v794_v33 }
  0x26   : > { %1181 = vmatprep.subr.bf16.mxu1 %v1249_v40  ;;  %v781_v36 = vrot.slane %v779_v30, 2 }
  0x27   : > { %392 = vmatmul.mubr.bf16.vlgmr.msra.gmra.mrb[0].mxu0 %v253_v50  ;;  %v803_v41 = vsel %vm777_vm0, %v798_v39, %v802_v35 }
  0x28   : > { %536 = vmatmul.mubr.bf16.vlgmr.msra.gmra.mrb[0].mxu1 %v1051_v37  ;;  %1160 = vmatpush3.bf16.msra.mxu0 %v1250_v47  ;;  %v784_v37 = vrot.slane %v782_v31, 3 }
  0x29   : > { %1182 = vmatpush3.bf16.msra.mxu1 %v1251_v48  ;;  %1161 = vmatprep.subr.bf16.mxu0 %v1252_v52 }
  0x2a   : > { %1183 = vmatprep.subr.bf16.mxu1 %v1253_v51  ;;  %718 = vmatprep.mubr.bf16.mxu0 %v587_v26  ;;  %v785_v40 = vor.u32 %v784_v37, %v781_v36 }
  0x2b   : > { %934 = vmatprep.mubr.bf16.mxu1 %v803_v41 }
  0x2c   : > { %1162 = vmatpush3.bf16.msra.mxu0 %v1254_v54  ;;  %v790_v42 = vsel %vm777_vm0, %v785_v40, %v789_v38 }
  0x2d   : > { %1184 = vmatpush3.bf16.msra.mxu1 %v1255_v53  ;;  %1163 = vmatprep.subr.bf16.mxu0 %v1256_v56 }
  0x2e   : > { %1185 = vmatprep.subr.bf16.mxu1 %v1257_v55 }
  0x30   : > { %1164 = vmatpush3.bf16.msra.mxu0 %v1258_v58 }
  0x31   : > { %1186 = vmatpush3.bf16.msra.mxu1 %v1259_v57  ;;  %1165 = vmatprep.subr.bf16.mxu0 %v1260_v60 }
  0x32   : > { %1187 = vmatprep.subr.bf16.mxu1 %v1261_v59 }
  0x34   : > { %1166 = vmatpush3.bf16.msra.mxu0 %v1262_v62 }
  0x35   : > { %1188 = vmatpush3.bf16.msra.mxu1 %v1263_v61  ;;  %1167 = vmatprep.subr.bf16.mxu0 %v1264_v0 }
  0x36   : > { %1189 = vmatprep.subr.bf16.mxu1 %v1265_v63 }
  0x38   : > { %1168 = vmatpush3.bf16.msra.mxu0 %v1266_v2 }
  0x39   : > { %1190 = vmatpush3.bf16.msra.mxu1 %v1267_v1  ;;  %1169 = vmatprep.subr.bf16.mxu0 %v1268_v4  ;;  %v1107_v4 = vld [vmem:[%s1545_s2] ss:$0 sm:$0xff] }
  0x3a   : > { %1191 = vmatprep.subr.bf16.mxu1 %v1269_v3 }
  0x3c   : > { %1170 = vmatpush3.bf16.msra.mxu0 %v1270_v6 }
  0x3d   : > { %1192 = vmatpush3.bf16.msra.mxu1 %v1271_v5  ;;  %1171 = vmatprep.subr.bf16.mxu0 %v1272_v8 }
  0x3e   : > { %1193 = vmatprep.subr.bf16.mxu1 %v1273_v7 }
  0x40   : > { %1172 = vmatpush3.bf16.msra.mxu0 %v1274_v10 }
  0x41   : > { %1194 = vmatpush3.bf16.msra.mxu1 %v1275_v9  ;;  %1173 = vmatprep.subr.bf16.mxu0 %v1276_v12 }
  0x42   : > { %1195 = vmatprep.subr.bf16.mxu1 %v1277_v11 }
  0x44   : > { %1174 = vmatpush3.bf16.msra.mxu0 %v1278_v18 }
  0x45   : > { %1196 = vmatpush3.bf16.msra.mxu1 %v1279_v13 }
  0x47   : > { %719 = vmatmul.mubr.bf16.vlgmr.msra.gmra.mrb[4].mxu0 %v586_v25 }
  0x48   : > { %935 = vmatmul.mubr.bf16.vlgmr.msra.gmra.mrb[4].mxu1 %v790_v42 }
  0xfa   : > { %v1131_v49 = vpop.f32.mrb[0].mxu0 }
  0xfb   : > { %v1153_v43 = vpop.f32.mrb[0].mxu1  ;;  %v1132_v50 = vpop.f32.mrb[1].mxu0 }
  0xfc   : > { %v1154_v44 = vpop.f32.mrb[1].mxu1  ;;  %v1133_v51 = vadd.f32 %v1132_v50, %v1131_v49  ;;  %v1134_v52 = vpop.f32.mrb[2].mxu0 }
  0xfd   : > { %v1155_v45 = vadd.f32 %v1154_v44, %v1153_v43  ;;  %v1156_v46 = vpop.f32.mrb[2].mxu1  ;;  %v1135_v53 = vpop.f32.mrb[3].mxu0 }
  0xfe   : > { %v1157_v47 = vpop.f32.mrb[3].mxu1  ;;  %v1136_v55 = vadd.f32 %v1135_v53, %v1134_v52 }
  0xff   : > { %v1158_v48 = vadd.f32 %v1157_v47, %v1156_v46  ;;  %v538_v54 = vadd.f32 %v1155_v45, %v1133_v51 }
 0x101   : > { %v541_v56 = vadd.f32 %v1158_v48, %v1136_v55 }
 0x11a   : > { %v1175_v57 = vpop.f32.mrb[4].mxu0 }
 0x11b   : > { %v1176_v58 = vpop.f32.mrb[5].mxu0  ;;  %v1197_v61 = vpop.f32.mrb[4].mxu1 }
 0x11c   : > { %v1177_v59 = vadd.f32 %v1176_v58, %v1175_v57  ;;  %v1178_v60 = vpop.f32.mrb[6].mxu0  ;;  %v1198_v0 = vpop.f32.mrb[5].mxu1 }
 0x11d   : > { %v1179_v62 = vpop.f32.mrb[7].mxu0  ;;  %v1199_v2 = vadd.f32 %v1198_v0, %v1197_v61  ;;  %v1200_v3 = vpop.f32.mrb[6].mxu1 }
 0x11e   : > { %v727_v63 = vadd.f32 %v1177_v59, %v538_v54  ;;  %v1180_v1 = vadd.f32 %v1179_v62, %v1178_v60  ;;  %v1201_v6 = vpop.f32.mrb[7].mxu1 }
 0x11f   : > { %v1202_v8 = vadd.f32 %v1201_v6, %v1200_v3 }
 0x120   : > { %v728_v5 = vadd.f32 %v1180_v1, %v541_v56  ;;  %v943_v7 = vadd.f32 %v1199_v2, %v727_v63 }
 0x122   : > { %v952_v9 = vadd.f32 %v1107_v4, %v943_v7  ;;  %v944_v10 = vadd.f32 %v1202_v8, %v728_v5 }
 0x124   : > { %vm954_vm1 = vcmp.ge.f32.partialorder %v952_v9, 0.0  ;;  %v956_v11 = vmul.f32 0.2, %v952_v9  ;;  %v953_v12 = vadd.f32 %v1107_v4, %v944_v10 }
 0x126   : > { %v958_v13 = vsel %vm954_vm1, %v952_v9, %v956_v11  ;;  %vm955_vm2 = vcmp.ge.f32.partialorder %v953_v12, 0.0  ;;  %v957_v14 = vmul.f32 0.2, %v953_v12 }
 0x127   : > { %v1113_v15 = vpack.c.bf16 %v958_v13, %v958_v13 }
 0x128   : > { %v959_v16 = vsel %vm955_vm2, %v953_v12, %v957_v14 }
 0x129   : > { %968 = vst [vmem:[%s170_s28] sm:$0xf] %v1113_v15  ;;  %v1114_v17 = vpack.c.bf16 %v959_v16, %v959_v16 }
 0x12b   : > { %969 = vst [vmem:[%s170_s28 + $0x4] sm:$0x3] %v1114_v17 }
 0x12c PF: > { %s13_s12 = sadd.s32 1, %s1292_s12  }
 0x12d   : > { %p10_p4 = scmp.ge.s32.totalorder %s13_s12, 4  }
 0x12f   :  { %12 = sbr.rel (!%p10_p4) target bundleno = 1 (0x1), region = 62 }

// kernel: multiscale_discriminator_forward.14
= control target key start
LH: loop header
LB: loop body
LE: loop exit
PB: predicated region body
PF: predicated region fallthrough
CT: control target
= control target key end

     0   :  { %s2982_s12 = smov 0   ;;  %s3830_s0 = inlined_call_operand.vmem [shape: bf16[2,16,512], index: 0, kind: input, shape index: {}]   ;;  %s3831_s1 = inlined_call_operand.vmem [shape: bf16[2048,256], index: 1, kind: input, shape index: {}]   ;;  %s3832_s2 = inlined_call_operand.vmem [shape: f32[1,256], index: 2, kind: input, shape index: {}]   ;;  %s3833_s3 = inlined_call_operand.vmem [shape: bf16[2,6,256], index: 3, kind: output, shape index: {}]  }
   0x1 LB: > { %s2259_s13 = sadd.s32 4294967295, %s2960_s12   ;;  %p2263_p0 = scmp.ge.s32.totalorder %s2960_s12, 1  ;;  %s2960_s12 = sphi %s2982_s12, %s13_s12  }
   0x2   : > { %p137_p1 = scmp.lt.s32.totalorder %s2960_s12, 3 }
   0x4   : > { %p138_p2 = pnand %p2263_p0, %p137_p1 }
   0x5   : > { %v2554_v0 = vld [vmem:[%s3831_s1 + $0x204] ss:$8 sps:$4 sm:$0xff] (!%p138_p2)   ;;  %v2558_v2 = vld [vmem:[%s3831_s1 + $0x200] ss:$8 sps:$4 sm:$0xff] (!%p138_p2)   ;;  %v2560_v4 = vld [vmem:[%s3831_s1 + $0x214] ss:$8 sps:$4 sm:$0xff] (!%p138_p2)  }
   0x6   : > { %141 = sbr.rel (%p138_p2) target bundleno = 488 (0x1e8), region = 32  ;;  %v2556_v1 = vld [vmem:[%s3831_s1 + $0x304] ss:$8 sps:$4 sm:$0xff] (!%p138_p2)   ;;  %665 = vmatprep.subr.bf16.mxu0 (!%p138_p2), %v2554_v0  ;;  %v2559_v3 = vld [vmem:[%s3831_s1 + $0x300] ss:$8 sps:$4 sm:$0xff] (!%p138_p2)   ;;  %p161_p3 = scmp.lt.s32.totalorder (!%p138_p2), %s2259_s13, 1 }
   0x7   : > { %706 = vmatprep.subr.bf16.mxu1 (!%p138_p2), %v2556_v1  ;;  %666 = vmatpush1.bf16.msra.mxu0 (!%p138_p2), %v2558_v2  ;;  %v2562_v5 = vld [vmem:[%s3831_s1 + $0x314] ss:$8 sps:$4 sm:$0xff] (!%p138_p2)   ;;  %v2564_v6 = vld [vmem:[%s3831_s1 + $0x210] ss:$8 sps:$4 sm:$0xff] (!%p138_p2)   ;;  %v2566_v8 = vld [vmem:[%s3831_s1 + $0x224] ss:$8 sps:$4 sm:$0xff] (!%p138_p2)  }
   0x8   : > { %707 = vmatpush1.bf16.msra.mxu1 (!%p138_p2), %v2559_v3  ;;  %667 = vmatprep.subr.bf16.mxu0 (!%p138_p2), %v2560_v4  ;;  %v2565_v7 = vld [vmem:[%s3831_s1 + $0x310] ss:$8 sps:$4 sm:$0xff] (!%p138_p2)   ;;  %v2568_v9 = vld [vmem:[%s3831_s1 + $0x324] ss:$8 sps:$4 sm:$0xff] (!%p138_p2)   ;;  %v2570_v10 = vld [vmem:[%s3831_s1 + $0x220] ss:$8 sps:$4 sm:$0xff] (!%p138_p2)  }
   0x9   : > { %708 = vmatprep.subr.bf16.mxu1 (!%p138_p2), %v2562_v5  ;;  %v2571_v11 = vld [vmem:[%s3831_s1 + $0x320] ss:$8 sps:$4 sm:$0xff] (!%p138_p2)   ;;  %v2572_v12 = vld [vmem:[%s3831_s1 + $0x234] ss:$8 sps:$4 sm:$0xff] (!%p138_p2)   ;;  %v2576_v14 = vld [vmem:[%s3831_s1 + $0x230] ss:$8 sps:$4 sm:$0xff] (!%p138_p2)  }
   0xa   : > { %v2574_v13 = vld [vmem:[%s3831_s1 + $0x334] ss:$8 sps:$4 sm:$0xff] (!%p138_p2)   ;;  %v2577_v15 = vld [vmem:[%s3831_s1 + $0x330] ss:$8 sps:$4 sm:$0xff] (!%p138_p2)   ;;  %v2578_v16 = vld [vmem:[%s3831_s1 + $0x244] ss:$8 sps:$4 sm:$0xff] (!%p138_p2)  }
   0xb   : > { %668 = vmatpush1.bf16.msra.mxu0 (!%p138_p2), %v2564_v6  ;;  %v2580_v17 = vld [vmem:[%s3831_s1 + $0x344] ss:$8 sps:$4 sm:$0xff] (!%p138_p2)   ;;  %v2582_v18 = vld [vmem:[%s3831_s1 + $0x240] ss:$8 sps:$4 sm:$0xff] (!%p138_p2)   ;;  %v2584_v20 = vld [vmem:[%s3831_s1 + $0x254] ss:$8 sps:$4 sm:$0xff] (!%p138_p2)  }
   0xc   : > { %709 = vmatpush1.bf16.msra.mxu1 (!%p138_p2), %v2565_v7  ;;  %669 = vmatprep.subr.bf16.mxu0 (!%p138_p2), %v2566_v8  ;;  %v2583_v19 = vld [vmem:[%s3831_s1 + $0x340] ss:$8 sps:$4 sm:$0xff] (!%p138_p2)   ;;  %v2586_v21 = vld [vmem:[%s3831_s1 + $0x354] ss:$8 sps:$4 sm:$0xff] (!%p138_p2)   ;;  %v2588_v22 = vld [vmem:[%s3831_s1 + $0x250] ss:$8 sps:$4 sm:$0xff] (!%p138_p2)  }
   0xd   : > { %710 = vmatprep.subr.bf16.mxu1 %v2568_v9  ;;  %v2589_v23 = vld [vmem:[%s3831_s1 + $0x350] ss:$8 sps:$4 sm:$0xff]   ;;  %v2590_v24 = vld [vmem:[%s3831_s1 + $0x264] ss:$8 sps:$4 sm:$0xff]   ;;  %v2594_v26 = vld [vmem:[%s3831_s1 + $0x260] ss:$8 sps:$4 sm:$0xff]  }
   0xe   : > { %v2592_v25 = vld [vmem:[%s3831_s1 + $0x364] ss:$8 sps:$4 sm:$0xff]   ;;  %v2595_v27 = vld [vmem:[%s3831_s1 + $0x360] ss:$8 sps:$4 sm:$0xff]   ;;  %v2596_v28 = vld [vmem:[%s3831_s1 + $0x274] ss:$8 sps:$4 sm:$0xff]  }
   0xf   : > { %670 = vmatpush1.bf16.msra.mxu0 %v2570_v10  ;;  %v2598_v29 = vld [vmem:[%s3831_s1 + $0x374] ss:$8 sps:$4 sm:$0xff]   ;;  %v2600_v30 = vld [vmem:[%s3831_s1 + $0x270] ss:$8 sps:$4 sm:$0xff]   ;;  %v2602_v32 = vld [vmem:[%s3831_s1 + $0x284] ss:$8 sps:$4 sm:$0xff]  }
  0x10   : > { %711 = vmatpush1.bf16.msra.mxu1 %v2571_v11  ;;  %671 = vmatprep.subr.bf16.mxu0 %v2572_v12  ;;  %v2601_v31 = vld [vmem:[%s3831_s1 + $0x370] ss:$8 sps:$4 sm:$0xff]   ;;  %v2604_v33 = vld [vmem:[%s3831_s1 + $0x384] ss:$8 sps:$4 sm:$0xff]   ;;  %v2606_v34 = vld [vmem:[%s3831_s1 + $0x280] ss:$8 sps:$4 sm:$0xff]  }
  0x11   : > { %712 = vmatprep.subr.bf16.mxu1 %v2574_v13  ;;  %v2607_v35 = vld [vmem:[%s3831_s1 + $0x380] ss:$8 sps:$4 sm:$0xff]   ;;  %v2608_v36 = vld [vmem:[%s3831_s1 + $0x294] ss:$8 sps:$4 sm:$0xff]   ;;  %s3835_s13 = smov (!%p161_p3, %s2259_s13), 1 }
  0x12   : > { %v2610_v37 = vld [vmem:[%s3831_s1 + $0x394] ss:$8 sps:$4 sm:$0xff]   ;;  %v2612_v38 = vld [vmem:[%s3831_s1 + $0x290] ss:$8 sps:$4 sm:$0xff]   ;;  %v2614_v40 = vld [vmem:[%s3831_s1 + $0x2a4] ss:$8 sps:$4 sm:$0xff]  }
  0x13   : > { %672 = vmatpush1.bf16.msra.mxu0 %v2576_v14  ;;  %v2613_v39 = vld [vmem:[%s3831_s1 + $0x390] ss:$8 sps:$4 sm:$0xff]   ;;  %s2543_s21 = sshll.u32 %s3835_s13, 5  ;;  %v2616_v41 = vld [vmem:[%s3831_s1 + $0x3a4] ss:$8 sps:$4 sm:$0xff]   ;;  %s2544_s18 = sshll.u32 %s3835_s13, 3 }
  0x14   : > { %713 = vmatpush1.bf16.msra.mxu1 %v2577_v15  ;;  %673 = vmatprep.subr.bf16.mxu0 %v2578_v16  ;;  %v2618_v42 = vld [vmem:[%s3831_s1 + $0x2a0] ss:$8 sps:$4 sm:$0xff]   ;;  %s3132_s30 = scalar_lea.vmem %s3830_s0, %s2543_s21  ;;  %v2620_v44 = vld [vmem:[%s3831_s1 + $0x2b4] ss:$8 sps:$4 sm:$0xff]   ;;  %v2624_v46 = vld [vmem:[%s3831_s1 + $0x2b0] ss:$8 sps:$4 sm:$0xff]   ;;  %s170_s21 = scalar_lea.vmem %s3833_s3, %s2544_s18 }
  0x15   : > { %714 = vmatprep.subr.bf16.mxu1 %v2580_v17  ;;  %v2619_v43 = vld [vmem:[%s3831_s1 + $0x3a0] ss:$8 sps:$4 sm:$0xff]   ;;  %v2622_v45 = vld [vmem:[%s3831_s1 + $0x3b4] ss:$8 sps:$4 sm:$0xff]   ;;  %v2625_v50 = vld [vmem:[%s3831_s1 + $0x3b0] ss:$8 sps:$4 sm:$0xff]  }
  0x16   : > { %v237_v47 = vld [vmem:[%s3132_s30] sm:$0xff]  ;;  %v238_v49 = vld [vmem:[%s3132_s30 + $0x8] sm:$0xff]  ;;  %v2632_v62 = vld [vmem:[%s3831_s1 + $0x2d4] ss:$8 sps:$4 sm:$0xff]  }
  0x17   : > { %674 = vmatpush1.bf16.msra.mxu0 %v2582_v18  ;;  %v2269_v48 = vcombine.high %v237_v47, %v237_v47  ;;  %v2626_v51 = vld [vmem:[%s3831_s1 + $0x2c4] ss:$8 sps:$4 sm:$0xff]   ;;  %v2271_v52 = vcombine.high %v238_v49, %v238_v49  ;;  %v2630_v59 = vld [vmem:[%s3831_s1 + $0x2c0] ss:$8 sps:$4 sm:$0xff]   ;;  %v2634_v63 = vld [vmem:[%s3831_s1 + $0x3d4] ss:$8 sps:$4 sm:$0xff]   ;;  %v2268_v2 = vcombine.low %v237_v47, %v237_v47  ;;  %v2270_v3 = vcombine.low %v238_v49, %v238_v49 }
  0x18   : > { %715 = vmatpush1.bf16.msra.mxu1 %v2583_v19  ;;  %675 = vmatprep.subr.bf16.mxu0 %v2584_v20  ;;  %v2628_v53 = vld [vmem:[%s3831_s1 + $0x3c4] ss:$8 sps:$4 sm:$0xff]   ;;  %v2631_v60 = vld [vmem:[%s3831_s1 + $0x3c0] ss:$8 sps:$4 sm:$0xff]   ;;  %v2636_v4 = vld [vmem:[%s3831_s1 + $0x2d0] ss:$8 sps:$4 sm:$0xff]  }
  0x19   : > { %716 = vmatprep.subr.bf16.mxu1 %v2586_v21  ;;  %v321_v54 = vshrl.u32 %v2269_v48, 16  ;;  %v323_v55 = vshll.u32 %v2269_v48, 16  ;;  %v335_v56 = vshrl.u32 %v2271_v52, 16  ;;  %v337_v57 = vshll.u32 %v2271_v52, 16  ;;  %v2637_v5 = vld [vmem:[%s3831_s1 + $0x3d0] ss:$8 sps:$4 sm:$0xff]  }
  0x1a   : > { %v2638_v6 = vld [vmem:[%s3831_s1 + $0x2e4] ss:$8 sps:$4 sm:$0xff]   ;;  %v316_v8 = vshll.u32 %v2268_v2, 16  ;;  %v330_v9 = vshll.u32 %v2270_v3, 16  ;;  %v2642_v10 = vld [vmem:[%s3831_s1 + $0x2e0] ss:$8 sps:$4 sm:$0xff]  }
  0x1b   : > { %676 = vmatpush1.bf16.msra.mxu0 %v2588_v22  ;;  %v325_v58 = vrot.slane %v323_v55, 1  ;;  %v339_v61 = vrot.slane %v337_v57, 1  ;;  %v2640_v7 = vld [vmem:[%s3831_s1 + $0x3e4] ss:$8 sps:$4 sm:$0xff]   ;;  %v2643_v11 = vld [vmem:[%s3831_s1 + $0x3e0] ss:$8 sps:$4 sm:$0xff]  }
  0x1c   : > { %717 = vmatpush1.bf16.msra.mxu1 %v2589_v23  ;;  %677 = vmatprep.subr.bf16.mxu0 %v2590_v24  ;;  %v2644_v12 = vld [vmem:[%s3831_s1 + $0x2f4] ss:$8 sps:$4 sm:$0xff]   ;;  %v314_v14 = vshrl.u32 %v2268_v2, 16  ;;  %v318_v15 = vrot.slane %v316_v8, 1  ;;  %v328_v16 = vshrl.u32 %v2270_v3, 16  ;;  %v332_v17 = vrot.slane %v330_v9, 1 }
  0x1d   : > { %718 = vmatprep.subr.bf16.mxu1 %v2592_v25  ;;  %v326_v0 = vor.u32 %v325_v58, %v321_v54  ;;  %v340_v1 = vor.u32 %v339_v61, %v335_v56  ;;  %v2646_v13 = vld [vmem:[%s3831_s1 + $0x3f4] ss:$8 sps:$4 sm:$0xff]   ;;  %v2648_v18 = vld [vmem:[%s3831_s1 + $0x2f0] ss:$8 sps:$4 sm:$0xff]   ;;  %v2656_v20 = vld [vmem:[%s3831_s1 + $0x4] ss:$8 sps:$4 sm:$0xff]  }
  0x1e   : > { %v2649_v19 = vld [vmem:[%s3831_s1 + $0x3f0] ss:$8 sps:$4 sm:$0xff]   ;;  %v2659_v21 = vld [vmem:[%s3831_s1 + $0x104] ss:$8 sps:$4 sm:$0xff]   ;;  %v319_v22 = vor.u32 %v318_v15, %v314_v14  ;;  %v333_v23 = vor.u32 %v332_v17, %v328_v16  ;;  %v2654_v24 = vld [vmem:[%s3831_s1] ss:$8 sps:$4 sm:$0xff]  }
  0x1f   : > { %678 = vmatpush1.bf16.msra.mxu0 %v2594_v26  ;;  %697 = vmatprep.mubr.bf16.mxu0 %v326_v0  ;;  %v2657_v25 = vld [vmem:[%s3831_s1 + $0x100] ss:$8 sps:$4 sm:$0xff]   ;;  %v2662_v26 = vld [vmem:[%s3831_s1 + $0x14] ss:$8 sps:$4 sm:$0xff]   ;;  %v2695_v47 = vld [vmem:[%s3831_s1 + $0x164] ss:$8 sps:$4 sm:$0xff]  }
  0x20   : > { %719 = vmatpush1.bf16.msra.mxu1 %v2595_v27  ;;  %679 = vmatprep.subr.bf16.mxu0 %v2596_v28  ;;  %v2665_v27 = vld [vmem:[%s3831_s1 + $0x114] ss:$8 sps:$4 sm:$0xff]   ;;  %v2660_v28 = vld [vmem:[%s3831_s1 + $0x10] ss:$8 sps:$4 sm:$0xff]   ;;  %v2690_v48 = vld [vmem:[%s3831_s1 + $0x60] ss:$8 sps:$4 sm:$0xff]  }
  0x21   : > { %720 = vmatprep.subr.bf16.mxu1 %v2598_v29  ;;  %738 = vmatprep.mubr.bf16.mxu1 %v340_v1  ;;  %v2663_v29 = vld [vmem:[%s3831_s1 + $0x110] ss:$8 sps:$4 sm:$0xff]   ;;  %v2693_v49 = vld [vmem:[%s3831_s1 + $0x160] ss:$8 sps:$4 sm:$0xff]   ;;  %v2698_v52 = vld [vmem:[%s3831_s1 + $0x74] ss:$8 sps:$4 sm:$0xff]  }
  0x22   : > { %v2701_v54 = vld [vmem:[%s3831_s1 + $0x174] ss:$8 sps:$4 sm:$0xff]   ;;  %v2696_v56 = vld [vmem:[%s3831_s1 + $0x70] ss:$8 sps:$4 sm:$0xff]   ;;  %v2704_v58 = vld [vmem:[%s3831_s1 + $0x84] ss:$8 sps:$4 sm:$0xff]  }
  0x23   : > { %680 = vmatpush1.bf16.msra.mxu0 %v2600_v30  ;;  %v2668_v30 = vld [vmem:[%s3831_s1 + $0x24] ss:$8 sps:$4 sm:$0xff]   ;;  %v2699_v57 = vld [vmem:[%s3831_s1 + $0x170] ss:$8 sps:$4 sm:$0xff]   ;;  %v2705_v61 = vld [vmem:[%s3831_s1 + $0x180] ss:$8 sps:$4 sm:$0xff]  }
  0x24   : > { %721 = vmatpush1.bf16.msra.mxu1 %v2601_v31  ;;  %681 = vmatprep.subr.bf16.mxu0 %v2602_v32  ;;  %v2671_v31 = vld [vmem:[%s3831_s1 + $0x124] ss:$8 sps:$4 sm:$0xff]   ;;  %v2666_v32 = vld [vmem:[%s3831_s1 + $0x20] ss:$8 sps:$4 sm:$0xff]   ;;  %v2708_v0 = vld [vmem:[%s3831_s1 + $0x90] ss:$8 sps:$4 sm:$0xff]  }
  0x25   : > { %722 = vmatprep.subr.bf16.mxu1 %v2604_v33  ;;  %v2669_v33 = vld [vmem:[%s3831_s1 + $0x120] ss:$8 sps:$4 sm:$0xff]   ;;  %v2711_v1 = vld [vmem:[%s3831_s1 + $0x190] ss:$8 sps:$4 sm:$0xff]   ;;  %v2716_v2 = vld [vmem:[%s3831_s1 + $0xa4] ss:$8 sps:$4 sm:$0xff]  }
  0x26   : > { %v2719_v3 = vld [vmem:[%s3831_s1 + $0x1a4] ss:$8 sps:$4 sm:$0xff]   ;;  %v2720_v8 = vld [vmem:[%s3831_s1 + $0xb0] ss:$8 sps:$4 sm:$0xff]   ;;  %v2734_v14 = vld [vmem:[%s3831_s1 + $0xd4] ss:$8 sps:$4 sm:$0xff]  }
  0x27   : > { %682 = vmatpush1.bf16.msra.mxu0 %v2606_v34  ;;  %v2674_v34 = vld [vmem:[%s3831_s1 + $0x34] ss:$8 sps:$4 sm:$0xff]   ;;  %v2723_v9 = vld [vmem:[%s3831_s1 + $0x1b0] ss:$8 sps:$4 sm:$0xff]  }
  0x28   : > { %723 = vmatpush1.bf16.msra.mxu1 %v2607_v35  ;;  %683 = vmatprep.subr.bf16.mxu0 %v2608_v36  ;;  %v2677_v35 = vld [vmem:[%s3831_s1 + $0x134] ss:$8 sps:$4 sm:$0xff]   ;;  %v2672_v36 = vld [vmem:[%s3831_s1 + $0x30] ss:$8 sps:$4 sm:$0xff]  }
  0x29   : > { %724 = vmatprep.subr.bf16.mxu1 %v2610_v37  ;;  %v2675_v37 = vld [vmem:[%s3831_s1 + $0x130] ss:$8 sps:$4 sm:$0xff]   ;;  %v2737_v15 = vld [vmem:[%s3831_s1 + $0x1d4] ss:$8 sps:$4 sm:$0xff]  }
  0x2a   : > { %v2732_v16 = vld [vmem:[%s3831_s1 + $0xd0] ss:$8 sps:$4 sm:$0xff]  }
  0x2b   : > { %684 = vmatpush1.bf16.msra.mxu0 %v2612_v38  ;;  %v2680_v38 = vld [vmem:[%s3831_s1 + $0x44] ss:$8 sps:$4 sm:$0xff]   ;;  %v2735_v17 = vld [vmem:[%s3831_s1 + $0x1d0] ss:$8 sps:$4 sm:$0xff]  }
  0x2c   : > { %725 = vmatpush1.bf16.msra.mxu1 %v2613_v39  ;;  %685 = vmatprep.subr.bf16.mxu0 %v2614_v40  ;;  %v2683_v39 = vld [vmem:[%s3831_s1 + $0x144] ss:$8 sps:$4 sm:$0xff]   ;;  %v2678_v40 = vld [vmem:[%s3831_s1 + $0x40] ss:$8 sps:$4 sm:$0xff]  }
  0x2d   : > { %726 = vmatprep.subr.bf16.mxu1 %v2616_v41  ;;  %v2681_v41 = vld [vmem:[%s3831_s1 + $0x140] ss:$8 sps:$4 sm:$0xff]  }
  0x2f   : > { %686 = vmatpush1.bf16.msra.mxu0 %v2618_v42  ;;  %v2686_v42 = vld [vmem:[%s3831_s1 + $0x54] ss:$8 sps:$4 sm:$0xff]  }
  0x30   : > { %727 = vmatpush1.bf16.msra.mxu1 %v2619_v43  ;;  %687 = vmatprep.subr.bf16.mxu0 %v2620_v44  ;;  %v2689_v43 = vld [vmem:[%s3831_s1 + $0x154] ss:$8 sps:$4 sm:$0xff]   ;;  %v2684_v44 = vld [vmem:[%s3831_s1 + $0x50] ss:$8 sps:$4 sm:$0xff]  }
  0x31   : > { %728 = vmatprep.subr.bf16.mxu1 %v2622_v45  ;;  %v2687_v45 = vld [vmem:[%s3831_s1 + $0x150] ss:$8 sps:$4 sm:$0xff]  }
  0x33   : > { %688 = vmatpush1.bf16.msra.mxu0 %v2624_v46  ;;  %v2692_v46 = vld [vmem:[%s3831_s1 + $0x64] ss:$8 sps:$4 sm:$0xff]  }
  0x34   : > { %729 = vmatpush1.bf16.msra.mxu1 %v2625_v50  ;;  %689 = vmatprep.subr.bf16.mxu0 %v2626_v51  ;;  %v3281_v50 = vld [vmem:[%s3132_s30] sm:$0x77]  ;;  %v3284_v51 = vld [vmem:[%s3132_s30 + $0x8] sm:$0x77] }
  0x35   : > { %730 = vmatprep.subr.bf16.mxu1 %v2628_v53  ;;  %v2337_v53 = vcombine.high %v3281_v50, %v3281_v50  ;;  %v2339_v55 = vcombine.high %v3284_v51, %v3284_v51 }
  0x37   : > { %690 = vmatpush1.bf16.msra.mxu0 %v2630_v59  ;;  %v2707_v59 = vld [vmem:[%s3831_s1 + $0x184] ss:$8 sps:$4 sm:$0xff]  }
  0x38   : > { %731 = vmatpush1.bf16.msra.mxu1 %v2631_v60  ;;  %691 = vmatprep.subr.bf16.mxu0 %v2632_v62  ;;  %v2702_v60 = vld [vmem:[%s3831_s1 + $0x80] ss:$8 sps:$4 sm:$0xff]   ;;  %v2710_v62 = vld [vmem:[%s3831_s1 + $0x94] ss:$8 sps:$4 sm:$0xff]  }
  0x39   : > { %732 = vmatprep.subr.bf16.mxu1 %v2634_v63  ;;  %v2713_v63 = vld [vmem:[%s3831_s1 + $0x194] ss:$8 sps:$4 sm:$0xff]  }
  0x3b   : > { %692 = vmatpush1.bf16.msra.mxu0 %v2636_v4  ;;  %v2714_v4 = vld [vmem:[%s3831_s1 + $0xa0] ss:$8 sps:$4 sm:$0xff]  }
  0x3c   : > { %733 = vmatpush1.bf16.msra.mxu1 %v2637_v5  ;;  %693 = vmatprep.subr.bf16.mxu0 %v2638_v6  ;;  %v2717_v5 = vld [vmem:[%s3831_s1 + $0x1a0] ss:$8 sps:$4 sm:$0xff]   ;;  %v2722_v6 = vld [vmem:[%s3831_s1 + $0xb4] ss:$8 sps:$4 sm:$0xff]  }
  0x3d   : > { %734 = vmatprep.subr.bf16.mxu1 %v2640_v7  ;;  %v2725_v7 = vld [vmem:[%s3831_s1 + $0x1b4] ss:$8 sps:$4 sm:$0xff]  }
  0x3f   : > { %694 = vmatpush1.bf16.msra.mxu0 %v2642_v10  ;;  %v2728_v10 = vld [vmem:[%s3831_s1 + $0xc4] ss:$8 sps:$4 sm:$0xff]  }
  0x40   : > { %735 = vmatpush1.bf16.msra.mxu1 %v2643_v11  ;;  %695 = vmatprep.subr.bf16.mxu0 %v2644_v12  ;;  %v2731_v11 = vld [vmem:[%s3831_s1 + $0x1c4] ss:$8 sps:$4 sm:$0xff]   ;;  %v2726_v12 = vld [vmem:[%s3831_s1 + $0xc0] ss:$8 sps:$4 sm:$0xff]  }
  0x41   : > { %736 = vmatprep.subr.bf16.mxu1 %v2646_v13  ;;  %v2729_v13 = vld [vmem:[%s3831_s1 + $0x1c0] ss:$8 sps:$4 sm:$0xff]  }
  0x43   : > { %696 = vmatpush1.bf16.msra.mxu0 %v2648_v18  ;;  %v2740_v18 = vld [vmem:[%s3831_s1 + $0xe4] ss:$8 sps:$4 sm:$0xff]  }
  0x44   : > { %737 = vmatpush1.bf16.msra.mxu1 %v2649_v19  ;;  %1081 = vmatprep.subr.bf16.mxu0 %v2656_v20  ;;  %v2743_v19 = vld [vmem:[%s3831_s1 + $0x1e4] ss:$8 sps:$4 sm:$0xff]   ;;  %v2738_v20 = vld [vmem:[%s3831_s1 + $0xe0] ss:$8 sps:$4 sm:$0xff]  }
  0x45   : > { %1122 = vmatprep.subr.bf16.mxu1 %v2659_v21  ;;  %v2741_v21 = vld [vmem:[%s3831_s1 + $0x1e0] ss:$8 sps:$4 sm:$0xff]  }
  0x46   : > { %698 = vmatmul.mubr.bf16.vlgmr.msra.gmra.mrb[0].mxu0 %v319_v22  ;;  %v2746_v22 = vld [vmem:[%s3831_s1 + $0xf4] ss:$8 sps:$4 sm:$0xff]  }
  0x47   : > { %739 = vmatmul.mubr.bf16.vlgmr.msra.gmra.mrb[0].mxu1 %v333_v23  ;;  %1082 = vmatpush1.bf16.msra.mxu0 %v2654_v24  ;;  %v2749_v23 = vld [vmem:[%s3831_s1 + $0x1f4] ss:$8 sps:$4 sm:$0xff]   ;;  %v2744_v24 = vld [vmem:[%s3831_s1 + $0xf0] ss:$8 sps:$4 sm:$0xff]  }
  0x48   : > { %1123 = vmatpush1.bf16.msra.mxu1 %v2657_v25  ;;  %1083 = vmatprep.subr.bf16.mxu0 %v2662_v26  ;;  %v2747_v25 = vld [vmem:[%s3831_s1 + $0x1f0] ss:$8 sps:$4 sm:$0xff]   ;;  %v2756_v26 = vld [vmem:[%s3831_s1 + $0x404] ss:$8 sps:$4 sm:$0xff]  }
  0x49   : > { %1124 = vmatprep.subr.bf16.mxu1 %v2665_v27  ;;  %1113 = vmatprep.mubr.bf16.mxu0 %v2337_v53  ;;  %v2759_v27 = vld [vmem:[%s3831_s1 + $0x504] ss:$8 sps:$4 sm:$0xff]   ;;  %v2777_v53 = vld [vmem:[%s3831_s1 + $0x534] ss:$8 sps:$4 sm:$0xff]  }
  0x4a   : > { %1154 = vmatprep.mubr.bf16.mxu1 %v2339_v55 }
  0x4b   : > { %1084 = vmatpush1.bf16.msra.mxu0 %v2660_v28  ;;  %v2336_v28 = vcombine.low %v3281_v50, %v3281_v50 }
  0x4c   : > { %1125 = vmatpush1.bf16.msra.mxu1 %v2663_v29  ;;  %1085 = vmatprep.subr.bf16.mxu0 %v2668_v30  ;;  %v2338_v29 = vcombine.low %v3284_v51, %v3284_v51  ;;  %v2754_v30 = vld [vmem:[%s3831_s1 + $0x400] ss:$8 sps:$4 sm:$0xff]  }
  0x4d   : > { %1126 = vmatprep.subr.bf16.mxu1 %v2671_v31  ;;  %v2757_v31 = vld [vmem:[%s3831_s1 + $0x500] ss:$8 sps:$4 sm:$0xff]  }
  0x4f   : > { %1086 = vmatpush1.bf16.msra.mxu0 %v2666_v32  ;;  %v2762_v32 = vld [vmem:[%s3831_s1 + $0x414] ss:$8 sps:$4 sm:$0xff]  }
  0x50   : > { %1127 = vmatpush1.bf16.msra.mxu1 %v2669_v33  ;;  %1087 = vmatprep.subr.bf16.mxu0 %v2674_v34  ;;  %v2765_v33 = vld [vmem:[%s3831_s1 + $0x514] ss:$8 sps:$4 sm:$0xff]   ;;  %v2760_v34 = vld [vmem:[%s3831_s1 + $0x410] ss:$8 sps:$4 sm:$0xff]  }
  0x51   : > { %1128 = vmatprep.subr.bf16.mxu1 %v2677_v35  ;;  %v2763_v35 = vld [vmem:[%s3831_s1 + $0x510] ss:$8 sps:$4 sm:$0xff]  }
  0x53   : > { %1088 = vmatpush1.bf16.msra.mxu0 %v2672_v36  ;;  %v3427_v36 = vld [vmem:[%s3132_s30] sm:$0xee] }
  0x54   : > { %1129 = vmatpush1.bf16.msra.mxu1 %v2675_v37  ;;  %1089 = vmatprep.subr.bf16.mxu0 %v2680_v38  ;;  %v3430_v37 = vld [vmem:[%s3132_s30 + $0x10] sm:$0x11]  ;;  %v3433_v38 = vld [vmem:[%s3132_s30 + $0x8] sm:$0xee] }
  0x55   : > { %1130 = vmatprep.subr.bf16.mxu1 %v2683_v39  ;;  %v3436_v39 = vld [vmem:[%s3132_s30 + $0x18] sm:$0x11] }
  0x57   : > { %1090 = vmatpush1.bf16.msra.mxu0 %v2678_v40  ;;  %v2768_v40 = vld [vmem:[%s3831_s1 + $0x424] ss:$8 sps:$4 sm:$0xff]  }
  0x58   : > { %1131 = vmatpush1.bf16.msra.mxu1 %v2681_v41  ;;  %1091 = vmatprep.subr.bf16.mxu0 %v2686_v42  ;;  %v2405_v41 = vcombine.high %v3427_v36, %v3430_v37  ;;  %v2771_v42 = vld [vmem:[%s3831_s1 + $0x524] ss:$8 sps:$4 sm:$0xff]  }
  0x59   : > { %1132 = vmatprep.subr.bf16.mxu1 %v2689_v43  ;;  %v2407_v43 = vcombine.high %v3433_v38, %v3436_v39 }
  0x5b   : > { %1092 = vmatpush1.bf16.msra.mxu0 %v2684_v44  ;;  %v1256_v44 = vshrl.u32 %v2405_v41, 16 }
  0x5c   : > { %1133 = vmatpush1.bf16.msra.mxu1 %v2687_v45  ;;  %1093 = vmatprep.subr.bf16.mxu0 %v2692_v46  ;;  %v1259_v45 = vshll.u32 %v2405_v41, 16  ;;  %v2766_v46 = vld [vmem:[%s3831_s1 + $0x420] ss:$8 sps:$4 sm:$0xff]   ;;  %v2835_v41 = vld [vmem:[%s3831_s1 + $0x5d0] ss:$8 sps:$4 sm:$0xff]  }
  0x5d   : > { %1134 = vmatprep.subr.bf16.mxu1 %v2695_v47  ;;  %v1272_v47 = vshrl.u32 %v2407_v43, 16  ;;  %v1258_v50 = vrot.slane %v1256_v44, 1 }
  0x5e   : > { %v1261_v51 = vrot.slane %v1259_v45, 2 }
  0x5f   : > { %1094 = vmatpush1.bf16.msra.mxu0 %v2690_v48  ;;  %v1275_v48 = vshll.u32 %v2407_v43, 16 }
  0x60   : > { %1135 = vmatpush1.bf16.msra.mxu1 %v2693_v49  ;;  %1095 = vmatprep.subr.bf16.mxu0 %v2698_v52  ;;  %v2769_v49 = vld [vmem:[%s3831_s1 + $0x520] ss:$8 sps:$4 sm:$0xff]   ;;  %v2774_v52 = vld [vmem:[%s3831_s1 + $0x434] ss:$8 sps:$4 sm:$0xff]  }
  0x61   : > { %1136 = vmatprep.subr.bf16.mxu1 %v2701_v54  ;;  %v1274_v54 = vrot.slane %v1272_v47, 1  ;;  %v1277_v55 = vrot.slane %v1275_v48, 2  ;;  %v2841_v47 = vld [vmem:[%s3831_s1 + $0x5e0] ss:$8 sps:$4 sm:$0xff]   ;;  %v2846_v48 = vld [vmem:[%s3831_s1 + $0x4f4] ss:$8 sps:$4 sm:$0xff]  }
  0x63   : > { %1096 = vmatpush1.bf16.msra.mxu0 %v2696_v56  ;;  %v1262_v56 = vor.u32 %v1261_v51, %v1258_v50 }
  0x64   : > { %1137 = vmatpush1.bf16.msra.mxu1 %v2699_v57  ;;  %1097 = vmatprep.subr.bf16.mxu0 %v2704_v58  ;;  %v2772_v57 = vld [vmem:[%s3831_s1 + $0x430] ss:$8 sps:$4 sm:$0xff]   ;;  %v1278_v58 = vor.u32 %v1277_v55, %v1274_v54  ;;  %v3609_v54 = vld [vmem:[%s3132_s30] sm:$0xcc]  ;;  %v3612_v55 = vld [vmem:[%s3132_s30 + $0x8] sm:$0xcc] }
  0x65   : > { %1138 = vmatprep.subr.bf16.mxu1 %v2707_v59  ;;  %v2775_v59 = vld [vmem:[%s3831_s1 + $0x530] ss:$8 sps:$4 sm:$0xff]  }
  0x67   : > { %1098 = vmatpush1.bf16.msra.mxu0 %v2702_v60  ;;  %v2780_v60 = vld [vmem:[%s3831_s1 + $0x444] ss:$8 sps:$4 sm:$0xff]  }
  0x68   : > { %1139 = vmatpush1.bf16.msra.mxu1 %v2705_v61  ;;  %1099 = vmatprep.subr.bf16.mxu0 %v2710_v62  ;;  %v2783_v61 = vld [vmem:[%s3831_s1 + $0x544] ss:$8 sps:$4 sm:$0xff]   ;;  %v2778_v62 = vld [vmem:[%s3831_s1 + $0x440] ss:$8 sps:$4 sm:$0xff]  }
  0x69   : > { %1140 = vmatprep.subr.bf16.mxu1 %v2713_v63  ;;  %v2781_v63 = vld [vmem:[%s3831_s1 + $0x540] ss:$8 sps:$4 sm:$0xff]  }
  0x6b   : > { %1100 = vmatpush1.bf16.msra.mxu0 %v2708_v0  ;;  %v2786_v0 = vld [vmem:[%s3831_s1 + $0x454] ss:$8 sps:$4 sm:$0xff]  }
  0x6c   : > { %1141 = vmatpush1.bf16.msra.mxu1 %v2711_v1  ;;  %1101 = vmatprep.subr.bf16.mxu0 %v2716_v2  ;;  %v2789_v1 = vld [vmem:[%s3831_s1 + $0x554] ss:$8 sps:$4 sm:$0xff]   ;;  %v2784_v2 = vld [vmem:[%s3831_s1 + $0x450] ss:$8 sps:$4 sm:$0xff]  }
  0x6d   : > { %1142 = vmatprep.subr.bf16.mxu1 %v2719_v3  ;;  %v2787_v3 = vld [vmem:[%s3831_s1 + $0x550] ss:$8 sps:$4 sm:$0xff]  }
  0x6f   : > { %1102 = vmatpush1.bf16.msra.mxu0 %v2714_v4  ;;  %v2792_v4 = vld [vmem:[%s3831_s1 + $0x464] ss:$8 sps:$4 sm:$0xff]  }
  0x70   : > { %1143 = vmatpush1.bf16.msra.mxu1 %v2717_v5  ;;  %1103 = vmatprep.subr.bf16.mxu0 %v2722_v6  ;;  %v2795_v5 = vld [vmem:[%s3831_s1 + $0x564] ss:$8 sps:$4 sm:$0xff]   ;;  %v2790_v6 = vld [vmem:[%s3831_s1 + $0x460] ss:$8 sps:$4 sm:$0xff]  }
  0x71   : > { %1144 = vmatprep.subr.bf16.mxu1 %v2725_v7  ;;  %v2793_v7 = vld [vmem:[%s3831_s1 + $0x560] ss:$8 sps:$4 sm:$0xff]  }
  0x73   : > { %1104 = vmatpush1.bf16.msra.mxu0 %v2720_v8  ;;  %v2798_v8 = vld [vmem:[%s3831_s1 + $0x474] ss:$8 sps:$4 sm:$0xff]  }
  0x74   : > { %1145 = vmatpush1.bf16.msra.mxu1 %v2723_v9  ;;  %1105 = vmatprep.subr.bf16.mxu0 %v2728_v10  ;;  %v2801_v9 = vld [vmem:[%s3831_s1 + $0x574] ss:$8 sps:$4 sm:$0xff]   ;;  %v2796_v10 = vld [vmem:[%s3831_s1 + $0x470] ss:$8 sps:$4 sm:$0xff]  }
  0x75   : > { %1146 = vmatprep.subr.bf16.mxu1 %v2731_v11  ;;  %v2799_v11 = vld [vmem:[%s3831_s1 + $0x570] ss:$8 sps:$4 sm:$0xff]  }
  0x77   : > { %1106 = vmatpush1.bf16.msra.mxu0 %v2726_v12  ;;  %v2804_v12 = vld [vmem:[%s3831_s1 + $0x484] ss:$8 sps:$4 sm:$0xff]  }
  0x78   : > { %1147 = vmatpush1.bf16.msra.mxu1 %v2729_v13  ;;  %1107 = vmatprep.subr.bf16.mxu0 %v2734_v14  ;;  %v2807_v13 = vld [vmem:[%s3831_s1 + $0x584] ss:$8 sps:$4 sm:$0xff]   ;;  %v2802_v14 = vld [vmem:[%s3831_s1 + $0x480] ss:$8 sps:$4 sm:$0xff]  }
  0x79   : > { %1148 = vmatprep.subr.bf16.mxu1 %v2737_v15  ;;  %v2805_v15 = vld [vmem:[%s3831_s1 + $0x580] ss:$8 sps:$4 sm:$0xff]  }
  0x7b   : > { %1108 = vmatpush1.bf16.msra.mxu0 %v2732_v16  ;;  %v2810_v16 = vld [vmem:[%s3831_s1 + $0x494] ss:$8 sps:$4 sm:$0xff]  }
  0x7c   : > { %1149 = vmatpush1.bf16.msra.mxu1 %v2735_v17  ;;  %1109 = vmatprep.subr.bf16.mxu0 %v2740_v18  ;;  %v2813_v17 = vld [vmem:[%s3831_s1 + $0x594] ss:$8 sps:$4 sm:$0xff]   ;;  %v2808_v18 = vld [vmem:[%s3831_s1 + $0x490] ss:$8 sps:$4 sm:$0xff]  }
  0x7d   : > { %1150 = vmatprep.subr.bf16.mxu1 %v2743_v19  ;;  %v2811_v19 = vld [vmem:[%s3831_s1 + $0x590] ss:$8 sps:$4 sm:$0xff]  }
  0x7f   : > { %1110 = vmatpush1.bf16.msra.mxu0 %v2738_v20  ;;  %v2816_v20 = vld [vmem:[%s3831_s1 + $0x4a4] ss:$8 sps:$4 sm:$0xff]  }
  0x80   : > { %1151 = vmatpush1.bf16.msra.mxu1 %v2741_v21  ;;  %1111 = vmatprep.subr.bf16.mxu0 %v2746_v22  ;;  %v2819_v21 = vld [vmem:[%s3831_s1 + $0x5a4] ss:$8 sps:$4 sm:$0xff]   ;;  %v2814_v22 = vld [vmem:[%s3831_s1 + $0x4a0] ss:$8 sps:$4 sm:$0xff]  }
  0x81   : > { %1152 = vmatprep.subr.bf16.mxu1 %v2749_v23  ;;  %v2817_v23 = vld [vmem:[%s3831_s1 + $0x5a0] ss:$8 sps:$4 sm:$0xff]  }
  0x83   : > { %1112 = vmatpush1.bf16.msra.mxu0 %v2744_v24  ;;  %v2822_v24 = vld [vmem:[%s3831_s1 + $0x4b4] ss:$8 sps:$4 sm:$0xff]  }
  0x84   : > { %1153 = vmatpush1.bf16.msra.mxu1 %v2747_v25  ;;  %1603 = vmatprep.subr.bf16.mxu0 %v2756_v26  ;;  %v2825_v25 = vld [vmem:[%s3831_s1 + $0x5b4] ss:$8 sps:$4 sm:$0xff]   ;;  %v2820_v26 = vld [vmem:[%s3831_s1 + $0x4b0] ss:$8 sps:$4 sm:$0xff]  }
  0x85   : > { %1644 = vmatprep.subr.bf16.mxu1 %v2759_v27  ;;  %v2823_v27 = vld [vmem:[%s3831_s1 + $0x5b0] ss:$8 sps:$4 sm:$0xff]  }
  0x86   : > { %1114 = vmatmul.mubr.bf16.vlgmr.msra.gmra.mrb[4].mxu0 %v2336_v28  ;;  %v2828_v28 = vld [vmem:[%s3831_s1 + $0x4c4] ss:$8 sps:$4 sm:$0xff]  }
  0x87   : > { %1155 = vmatmul.mubr.bf16.vlgmr.msra.gmra.mrb[4].mxu1 %v2338_v29  ;;  %1604 = vmatpush1.bf16.msra.mxu0 %v2754_v30  ;;  %v2831_v29 = vld [vmem:[%s3831_s1 + $0x5c4] ss:$8 sps:$4 sm:$0xff]   ;;  %v2826_v30 = vld [vmem:[%s3831_s1 + $0x4c0] ss:$8 sps:$4 sm:$0xff]  }
  0x88   : > { %1645 = vmatpush1.bf16.msra.mxu1 %v2757_v31  ;;  %1605 = vmatprep.subr.bf16.mxu0 %v2762_v32  ;;  %v2829_v31 = vld [vmem:[%s3831_s1 + $0x5c0] ss:$8 sps:$4 sm:$0xff]   ;;  %v2834_v32 = vld [vmem:[%s3831_s1 + $0x4d4] ss:$8 sps:$4 sm:$0xff]  }
  0x89   : > { %1646 = vmatprep.subr.bf16.mxu1 %v2765_v33  ;;  %1635 = vmatprep.mubr.bf16.mxu0 %v1262_v56  ;;  %v2837_v33 = vld [vmem:[%s3831_s1 + $0x5d4] ss:$8 sps:$4 sm:$0xff]   ;;  %v2844_v56 = vld [vmem:[%s3831_s1 + $0x4f0] ss:$8 sps:$4 sm:$0xff]  }
  0x8a   : > { %1676 = vmatprep.mubr.bf16.mxu1 %v1278_v58  ;;  %v2856_v58 = vld [vmem:[%s3831_s1 + $0x604] ss:$8 sps:$4 sm:$0xff]  }
  0x8b   : > { %1606 = vmatpush1.bf16.msra.mxu0 %v2760_v34  ;;  %v2404_v34 = vcombine.low %v3427_v36, %v3430_v37  ;;  %v2843_v36 = vld [vmem:[%s3831_s1 + $0x5e4] ss:$8 sps:$4 sm:$0xff]  }
  0x8c   : > { %1647 = vmatpush1.bf16.msra.mxu1 %v2763_v35  ;;  %1607 = vmatprep.subr.bf16.mxu0 %v2768_v40  ;;  %v2406_v35 = vcombine.low %v3433_v38, %v3436_v39  ;;  %v2832_v40 = vld [vmem:[%s3831_s1 + $0x4d0] ss:$8 sps:$4 sm:$0xff]  }
  0x8d   : > { %1648 = vmatprep.subr.bf16.mxu1 %v2771_v42  ;;  %v2840_v42 = vld [vmem:[%s3831_s1 + $0x4e4] ss:$8 sps:$4 sm:$0xff]   ;;  %v1248_v38 = vshrl.u32 %v2404_v34, 16  ;;  %v1251_v43 = vshll.u32 %v2404_v34, 16  ;;  %v2902_v34 = vld [vmem:[%s3831_s1 + $0x680] ss:$8 sps:$4 sm:$0xff]  }
  0x8e   : > { %v1264_v44 = vshrl.u32 %v2406_v35, 16  ;;  %v1267_v45 = vshll.u32 %v2406_v35, 16  ;;  %v2905_v35 = vld [vmem:[%s3831_s1 + $0x780] ss:$8 sps:$4 sm:$0xff]  }
  0x8f   : > { %1608 = vmatpush1.bf16.msra.mxu0 %v2766_v46  ;;  %v2838_v46 = vld [vmem:[%s3831_s1 + $0x4e0] ss:$8 sps:$4 sm:$0xff]   ;;  %v1250_v50 = vrot.slane %v1248_v38, 1  ;;  %v1253_v51 = vrot.slane %v1251_v43, 2  ;;  %v2916_v38 = vld [vmem:[%s3831_s1 + $0x6a4] ss:$8 sps:$4 sm:$0xff]  }
  0x90   : > { %1649 = vmatpush1.bf16.msra.mxu1 %v2769_v49  ;;  %1609 = vmatprep.subr.bf16.mxu0 %v2774_v52  ;;  %v2849_v49 = vld [vmem:[%s3831_s1 + $0x5f4] ss:$8 sps:$4 sm:$0xff]   ;;  %v1266_v52 = vrot.slane %v1264_v44, 1  ;;  %v2919_v43 = vld [vmem:[%s3831_s1 + $0x7a4] ss:$8 sps:$4 sm:$0xff]  }
  0x91   : > { %1650 = vmatprep.subr.bf16.mxu1 %v2777_v53  ;;  %v1269_v53 = vrot.slane %v1267_v45, 2  ;;  %v2914_v44 = vld [vmem:[%s3831_s1 + $0x6a0] ss:$8 sps:$4 sm:$0xff]  }
  0x92   : > { %v2917_v45 = vld [vmem:[%s3831_s1 + $0x7a0] ss:$8 sps:$4 sm:$0xff]  }
  0x93   : > { %1610 = vmatpush1.bf16.msra.mxu0 %v2772_v57  ;;  %v2847_v57 = vld [vmem:[%s3831_s1 + $0x5f0] ss:$8 sps:$4 sm:$0xff]  }
  0x94   : > { %1651 = vmatpush1.bf16.msra.mxu1 %v2775_v59  ;;  %1611 = vmatprep.subr.bf16.mxu0 %v2780_v60  ;;  %v2859_v59 = vld [vmem:[%s3831_s1 + $0x704] ss:$8 sps:$4 sm:$0xff]   ;;  %v2473_v60 = vcombine.high %v3609_v54, %v3430_v37 }
  0x95   : > { %1652 = vmatprep.subr.bf16.mxu1 %v2783_v61  ;;  %v2475_v61 = vcombine.high %v3612_v55, %v3436_v39 }
  0x97   : > { %1612 = vmatpush1.bf16.msra.mxu0 %v2778_v62  ;;  %v1254_v62 = vor.u32 %v1253_v51, %v1250_v50  ;;  %v2928_v50 = vld [vmem:[%s3831_s1 + $0x6c4] ss:$8 sps:$4 sm:$0xff]  }
  0x98   : > { %1653 = vmatpush1.bf16.msra.mxu1 %v2781_v63  ;;  %1613 = vmatprep.subr.bf16.mxu0 %v2786_v0  ;;  %v1270_v63 = vor.u32 %v1269_v53, %v1266_v52  ;;  %v2854_v0 = vld [vmem:[%s3831_s1 + $0x600] ss:$8 sps:$4 sm:$0xff]   ;;  %v2931_v51 = vld [vmem:[%s3831_s1 + $0x7c4] ss:$8 sps:$4 sm:$0xff]  }
  0x99   : > { %1654 = vmatprep.subr.bf16.mxu1 %v2789_v1  ;;  %v2857_v1 = vld [vmem:[%s3831_s1 + $0x700] ss:$8 sps:$4 sm:$0xff]  }
  0x9a   : > { %v2926_v52 = vld [vmem:[%s3831_s1 + $0x6c0] ss:$8 sps:$4 sm:$0xff]  }
  0x9b   : > { %1614 = vmatpush1.bf16.msra.mxu0 %v2784_v2  ;;  %v2862_v2 = vld [vmem:[%s3831_s1 + $0x614] ss:$8 sps:$4 sm:$0xff]   ;;  %v2929_v53 = vld [vmem:[%s3831_s1 + $0x7c0] ss:$8 sps:$4 sm:$0xff]  }
  0x9c   : > { %1655 = vmatpush1.bf16.msra.mxu1 %v2787_v3  ;;  %1615 = vmatprep.subr.bf16.mxu0 %v2792_v4  ;;  %v2865_v3 = vld [vmem:[%s3831_s1 + $0x714] ss:$8 sps:$4 sm:$0xff]   ;;  %v1764_v4 = vrot.slane %v2473_v60, 2  ;;  %v2940_v60 = vld [vmem:[%s3831_s1 + $0x6e4] ss:$8 sps:$4 sm:$0xff]  }
  0x9d   : > { %1656 = vmatprep.subr.bf16.mxu1 %v2795_v5  ;;  %v1766_v5 = vrot.slane %v2475_v61, 2  ;;  %v2943_v61 = vld [vmem:[%s3831_s1 + $0x7e4] ss:$8 sps:$4 sm:$0xff]  }
  0x9f   : > { %1616 = vmatpush1.bf16.msra.mxu0 %v2790_v6  ;;  %v2860_v6 = vld [vmem:[%s3831_s1 + $0x610] ss:$8 sps:$4 sm:$0xff]  }
  0xa0   : > { %1657 = vmatpush1.bf16.msra.mxu1 %v2793_v7  ;;  %1617 = vmatprep.subr.bf16.mxu0 %v2798_v8  ;;  %v2863_v7 = vld [vmem:[%s3831_s1 + $0x710] ss:$8 sps:$4 sm:$0xff]   ;;  %v2868_v8 = vld [vmem:[%s3831_s1 + $0x624] ss:$8 sps:$4 sm:$0xff]  }
  0xa1   : > { %1658 = vmatprep.subr.bf16.mxu1 %v2801_v9  ;;  %v2871_v9 = vld [vmem:[%s3831_s1 + $0x724] ss:$8 sps:$4 sm:$0xff]  }
  0xa3   : > { %1618 = vmatpush1.bf16.msra.mxu0 %v2796_v10  ;;  %v2866_v10 = vld [vmem:[%s3831_s1 + $0x620] ss:$8 sps:$4 sm:$0xff]  }
  0xa4   : > { %1659 = vmatpush1.bf16.msra.mxu1 %v2799_v11  ;;  %1619 = vmatprep.subr.bf16.mxu0 %v2804_v12  ;;  %v2869_v11 = vld [vmem:[%s3831_s1 + $0x720] ss:$8 sps:$4 sm:$0xff]   ;;  %v2874_v12 = vld [vmem:[%s3831_s1 + $0x634] ss:$8 sps:$4 sm:$0xff]  }
  0xa5   : > { %1660 = vmatprep.subr.bf16.mxu1 %v2807_v13  ;;  %v2877_v13 = vld [vmem:[%s3831_s1 + $0x734] ss:$8 sps:$4 sm:$0xff]  }
  0xa7   : > { %1620 = vmatpush1.bf16.msra.mxu0 %v2802_v14  ;;  %v2872_v14 = vld [vmem:[%s3831_s1 + $0x630] ss:$8 sps:$4 sm:$0xff]  }
  0xa8   : > { %1661 = vmatpush1.bf16.msra.mxu1 %v2805_v15  ;;  %1621 = vmatprep.subr.bf16.mxu0 %v2810_v16  ;;  %v2875_v15 = vld [vmem:[%s3831_s1 + $0x730] ss:$8 sps:$4 sm:$0xff]   ;;  %v2880_v16 = vld [vmem:[%s3831_s1 + $0x644] ss:$8 sps:$4 sm:$0xff]  }
  0xa9   : > { %1662 = vmatprep.subr.bf16.mxu1 %v2813_v17  ;;  %v2883_v17 = vld [vmem:[%s3831_s1 + $0x744] ss:$8 sps:$4 sm:$0xff]  }
  0xab   : > { %1622 = vmatpush1.bf16.msra.mxu0 %v2808_v18  ;;  %v2878_v18 = vld [vmem:[%s3831_s1 + $0x640] ss:$8 sps:$4 sm:$0xff]  }
  0xac   : > { %1663 = vmatpush1.bf16.msra.mxu1 %v2811_v19  ;;  %1623 = vmatprep.subr.bf16.mxu0 %v2816_v20  ;;  %v2881_v19 = vld [vmem:[%s3831_s1 + $0x740] ss:$8 sps:$4 sm:$0xff]   ;;  %v2886_v20 = vld [vmem:[%s3831_s1 + $0x654] ss:$8 sps:$4 sm:$0xff]  }
  0xad   : > { %1664 = vmatprep.subr.bf16.mxu1 %v2819_v21  ;;  %v2889_v21 = vld [vmem:[%s3831_s1 + $0x754] ss:$8 sps:$4 sm:$0xff]  }
  0xaf   : > { %1624 = vmatpush1.bf16.msra.mxu0 %v2814_v22  ;;  %v2884_v22 = vld [vmem:[%s3831_s1 + $0x650] ss:$8 sps:$4 sm:$0xff]  }
  0xb0   : > { %1665 = vmatpush1.bf16.msra.mxu1 %v2817_v23  ;;  %1625 = vmatprep.subr.bf16.mxu0 %v2822_v24  ;;  %v2887_v23 = vld [vmem:[%s3831_s1 + $0x750] ss:$8 sps:$4 sm:$0xff]   ;;  %v2892_v24 = vld [vmem:[%s3831_s1 + $0x664] ss:$8 sps:$4 sm:$0xff]  }
  0xb1   : > { %1666 = vmatprep.subr.bf16.mxu1 %v2825_v25  ;;  %v2895_v25 = vld [vmem:[%s3831_s1 + $0x764] ss:$8 sps:$4 sm:$0xff]  }
  0xb3   : > { %1626 = vmatpush1.bf16.msra.mxu0 %v2820_v26  ;;  %v2890_v26 = vld [vmem:[%s3831_s1 + $0x660] ss:$8 sps:$4 sm:$0xff]  }
  0xb4   : > { %1667 = vmatpush1.bf16.msra.mxu1 %v2823_v27  ;;  %1627 = vmatprep.subr.bf16.mxu0 %v2828_v28  ;;  %v2893_v27 = vld [vmem:[%s3831_s1 + $0x760] ss:$8 sps:$4 sm:$0xff]   ;;  %v2898_v28 = vld [vmem:[%s3831_s1 + $0x674] ss:$8 sps:$4 sm:$0xff]  }
  0xb5   : > { %1668 = vmatprep.subr.bf16.mxu1 %v2831_v29  ;;  %v2901_v29 = vld [vmem:[%s3831_s1 + $0x774] ss:$8 sps:$4 sm:$0xff]  }
  0xb7   : > { %1628 = vmatpush1.bf16.msra.mxu0 %v2826_v30  ;;  %v2896_v30 = vld [vmem:[%s3831_s1 + $0x670] ss:$8 sps:$4 sm:$0xff]  }
  0xb8   : > { %1669 = vmatpush1.bf16.msra.mxu1 %v2829_v31  ;;  %1629 = vmatprep.subr.bf16.mxu0 %v2834_v32  ;;  %v2899_v31 = vld [vmem:[%s3831_s1 + $0x770] ss:$8 sps:$4 sm:$0xff]   ;;  %v2904_v32 = vld [vmem:[%s3831_s1 + $0x684] ss:$8 sps:$4 sm:$0xff]  }
  0xb9   : > { %1670 = vmatprep.subr.bf16.mxu1 %v2837_v33  ;;  %v2907_v33 = vld [vmem:[%s3831_s1 + $0x784] ss:$8 sps:$4 sm:$0xff]  }
  0xbb   : > { %1630 = vmatpush1.bf16.msra.mxu0 %v2832_v40  ;;  %v2910_v40 = vld [vmem:[%s3831_s1 + $0x694] ss:$8 sps:$4 sm:$0xff]  }
  0xbc   : > { %1671 = vmatpush1.bf16.msra.mxu1 %v2835_v41  ;;  %1631 = vmatprep.subr.bf16.mxu0 %v2840_v42  ;;  %v2913_v41 = vld [vmem:[%s3831_s1 + $0x794] ss:$8 sps:$4 sm:$0xff]   ;;  %v2908_v42 = vld [vmem:[%s3831_s1 + $0x690] ss:$8 sps:$4 sm:$0xff]  }
  0xbd   : > { %1672 = vmatprep.subr.bf16.mxu1 %v2843_v36  ;;  %v2911_v36 = vld [vmem:[%s3831_s1 + $0x790] ss:$8 sps:$4 sm:$0xff]  }
  0xbf   : > { %1632 = vmatpush1.bf16.msra.mxu0 %v2838_v46  ;;  %v2922_v46 = vld [vmem:[%s3831_s1 + $0x6b4] ss:$8 sps:$4 sm:$0xff]  }
  0xc0   : > { %1673 = vmatpush1.bf16.msra.mxu1 %v2841_v47  ;;  %1633 = vmatprep.subr.bf16.mxu0 %v2846_v48  ;;  %v2925_v47 = vld [vmem:[%s3831_s1 + $0x7b4] ss:$8 sps:$4 sm:$0xff]   ;;  %v2920_v48 = vld [vmem:[%s3831_s1 + $0x6b0] ss:$8 sps:$4 sm:$0xff]  }
  0xc1   : > { %1674 = vmatprep.subr.bf16.mxu1 %v2849_v49  ;;  %v2923_v49 = vld [vmem:[%s3831_s1 + $0x7b0] ss:$8 sps:$4 sm:$0xff]  }
  0xc3   : > { %1634 = vmatpush1.bf16.msra.mxu0 %v2844_v56  ;;  %v2934_v56 = vld [vmem:[%s3831_s1 + $0x6d4] ss:$8 sps:$4 sm:$0xff]  }
  0xc4   : > { %1675 = vmatpush1.bf16.msra.mxu1 %v2847_v57  ;;  %2091 = vmatprep.subr.bf16.mxu0 %v2856_v58  ;;  %v2937_v57 = vld [vmem:[%s3831_s1 + $0x7d4] ss:$8 sps:$4 sm:$0xff]   ;;  %v2932_v58 = vld [vmem:[%s3831_s1 + $0x6d0] ss:$8 sps:$4 sm:$0xff]  }
  0xc5   : > { %2132 = vmatprep.subr.bf16.mxu1 %v2859_v59  ;;  %v2935_v59 = vld [vmem:[%s3831_s1 + $0x7d0] ss:$8 sps:$4 sm:$0xff]  }
  0xc6   : > { %1636 = vmatmul.mubr.bf16.vlgmr.msra.gmra.mrb[8].mxu0 %v1254_v62  ;;  %v2938_v62 = vld [vmem:[%s3831_s1 + $0x6e0] ss:$8 sps:$4 sm:$0xff]  }
  0xc7   : > { %1677 = vmatmul.mubr.bf16.vlgmr.msra.gmra.mrb[8].mxu1 %v1270_v63  ;;  %2092 = vmatpush1.bf16.msra.mxu0 %v2854_v0  ;;  %v2941_v63 = vld [vmem:[%s3831_s1 + $0x7e0] ss:$8 sps:$4 sm:$0xff]   ;;  %v2946_v0 = vld [vmem:[%s3831_s1 + $0x6f4] ss:$8 sps:$4 sm:$0xff]  }
  0xc8   : > { %2133 = vmatpush1.bf16.msra.mxu1 %v2857_v1  ;;  %2093 = vmatprep.subr.bf16.mxu0 %v2862_v2  ;;  %v2949_v1 = vld [vmem:[%s3831_s1 + $0x7f4] ss:$8 sps:$4 sm:$0xff]   ;;  %v2472_v2 = vcombine.low %v3609_v54, %v3430_v37 }
  0xc9   : > { %2134 = vmatprep.subr.bf16.mxu1 %v2865_v3  ;;  %2123 = vmatprep.mubr.bf16.mxu0 %v1764_v4  ;;  %v2474_v3 = vcombine.low %v3612_v55, %v3436_v39  ;;  %v2944_v4 = vld [vmem:[%s3831_s1 + $0x6f0] ss:$8 sps:$4 sm:$0xff]  }
  0xca   : > { %2164 = vmatprep.mubr.bf16.mxu1 %v1766_v5  ;;  %v2947_v5 = vld [vmem:[%s3831_s1 + $0x7f0] ss:$8 sps:$4 sm:$0xff]  }
  0xcb   : > { %2094 = vmatpush1.bf16.msra.mxu0 %v2860_v6  ;;  %v1763_v6 = vrot.slane %v2472_v2, 2 }
  0xcc   : > { %2135 = vmatpush1.bf16.msra.mxu1 %v2863_v7  ;;  %2095 = vmatprep.subr.bf16.mxu0 %v2868_v8  ;;  %v1765_v7 = vrot.slane %v2474_v3, 2 }
  0xcd   : > { %2136 = vmatprep.subr.bf16.mxu1 %v2871_v9 }
  0xcf   : > { %2096 = vmatpush1.bf16.msra.mxu0 %v2866_v10 }
  0xd0   : > { %2137 = vmatpush1.bf16.msra.mxu1 %v2869_v11  ;;  %2097 = vmatprep.subr.bf16.mxu0 %v2874_v12 }
  0xd1   : > { %2138 = vmatprep.subr.bf16.mxu1 %v2877_v13 }
  0xd3   : > { %2098 = vmatpush1.bf16.msra.mxu0 %v2872_v14 }
  0xd4   : > { %2139 = vmatpush1.bf16.msra.mxu1 %v2875_v15  ;;  %2099 = vmatprep.subr.bf16.mxu0 %v2880_v16 }
  0xd5   : > { %2140 = vmatprep.subr.bf16.mxu1 %v2883_v17 }
  0xd7   : > { %2100 = vmatpush1.bf16.msra.mxu0 %v2878_v18 }
  0xd8   : > { %2141 = vmatpush1.bf16.msra.mxu1 %v2881_v19  ;;  %2101 = vmatprep.subr.bf16.mxu0 %v2886_v20 }
  0xd9   : > { %2142 = vmatprep.subr.bf16.mxu1 %v2889_v21 }
  0xdb   : > { %2102 = vmatpush1.bf16.msra.mxu0 %v2884_v22 }
  0xdc   : > { %2143 = vmatpush1.bf16.msra.mxu1 %v2887_v23  ;;  %2103 = vmatprep.subr.bf16.mxu0 %v2892_v24 }
  0xdd   : > { %2144 = vmatprep.subr.bf16.mxu1 %v2895_v25 }
  0xdf   : > { %2104 = vmatpush1.bf16.msra.mxu0 %v2890_v26 }
  0xe0   : > { %2145 = vmatpush1.bf16.msra.mxu1 %v2893_v27  ;;  %2105 = vmatprep.subr.bf16.mxu0 %v2898_v28 }
  0xe1   : > { %2146 = vmatprep.subr.bf16.mxu1 %v2901_v29 }
  0xe3   : > { %2106 = vmatpush1.bf16.msra.mxu0 %v2896_v30 }
  0xe4   : > { %2147 = vmatpush1.bf16.msra.mxu1 %v2899_v31  ;;  %2107 = vmatprep.subr.bf16.mxu0 %v2904_v32 }
  0xe5   : > { %2148 = vmatprep.subr.bf16.mxu1 %v2907_v33 }
  0xe7   : > { %2108 = vmatpush1.bf16.msra.mxu0 %v2902_v34 }
  0xe8   : > { %2149 = vmatpush1.bf16.msra.mxu1 %v2905_v35  ;;  %2109 = vmatprep.subr.bf16.mxu0 %v2910_v40 }
  0xe9   : > { %2150 = vmatprep.subr.bf16.mxu1 %v2913_v41 }
  0xeb   : > { %2110 = vmatpush1.bf16.msra.mxu0 %v2908_v42  ;;  %v2177_v42 = vlaneseq }
  0xec   : > { %2151 = vmatpush1.bf16.msra.mxu1 %v2911_v36  ;;  %2111 = vmatprep.subr.bf16.mxu0 %v2916_v38 }
  0xed   : > { %2152 = vmatprep.subr.bf16.mxu1 %v2919_v43  ;;  %v2178_v36 = vshrl.u32 %v2177_v42, 7  ;;  %v2175_v43 = vld [vmem:[%s3832_s2] sm:$0x3] }
  0xef   : > { %2112 = vmatpush1.bf16.msra.mxu0 %v2914_v44  ;;  %v2179_v38 = vsub.s32 0, %v2178_v36  ;;  %v2183_v44 = vsub.s32 1, %v2178_v36 }
  0xf0   : > { %2153 = vmatpush1.bf16.msra.mxu1 %v2917_v45  ;;  %2113 = vmatprep.subr.bf16.mxu0 %v2922_v46 }
  0xf1   : > { %2154 = vmatprep.subr.bf16.mxu1 %v2925_v47 }
  0xf3   : > { %2114 = vmatpush1.bf16.msra.mxu0 %v2920_v48  ;;  %v2180_v48 = vrot.slane %v2175_v43, %v2179_v38 }
  0xf4   : > { %2155 = vmatpush1.bf16.msra.mxu1 %v2923_v49  ;;  %2115 = vmatprep.subr.bf16.mxu0 %v2928_v50 }
  0xf5   : > { %2156 = vmatprep.subr.bf16.mxu1 %v2931_v51 }
  0xf7   : > { %2116 = vmatpush1.bf16.msra.mxu0 %v2926_v52  ;;  %v2184_v52 = vrot.slane %v2175_v43, %v2183_v44 }
  0xf8   : > { %2157 = vmatpush1.bf16.msra.mxu1 %v2929_v53  ;;  %2117 = vmatprep.subr.bf16.mxu0 %v2934_v56 }
  0xf9   : > { %2158 = vmatprep.subr.bf16.mxu1 %v2937_v57 }
  0xfb   : > { %2118 = vmatpush1.bf16.msra.mxu0 %v2932_v58 }
  0xfc   : > { %2159 = vmatpush1.bf16.msra.mxu1 %v2935_v59  ;;  %2119 = vmatprep.subr.bf16.mxu0 %v2940_v60 }
  0xfd   : > { %2160 = vmatprep.subr.bf16.mxu1 %v2943_v61 }
  0xff   : > { %2120 = vmatpush1.bf16.msra.mxu0 %v2938_v62 }
 0x100   : > { %2161 = vmatpush1.bf16.msra.mxu1 %v2941_v63  ;;  %2121 = vmatprep.subr.bf16.mxu0 %v2946_v0 }
 0x101   : > { %2162 = vmatprep.subr.bf16.mxu1 %v2949_v1 }
 0x103   : > { %2122 = vmatpush1.bf16.msra.mxu0 %v2944_v4 }
 0x104   : > { %2163 = vmatpush1.bf16.msra.mxu1 %v2947_v5 }
 0x106   : > { %2124 = vmatmul.mubr.bf16.vlgmr.msra.gmra.mrb[12].mxu0 %v1763_v6 }
 0x107   : > { %2165 = vmatmul.mubr.bf16.vlgmr.msra.gmra.mrb[12].mxu1 %v1765_v7 }
 0x119   : > { %v699_v37 = vpop.f32.mrb[0].mxu0 }
 0x11a   : > { %v740_v39 = vpop.f32.mrb[0].mxu1  ;;  %v701_v55 = vpop.f32.mrb[1].mxu0 }
 0x11b   : > { %v741_v54 = vadd.f32 %v740_v39, %v699_v37  ;;  %v742_v8 = vpop.f32.mrb[1].mxu1  ;;  %v703_v10 = vpop.f32.mrb[2].mxu0 }
 0x11c   : > { %v743_v9 = vadd.f32 %v742_v8, %v701_v55  ;;  %v744_v11 = vpop.f32.mrb[2].mxu1  ;;  %v704_v12 = vpop.f32.mrb[3].mxu0 }
 0x11d   : > { %v745_v13 = vpop.f32.mrb[3].mxu1 }
 0x159   : > { %v1115_v14 = vpop.f32.mrb[4].mxu0 }
 0x15a   : > { %v1156_v15 = vpop.f32.mrb[4].mxu1  ;;  %v1116_v16 = vadd.f32 %v1115_v14, %v741_v54  ;;  %v1117_v17 = vpop.f32.mrb[5].mxu0 }
 0x15b   : > { %v1158_v18 = vpop.f32.mrb[5].mxu1  ;;  %v1118_v19 = vadd.f32 %v1117_v17, %v743_v9  ;;  %v1119_v20 = vpop.f32.mrb[6].mxu0 }
 0x15c   : > { %v1160_v21 = vpop.f32.mrb[6].mxu1  ;;  %v1157_v22 = vadd.f32 %v1156_v15, %v1116_v16  ;;  %v1120_v23 = vpop.f32.mrb[7].mxu0 }
 0x15d   : > { %v1161_v24 = vpop.f32.mrb[7].mxu1  ;;  %v1159_v25 = vadd.f32 %v1158_v18, %v1118_v19 }
 0x199   : > { %v1637_v26 = vpop.f32.mrb[8].mxu0 }
 0x19a   : > { %v1678_v27 = vpop.f32.mrb[8].mxu1  ;;  %v1639_v29 = vpop.f32.mrb[9].mxu0 }
 0x19b   : > { %v1679_v28 = vadd.f32 %v1678_v27, %v1637_v26  ;;  %v1680_v30 = vpop.f32.mrb[9].mxu1  ;;  %v1641_v32 = vpop.f32.mrb[10].mxu0 }
 0x19c   : > { %v1681_v31 = vadd.f32 %v1680_v30, %v1639_v29  ;;  %v1682_v33 = vpop.f32.mrb[10].mxu1  ;;  %v1642_v35 = vpop.f32.mrb[11].mxu0 }
 0x19d   : > { %v1685_v34 = vadd.f32 %v1679_v28, %v1157_v22  ;;  %v1683_v40 = vpop.f32.mrb[11].mxu1 }
 0x19e   : > { %v1686_v41 = vadd.f32 %v1681_v31, %v1159_v25 }
 0x1d9   : > { %v2125_v45 = vpop.f32.mrb[12].mxu0 }
 0x1da   : > { %v2166_v46 = vpop.f32.mrb[12].mxu1  ;;  %v2127_v49 = vpop.f32.mrb[13].mxu0 }
 0x1db   : > { %v2167_v47 = vadd.f32 %v2166_v46, %v2125_v45  ;;  %v2168_v50 = vpop.f32.mrb[13].mxu1  ;;  %v2129_v53 = vpop.f32.mrb[14].mxu0 }
 0x1dc   : > { %v2169_v51 = vadd.f32 %v2168_v50, %v2127_v49  ;;  %v2170_v56 = vpop.f32.mrb[14].mxu1  ;;  %v2130_v58 = vpop.f32.mrb[15].mxu0 }
 0x1dd   : > { %v2173_v57 = vadd.f32 %v2167_v47, %v1685_v34  ;;  %v2171_v59 = vpop.f32.mrb[15].mxu1 }
 0x1de   : > { %v2174_v60 = vadd.f32 %v2169_v51, %v1686_v41 }
 0x1df   : > { %v2187_v61 = vadd.f32 %v2180_v48, %v2173_v57 }
 0x1e0   : > { %v2188_v62 = vadd.f32 %v2184_v52, %v2174_v60 }
 0x1e1   : > { %vm2189_vm0 = vcmp.ge.f32.partialorder %v2187_v61, 0.0  ;;  %v2191_v63 = vmul.f32 0.2, %v2187_v61 }
 0x1e2   : > { %vm2190_vm1 = vcmp.ge.f32.partialorder %v2188_v62, 0.0  ;;  %v2192_v0 = vmul.f32 0.2, %v2188_v62 }
 0x1e3   : > { %v2193_v1 = vsel %vm2189_vm0, %v2187_v61, %v2191_v63 }
 0x1e4   : > { %v2194_v2 = vsel %vm2190_vm1, %v2188_v62, %v2192_v0 }
 0x1e5   : > { %v2545_v3 = vpack.c.bf16 %v2194_v2, %v2193_v1 }
 0x1e7   : > { %2203 = vst [vmem:[%s170_s21] sm:$0x77] %v2545_v3 }
 0x1e8 PF: > { %s13_s12 = sadd.s32 1, %s2960_s12  }
 0x1e9   : > { %p10_p4 = scmp.ge.s32.totalorder %s13_s12, 4  }
 0x1eb   :  { %12 = sbr.rel (!%p10_p4) target bundleno = 1 (0x1), region = 62 }

// kernel: multiscale_discriminator_forward.16
= control target key start
LH: loop header
LB: loop body
LE: loop exit
PB: predicated region body
PF: predicated region fallthrough
CT: control target
= control target key end

     0   :  { %s334_s6 = smov 0   ;;  %s357_s0 = inlined_call_operand.vmem [shape: f32[10,4,10,10], index: 0, kind: input, shape index: {}]   ;;  %s358_s1 = inlined_call_operand.vmem [shape: f32[10,8,8], index: 1, kind: output, shape index: {}]  }
   0x1 LB: > { %s287_s7 = sadd.s32 4294967295, %s320_s6   ;;  %p291_p0 = scmp.ge.s32.totalorder %s320_s6, 1  ;;  %s320_s6 = sphi %s334_s6, %s11_s6  }
   0x2   : > { %p87_p1 = scmp.lt.s32.totalorder %s320_s6, 11 }
   0x4   : > { %p88_p2 = pnand %p291_p0, %p87_p1 }
   0x5   : > { %p106_p3 = scmp.lt.s32.totalorder (!%p88_p2), %s287_s7, 9  ;;  %s322_s12 = smov (!%p88_p2), 127   ;;  %vm226_vm0 = vcmask (!%p88_p2), 1045504   ;;  %vm209_vm1 = vcmask (!%p88_p2), 1046528   ;;  %vm232_vm2 = vcmask (!%p88_p2), 64512  }
   0x6   : > { %91 = sbr.rel (%p88_p2) target bundleno = 168 (0xa8), region = 24  ;;  %s323_s13 = smov (!%p88_p2), 126  }
   0xd   : > { %s360_s7 = smov (!%p106_p3, %s287_s7), 9 }
   0xe   : > { %s303_s8 = sshll.u32 %s360_s7, 6  ;;  %s294_s14 = sshll.u32 %s360_s7, 3 }
   0xf   : > { %s110_s11 = scalar_lea.vmem %s357_s0, %s303_s8  ;;  %s114_s17 = scalar_lea.vmem %s358_s1, %s294_s14 }
  0x10   : > { %v297_v0 = vld [vmem:[%s110_s11 + $0x20] sm:$0xff]  ;;  %v295_v2 = vld [vmem:[%s110_s11 + $0x10] sm:$0xff]  ;;  %v116_v7 = vld [vmem:[%s110_s11 + $0x8] sm:$0x3] }
  0x11   : > { %v115_v1 = vld [vmem:[%s110_s11] sm:$0xff]  ;;  %v170_v3 = vmul.f32 0.7865707, %v297_v0  ;;  %v122_v6 = vmul.f32 0.106450774, %v295_v2  ;;  %v299_v13 = vld [vmem:[%s110_s11 + $0x30] sm:$0xff] }
  0x12   : > { %v126_v4 = vmul.f32 0.7865707, %v115_v1  ;;  %v117_v5 = vmul.f32 0.00026386508, %v115_v1  ;;  %v161_v8 = vmul.f32 0.00026386508, %v297_v0 }
  0x13   : > { %174 = vrot.lane.b32.xlu1 %v170_v3, %s322_s12  ;;  %v127_v9 = vmul.f32 0.7865707, %v116_v7  ;;  %v296_v10 = vld [vmem:[%s110_s11 + $0x18] sm:$0x3]  ;;  %v298_v11 = vld [vmem:[%s110_s11 + $0x28] sm:$0x3] }
  0x14   : > { %130 = vrot.lane.b32.xlu0 %v126_v4, %s322_s12  ;;  %v123_v12 = vmul.f32 0.106450774, %v296_v10  ;;  %v124_v14 = vadd.f32 %v122_v6, %v117_v5  ;;  %v166_v15 = vmul.f32 0.106450774, %v299_v13  ;;  %v118_v16 = vmul.f32 0.00026386508, %v116_v7 }
  0x15   : > { %v300_v17 = vld [vmem:[%s110_s11 + $0x38] sm:$0x3]  ;;  %v162_v19 = vmul.f32 0.00026386508, %v298_v11  ;;  %v171_v20 = vmul.f32 0.7865707, %v298_v11 }
  0x16   : > { %v167_v18 = vmul.f32 0.106450774, %v300_v17  ;;  %v168_v21 = vadd.f32 %v166_v15, %v161_v8  ;;  %v125_v22 = vadd.f32 %v123_v12, %v118_v16 }
  0x17   : > { %140 = vrot.lane.b32.xlu1 %v122_v6, %s322_s12 }
  0x18   : > { %132 = vrot.lane.b32.xlu0 %v127_v9, %s322_s12  ;;  %v169_v23 = vadd.f32 %v167_v18, %v162_v19 }
  0x1b   : > { %176 = vrot.lane.b32.xlu1 %v171_v20, %s322_s12 }
  0x1c   : > { %142 = vrot.lane.b32.xlu0 %v123_v12, %s322_s12 }
  0x1f   : > { %150 = vrot.lane.b32.xlu1 %v117_v5, %s323_s13 }
  0x20   : > { %184 = vrot.lane.b32.xlu0 %v166_v15, %s322_s12 }
  0x23   : > { %186 = vrot.lane.b32.xlu1 %v167_v18, %s322_s12 }
  0x24   : > { %152 = vrot.lane.b32.xlu0 %v118_v16, %s323_s13 }
  0x27   : > { %196 = vrot.lane.b32.xlu1 %v162_v19, %s323_s13 }
  0x28   : > { %194 = vrot.lane.b32.xlu0 %v161_v8, %s323_s13 }
  0x85   : > { %v175_v24 = vpop.permute.xlu1 %174 }
  0x86   : > { %v131_v25 = vpop.permute.xlu0 %130  ;;  %v180_v41 = vadd.f32 %v175_v24, %v168_v21 }
  0x87   : > { %v136_v30 = vadd.f32 %v131_v25, %v124_v14 }
  0x89   : > { %v141_v26 = vpop.permute.xlu1 %140 }
  0x8a   : > { %v133_v27 = vpop.permute.xlu0 %132  ;;  %v146_v31 = vadd.f32 %v141_v26, %v136_v30 }
  0x8b   : > { %v137_v34 = vadd.f32 %v133_v27, %v125_v22 }
  0x8d   : > { %v177_v28 = vpop.permute.xlu1 %176 }
  0x8e   : > { %v143_v29 = vpop.permute.xlu0 %142  ;;  %v181_v42 = vadd.f32 %v177_v28, %v169_v23 }
  0x8f   : > { %v147_v36 = vadd.f32 %v143_v29, %v137_v34 }
  0x91   : > { %v151_v33 = vpop.permute.xlu1 %150 }
  0x92   : > { %v185_v32 = vpop.permute.xlu0 %184  ;;  %v156_v35 = vadd.f32 %v151_v33, %v146_v31 }
  0x93   : > { %v190_v44 = vadd.f32 %v185_v32, %v180_v41 }
  0x94   : > { %v202_v37 = vmul.f32 0.00026386508, %v156_v35  ;;  %v205_v38 = vmul.f32 0.7865707, %v156_v35 }
  0x95   : > { %v187_v40 = vpop.permute.xlu1 %186 }
  0x96   : > { %v153_v39 = vpop.permute.xlu0 %152  ;;  %v191_v47 = vadd.f32 %v187_v40, %v181_v42  ;;  %v210_v48 = vrot.slane %v205_v38, 1  ;;  %v227_v49 = vrot.slane %v202_v37, 2 }
  0x97   : > { %v157_v43 = vadd.f32 %v153_v39, %v147_v36 }
  0x99   : > { %v206_v45 = vmul.f32 0.7865707, %v157_v43  ;;  %v223_v46 = vmul.f32 0.00026386508, %v157_v43  ;;  %v197_v51 = vpop.permute.xlu1 %196 }
  0x9a   : > { %v195_v50 = vpop.permute.xlu0 %194  ;;  %v201_v55 = vadd.f32 %v197_v51, %v191_v47 }
  0x9b   : > { %v211_v52 = vrot.slane %v206_v45, 1  ;;  %v228_v53 = vrot.slane %v223_v46, 2  ;;  %v200_v54 = vadd.f32 %v195_v50, %v190_v44 }
  0x9c   : > { %v215_v59 = vmul.f32 0.106450774, %v201_v55 }
  0x9d   : > { %v229_v56 = vsel %vm226_vm0, %v227_v49, %v228_v53  ;;  %v203_v57 = vmul.f32 0.106450774, %v200_v54  ;;  %v212_v58 = vsel %vm209_vm1, %v210_v48, %v211_v52 }
  0x9e   : > { %v219_v62 = vrot.slane %v215_v59, 1 }
  0x9f   : > { %v204_v60 = vadd.f32 %v203_v57, %v202_v37  ;;  %v218_v61 = vrot.slane %v203_v57, 1 }
  0xa1   : > { %v214_v63 = vadd.f32 %v212_v58, %v204_v60  ;;  %v220_v0 = vsel %vm209_vm1, %v218_v61, %v219_v62 }
  0xa3   : > { %v222_v1 = vadd.f32 %v220_v0, %v214_v63 }
  0xa5   : > { %v231_v2 = vadd.f32 %v229_v56, %v222_v1 }
  0xa7   : > { %233 = vst.msk [vmem:[%s114_s17] sm:$0xff] %vm232_vm2, %v231_v2 }
  0xa8 PF: > { %s11_s6 = sadd.s32 1, %s320_s6  }
  0xa9   : > { %p8_p4 = scmp.ge.s32.totalorder %s11_s6, 12  }
  0xab   :  { %10 = sbr.rel (!%p8_p4) target bundleno = 1 (0x1), region = 57 }

// kernel: multiscale_discriminator_forward.17
= control target key start
LH: loop header
LB: loop body
LE: loop exit
PB: predicated region body
PF: predicated region fallthrough
CT: control target
= control target key end

     0   :  { %s808_s12 = smov 0   ;;  %s882_s0 = inlined_call_operand.vmem [shape: bf16[2,40,32], index: 0, kind: input, shape index: {}]   ;;  %s883_s1 = inlined_call_operand.vmem [shape: bf16[128,32], index: 1, kind: input, shape index: {}]   ;;  %s884_s2 = inlined_call_operand.vmem [shape: f32[1,32], index: 2, kind: input, shape index: {}]   ;;  %s885_s3 = inlined_call_operand.vmem [shape: bf16[2,30,32], index: 3, kind: output, shape index: {}]  }
   0x1 LB: > { %s653_s13 = sadd.s32 4294967295, %s786_s12   ;;  %p657_p0 = scmp.ge.s32.totalorder %s786_s12, 1  ;;  %s786_s12 = sphi %s808_s12, %s13_s12  }
   0x2   : > { %p137_p1 = scmp.lt.s32.totalorder %s786_s12, 3 }
   0x4   : > { %p138_p2 = pnand %p657_p0, %p137_p1 }
   0x5   : > { %v765_v0 = vld [vmem:[%s883_s1 + $0x20] sm:$0xff] (!%p138_p2)   ;;  %p161_p3 = scmp.lt.s32.totalorder (!%p138_p2), %s653_s13, 1  ;;  %v766_v1 = vld [vmem:[%s883_s1 + $0x10] sm:$0xff] (!%p138_p2)   ;;  %v767_v2 = vld [vmem:[%s883_s1 + $0x28] sm:$0xff] (!%p138_p2)   ;;  %vm223_vm0 = vcmask (!%p138_p2), 261120   ;;  %vm370_vm1 = vcmask (!%p138_p2), 1044480  }
   0x6   : > { %141 = sbr.rel (%p138_p2) target bundleno = 265 (0x109), region = 32  ;;  %728 = vmatprep.subr.bf16.mxu0 (!%p138_p2), %v765_v0  ;;  %712 = vmatprep.subr.bf16.mxu1 (!%p138_p2), %v766_v1  ;;  %v768_v3 = vld [vmem:[%s883_s1 + $0x18] sm:$0xff] (!%p138_p2)   ;;  %v775_v4 = vld [vmem:[%s883_s1] sm:$0xff] (!%p138_p2)   ;;  %v776_v5 = vld [vmem:[%s883_s1 + $0x30] sm:$0xff] (!%p138_p2)   ;;  %vm195_vm2 = vsmask.f32 (!%p138_p2), 7424 }
   0x7   : > { %729 = vmatpush3.bf16.msra.mxu0 (!%p138_p2), %v765_v0  ;;  %713 = vmatpush3.bf16.msra.mxu1 (!%p138_p2), %v766_v1  ;;  %v777_v18 = vld [vmem:[%s883_s1 + $0x38] sm:$0xff] (!%p138_p2)   ;;  %vm455_vm3 = vsmask.f32 (!%p138_p2), 4352  ;;  %v778_v41 = vld [vmem:[%s883_s1 + $0x8] sm:$0xff] (!%p138_p2)   ;;  %v684_v54 = vld [vmem:[%s884_s2] ss:$0 sm:$0xff] (!%p138_p2) }
   0x8   : > { %730 = vmatprep.subr.bf16.mxu0 (!%p138_p2), %v767_v2  ;;  %714 = vmatprep.subr.bf16.mxu1 (!%p138_p2), %v768_v3  ;;  %vm592_vm6 = vcmask (!%p138_p2), 257024   ;;  %vm596_vm9 = vcmask (!%p138_p2), 256000  }
   0xb   : > { %731 = vmatpush3.bf16.msra.mxu0 (!%p138_p2), %v767_v2  ;;  %715 = vmatpush3.bf16.msra.mxu1 (!%p138_p2), %v768_v3 }
   0xc   : > { %736 = vmatprep.subr.bf16.mxu0 (!%p138_p2), %v776_v5  ;;  %720 = vmatprep.subr.bf16.mxu1 (!%p138_p2), %v775_v4 }
   0xd   : > { %s887_s13 = smov (!%p161_p3, %s653_s13), 1 }
   0xe   : > { %s756_s22 = smul.u32 20, %s887_s13  ;;  %s691_s9 = sshll.u32 %s887_s13, 4 }
   0xf   : > { %s170_s14 = scalar_lea.vmem %s885_s3, %s691_s9 }
  0x10   : > { %s837_s27 = scalar_lea.vmem %s882_s0, %s756_s22 }
  0x11   : > { %v769_v6 = vld [vmem:[%s837_s27] sm:$0xf8]   ;;  %v770_v7 = vld [vmem:[%s837_s27 + $0x8] sm:$0xff]   ;;  %v771_v8 = vld [vmem:[%s837_s27 + $0x10] ss:$0 sps:$4 sm:$0x33]  }
  0x12   : > { %v772_v9 = vld [vmem:[%s837_s27] sm:$0xff]   ;;  %v371_v10 = vrot.slane %v769_v6, 3  ;;  %v372_v11 = vrot.slane %v770_v7, 3  ;;  %v374_v12 = vrot.slane %v771_v8, 3  ;;  %v174_v13 = vld [vmem:[%s837_s27 + $0x8] sm:$0xf] }
  0x13   : > { %v197_v14 = vshrl.u32 %v772_v9, 16  ;;  %v180_v16 = vld [vmem:[%s837_s27 + $0xc] sm:$0xf]  ;;  %v199_v17 = vshll.u32 %v772_v9, 16  ;;  %v457_v21 = vshrl.u32 %v769_v6, 16  ;;  %v460_v23 = vshll.u32 %v769_v6, 16 }
  0x14   : > { %v373_v15 = vsel %vm370_vm1, %v371_v10, %v372_v11  ;;  %v375_v19 = vsel %vm370_vm1, %v372_v11, %v374_v12  ;;  %v662_v20 = vcombine.low %v174_v13, %v180_v16  ;;  %v465_v24 = vshrl.u32 %v770_v7, 16  ;;  %v779_v29 = vld [vmem:[%s837_s27 + $0x10] ss:$0 sps:$4 sm:$0x77]   ;;  %v175_v47 = vld [vmem:[%s837_s27 + $0xc] sm:$0x7] }
  0x15   : > { %732 = vmatprep.mubr.msk.bf16.mxu0 %vm223_vm0, %v373_v15  ;;  %v201_v22 = vrot.slane %v199_v17, 1  ;;  %v468_v25 = vshll.u32 %v770_v7, 16  ;;  %v459_v28 = vrot.slane %v457_v21, 3  ;;  %v462_v31 = vrot.slane %v460_v23, 4 }
  0x16   : > { %733 = vmatmul.mubr.msk.bf16.vlgmr.msra.gmra.mrb[0].mxu0 %vm223_vm0, %v375_v19  ;;  %v204_v26 = vshll.u32 %v662_v20, 16  ;;  %v208_v27 = vshrl.u32 %v662_v20, 16  ;;  %v467_v32 = vrot.slane %v465_v24, 3  ;;  %v474_v35 = vshrl.u32 %v779_v29, 16 }
  0x17   : > { %737 = vmatpush3.bf16.msra.mxu0 %v776_v5  ;;  %v202_v30 = vor.u32 %v201_v22, %v197_v14  ;;  %v470_v33 = vrot.slane %v468_v25, 4  ;;  %v477_v36 = vshll.u32 %v779_v29, 16  ;;  %v463_v37 = vor.u32 %v462_v31, %v459_v28 }
  0x18   : > { %738 = vmatprep.subr.bf16.mxu0 %v777_v18  ;;  %v206_v34 = vrot.slane %v204_v26, 1  ;;  %v476_v42 = vrot.slane %v474_v35, 3  ;;  %v667_v48 = vcombine.low %v174_v13, %v175_v47 }
  0x19   : > { %v471_v38 = vor.u32 %v470_v33, %v467_v32  ;;  %v479_v43 = vrot.slane %v477_v36, 4 }
  0x1a   : > { %v207_v39 = vsel %vm195_vm2, %v202_v30, %v206_v34  ;;  %v210_v40 = vor.u32 %v208_v27, %v206_v34 }
  0x1b   : > { %739 = vmatpush3.bf16.msra.mxu0 %v777_v18  ;;  %716 = vmatprep.mubr.msk.bf16.mxu1 %vm223_vm0, %v207_v39  ;;  %v472_v44 = vsel %vm455_vm3, %v463_v37, %v471_v38  ;;  %v480_v45 = vor.u32 %v479_v43, %v476_v42 }
  0x1c   : > { %717 = vmatmul.mubr.msk.bf16.vlgmr.msra.gmra.mrb[0].mxu1 %vm223_vm0, %v210_v40  ;;  %740 = vmatprep.mubr.msk.bf16.mxu0 %vm223_vm0, %v472_v44 }
  0x1d   : > { %721 = vmatpush3.bf16.msra.mxu1 %v775_v4  ;;  %724 = vmatprep.mubr.msk.bf16.mxu1 %vm223_vm0, %v772_v9  ;;  %v481_v46 = vsel %vm455_vm3, %v471_v38, %v480_v45 }
  0x1e   : > { %722 = vmatprep.subr.bf16.mxu1 %v778_v41 }
  0x21   : > { %723 = vmatpush3.bf16.msra.mxu1 %v778_v41 }
  0x22   : > { %741 = vmatmul.mubr.msk.bf16.vlgmr.msra.gmra.mrb[0].mxu0 %vm223_vm0, %v481_v46 }
  0x28   : > { %725 = vmatmul.mubr.msk.bf16.vlgmr.msra.gmra.mrb[0].mxu1 %vm223_vm0, %v667_v48 }
  0xf5   : > { %v742_v49 = vpop.f32.mrb[0].mxu0 }
  0xf6   : > { %v534_v50 = vpop.f32.mrb[1].mxu0 }
  0xf7   : > { %v743_v51 = vpop.f32.mrb[2].mxu0 }
  0xf8   : > { %v537_v52 = vpop.f32.mrb[3].mxu0 }
  0xfb   : > { %v726_v53 = vpop.f32.mrb[0].mxu1 }
  0xfc   : > { %v744_v55 = vadd.f32 %v742_v49, %v726_v53  ;;  %v333_v56 = vpop.f32.mrb[1].mxu1 }
  0xfd   : > { %v745_v57 = vadd.f32 %v534_v50, %v333_v56  ;;  %v727_v58 = vpop.f32.mrb[2].mxu1 }
  0xfe   : > { %v562_v59 = vadd.f32 %v744_v55, %v684_v54  ;;  %v746_v60 = vadd.f32 %v743_v51, %v727_v58  ;;  %v336_v61 = vpop.f32.mrb[3].mxu1 }
  0xff   : > { %v560_v62 = vadd.f32 %v745_v57, %v684_v54  ;;  %v747_v63 = vadd.f32 %v537_v52, %v336_v61 }
 0x100   : > { %vm566_vm4 = vcmp.ge.f32.partialorder %v562_v59, 0.0  ;;  %v570_v0 = vmul.f32 0.2, %v562_v59  ;;  %v563_v1 = vadd.f32 %v746_v60, %v684_v54 }
 0x101   : > { %vm564_vm5 = vcmp.ge.f32.partialorder %v560_v62, 0.0  ;;  %v568_v2 = vmul.f32 0.2, %v560_v62  ;;  %v561_v3 = vadd.f32 %v747_v63, %v684_v54 }
 0x102   : > { %v574_v4 = vsel %vm566_vm4, %v562_v59, %v570_v0  ;;  %vm567_vm7 = vcmp.ge.f32.partialorder %v563_v1, 0.0  ;;  %v571_v5 = vmul.f32 0.2, %v563_v1 }
 0x103   : > { %v694_v6 = vpack.c.bf16 %v574_v4, %v574_v4  ;;  %v572_v7 = vsel %vm564_vm5, %v560_v62, %v568_v2  ;;  %vm565_vm8 = vcmp.ge.f32.partialorder %v561_v3, 0.0  ;;  %v569_v8 = vmul.f32 0.2, %v561_v3 }
 0x104   : > { %v692_v9 = vpack.c.bf16 %v572_v7, %v572_v7  ;;  %v575_v10 = vsel %vm567_vm7, %v563_v1, %v571_v5 }
 0x105   : > { %595 = vst.msk [vmem:[%s170_s14 + $0x8] sm:$0xf] %vm592_vm6, %v694_v6  ;;  %v695_v11 = vpack.c.bf16 %v575_v10, %v575_v10  ;;  %v573_v12 = vsel %vm565_vm8, %v561_v3, %v569_v8 }
 0x106   : > { %593 = vst.msk [vmem:[%s170_s14] sm:$0xf] %vm592_vm6, %v692_v9  ;;  %v693_v13 = vpack.c.bf16 %v573_v12, %v573_v12 }
 0x107   : > { %597 = vst.msk [vmem:[%s170_s14 + $0xc] sm:$0x7] %vm596_vm9, %v695_v11 }
 0x108   : > { %594 = vst.msk [vmem:[%s170_s14 + $0x4] sm:$0xf] %vm592_vm6, %v693_v13 }
 0x109 PF: > { %s13_s12 = sadd.s32 1, %s786_s12  }
 0x10a   : > { %p10_p4 = scmp.ge.s32.totalorder %s13_s12, 4  }
 0x10c   :  { %12 = sbr.rel (!%p10_p4) target bundleno = 1 (0x1), region = 62 }

// kernel: multiscale_discriminator_forward.18
= control target key start
LH: loop header
LB: loop body
LE: loop exit
PB: predicated region body
PF: predicated region fallthrough
CT: control target
= control target key end

     0   :  { %s980_s12 = smov 0   ;;  %s1148_s0 = inlined_call_operand.vmem [shape: bf16[2,24,128], index: 0, kind: input, shape index: {}]   ;;  %s1149_s1 = inlined_call_operand.vmem [shape: bf16[512,64], index: 1, kind: input, shape index: {}]   ;;  %s1150_s2 = inlined_call_operand.vmem [shape: f32[1,64], index: 2, kind: input, shape index: {}]   ;;  %s1151_s3 = inlined_call_operand.vmem [shape: bf16[2,12,64], index: 3, kind: output, shape index: {}]  }
   0x1 LB: > { %s733_s13 = sadd.s32 4294967295, %s956_s12   ;;  %p737_p0 = scmp.ge.s32.totalorder %s956_s12, 1  ;;  %s956_s12 = sphi %s980_s12, %s13_s12  }
   0x2   : > { %p137_p1 = scmp.lt.s32.totalorder %s956_s12, 3 }
   0x4   : > { %p138_p2 = pnand %p737_p0, %p137_p1 }
   0x5   : > { %v913_v0 = vld [vmem:[%s1149_s1 + $0x40] sm:$0xff] (!%p138_p2)   ;;  %v958_v1 = vmov (!%p138_p2), 0.0   ;;  %v915_v3 = vld [vmem:[%s1149_s1 + $0x48] sm:$0xff] (!%p138_p2)   ;;  %vm959_vm0 = vmmov (!%p138_p2), 0   ;;  %p161_p3 = scmp.lt.s32.totalorder (!%p138_p2), %s733_s13, 1  ;;  %v917_v5 = vld [vmem:[%s1149_s1 + $0x50] sm:$0xff] (!%p138_p2)  }
   0x6   : > { %141 = sbr.rel (%p138_p2) target bundleno = 296 (0x128), region = 32  ;;  %822 = vmatprep.subr.bf16.mxu0 (!%p138_p2), %v958_v1  ;;  %842 = vmatprep.subr.bf16.mxu1 (!%p138_p2), %v958_v1  ;;  %v914_v2 = vld [vmem:[%s1149_s1] sm:$0xff] (!%p138_p2)   ;;  %v916_v4 = vld [vmem:[%s1149_s1 + $0x8] sm:$0xff] (!%p138_p2)   ;;  %v918_v6 = vld [vmem:[%s1149_s1 + $0x10] sm:$0xff] (!%p138_p2)   ;;  %vm545_vm1 = vsmask.f32 (!%p138_p2), 5376 }
   0x7   : > { %823 = vmatpush3.bf16.msra.mxu0 (!%p138_p2), %v913_v0  ;;  %838 = vmatprep.mubr.msk.bf16.mxu0 (!%p138_p2), %vm959_vm0, %v958_v1  ;;  %v919_v7 = vld [vmem:[%s1149_s1 + $0x58] sm:$0xff] (!%p138_p2)   ;;  %v921_v9 = vld [vmem:[%s1149_s1 + $0x60] sm:$0xff] (!%p138_p2)   ;;  %v923_v14 = vld [vmem:[%s1149_s1 + $0x68] sm:$0xff] (!%p138_p2)   ;;  %vm674_vm3 = vcmask (!%p138_p2), 519168   ;;  %vm676_vm5 = vcmask (!%p138_p2), 517120  }
   0x8   : > { %843 = vmatpush3.bf16.msra.mxu1 (!%p138_p2), %v914_v2  ;;  %824 = vmatprep.subr.bf16.mxu0 (!%p138_p2), %v958_v1  ;;  %v920_v8 = vld [vmem:[%s1149_s1 + $0x18] sm:$0xff] (!%p138_p2)   ;;  %v922_v10 = vld [vmem:[%s1149_s1 + $0x20] sm:$0xff] (!%p138_p2)   ;;  %v924_v15 = vld [vmem:[%s1149_s1 + $0x28] sm:$0xff] (!%p138_p2)  }
   0x9   : > { %844 = vmatprep.subr.bf16.mxu1 (!%p138_p2), %v958_v1  ;;  %858 = vmatprep.mubr.msk.bf16.mxu1 (!%p138_p2), %vm959_vm0, %v958_v1  ;;  %v925_v17 = vld [vmem:[%s1149_s1 + $0x70] sm:$0xff] (!%p138_p2)   ;;  %v927_v19 = vld [vmem:[%s1149_s1 + $0x78] sm:$0xff] (!%p138_p2)   ;;  %v931_v26 = vld [vmem:[%s1149_s1 + $0x80] sm:$0xff] (!%p138_p2)  }
   0xa   : > { %v926_v18 = vld [vmem:[%s1149_s1 + $0x30] sm:$0xff] (!%p138_p2)   ;;  %v928_v22 = vld [vmem:[%s1149_s1 + $0x38] sm:$0xff] (!%p138_p2)   ;;  %v932_v27 = vld [vmem:[%s1149_s1 + $0xc0] sm:$0xff] (!%p138_p2)  }
   0xb   : > { %825 = vmatpush3.bf16.msra.mxu0 (!%p138_p2), %v915_v3  ;;  %v933_v28 = vld [vmem:[%s1149_s1 + $0x88] sm:$0xff] (!%p138_p2)   ;;  %v935_v30 = vld [vmem:[%s1149_s1 + $0x90] sm:$0xff] (!%p138_p2)   ;;  %v937_v32 = vld [vmem:[%s1149_s1 + $0x98] sm:$0xff] (!%p138_p2)  }
   0xc   : > { %845 = vmatpush3.bf16.msra.mxu1 (!%p138_p2), %v916_v4  ;;  %826 = vmatprep.subr.bf16.mxu0 (!%p138_p2), %v958_v1  ;;  %v934_v29 = vld [vmem:[%s1149_s1 + $0xc8] sm:$0xff] (!%p138_p2)   ;;  %v936_v31 = vld [vmem:[%s1149_s1 + $0xd0] sm:$0xff] (!%p138_p2)   ;;  %v938_v33 = vld [vmem:[%s1149_s1 + $0xd8] sm:$0xff] (!%p138_p2)  }
   0xd   : > { %s1153_s13 = smov (!%p161_p3, %s733_s13), 1  ;;  %846 = vmatprep.subr.bf16.mxu1 %v958_v1  ;;  %v939_v34 = vld [vmem:[%s1149_s1 + $0xa0] sm:$0xff]   ;;  %v941_v37 = vld [vmem:[%s1149_s1 + $0xa8] sm:$0xff]   ;;  %v943_v42 = vld [vmem:[%s1149_s1 + $0xb0] sm:$0xff]  }
   0xe   : > { %s902_s26 = smul.u32 12, %s1153_s13  ;;  %v940_v35 = vld [vmem:[%s1149_s1 + $0xe0] sm:$0xff]   ;;  %v942_v38 = vld [vmem:[%s1149_s1 + $0xe8] sm:$0xff]   ;;  %v944_v43 = vld [vmem:[%s1149_s1 + $0xf0] sm:$0xff]   ;;  %s783_s8 = sshll.u32 %s1153_s13, 3 }
   0xf   : > { %827 = vmatpush3.bf16.msra.mxu0 %v917_v5  ;;  %v945_v48 = vld [vmem:[%s1149_s1 + $0xb8] sm:$0xff]   ;;  %v778_v4 = vld [vmem:[%s1150_s2] ss:$0 sm:$0xff]  ;;  %s170_s11 = scalar_lea.vmem %s1151_s3, %s783_s8 }
  0x10   : > { %847 = vmatpush3.bf16.msra.mxu1 %v918_v6  ;;  %828 = vmatprep.subr.bf16.mxu0 %v958_v1  ;;  %s1030_s6 = scalar_lea.vmem %s1148_s0, %s902_s26  ;;  %v946_v49 = vld [vmem:[%s1149_s1 + $0xf8] sm:$0xff]  }
  0x11   : > { %848 = vmatprep.subr.bf16.mxu1 %v958_v1  ;;  %v172_v11 = vld [vmem:[%s1030_s6] sm:$0xf]  ;;  %v190_v12 = vld [vmem:[%s1030_s6 + $0x4] sm:$0x7] }
  0x12   : > { %v741_v13 = vcombine.low %v172_v11, %v190_v12  ;;  %v173_v23 = vld [vmem:[%s1030_s6 + $0x4] sm:$0x3]  ;;  %v949_v39 = vld [vmem:[%s1030_s6 + $0x8] ss:$0 sps:$4 sm:$0x11]  }
  0x13   : > { %829 = vmatpush3.bf16.msra.mxu0 %v919_v7  ;;  %v750_v25 = vcombine.low %v172_v11, %v173_v23  ;;  %v948_v36 = vld [vmem:[%s1030_s6] sm:$0xfc]   ;;  %v555_v46 = vshll.u32 %v949_v39, 16 }
  0x14   : > { %849 = vmatpush3.bf16.msra.mxu1 %v920_v8  ;;  %830 = vmatprep.subr.bf16.mxu0 %v958_v1  ;;  %v215_v16 = vshll.u32 %v741_v13, 16  ;;  %v213_v20 = vshrl.u32 %v741_v13, 16  ;;  %v547_v40 = vshrl.u32 %v948_v36, 16  ;;  %v550_v41 = vshll.u32 %v948_v36, 16  ;;  %v947_v47 = vld [vmem:[%s1030_s6] sm:$0xfc]  }
  0x15   : > { %850 = vmatprep.subr.bf16.mxu1 %v958_v1  ;;  %v557_v51 = vrot.slane %v555_v46, 3  ;;  %v425_v52 = vrot.slane %v947_v47, 2 }
  0x16   : > { %v217_v21 = vrot.slane %v215_v16, 1  ;;  %v549_v44 = vrot.slane %v547_v40, 2  ;;  %v552_v45 = vrot.slane %v550_v41, 3 }
  0x17   : > { %831 = vmatpush3.bf16.msra.mxu0 %v921_v9 }
  0x18   : > { %851 = vmatpush3.bf16.msra.mxu1 %v922_v10  ;;  %832 = vmatprep.subr.bf16.mxu0 %v958_v1  ;;  %v218_v24 = vor.u32 %v217_v21, %v213_v20  ;;  %v553_v50 = vor.u32 %v552_v45, %v549_v44 }
  0x19   : > { %852 = vmatprep.subr.bf16.mxu1 %v958_v1 }
  0x1a   : > { %v558_v53 = vsel %vm545_vm1, %v553_v50, %v557_v51 }
  0x1b   : > { %833 = vmatpush3.bf16.msra.mxu0 %v923_v14 }
  0x1c   : > { %853 = vmatpush3.bf16.msra.mxu1 %v924_v15  ;;  %834 = vmatprep.subr.bf16.mxu0 %v958_v1 }
  0x1d   : > { %854 = vmatprep.subr.bf16.mxu1 %v958_v1 }
  0x1f   : > { %835 = vmatpush3.bf16.msra.mxu0 %v925_v17 }
  0x20   : > { %855 = vmatpush3.bf16.msra.mxu1 %v926_v18  ;;  %836 = vmatprep.subr.bf16.mxu0 %v958_v1 }
  0x21   : > { %856 = vmatprep.subr.bf16.mxu1 %v958_v1 }
  0x23   : > { %837 = vmatpush3.bf16.msra.mxu0 %v927_v19 }
  0x24   : > { %857 = vmatpush3.bf16.msra.mxu1 %v928_v22  ;;  %862 = vmatprep.subr.bf16.mxu0 %v958_v1 }
  0x25   : > { %882 = vmatprep.subr.bf16.mxu1 %v958_v1 }
  0x26   : > { %839 = vmatmul.mubr.bf16.vlgmr.msra.gmra.mrb[0].mxu0 %v218_v24 }
  0x27   : > { %859 = vmatmul.mubr.bf16.vlgmr.msra.gmra.mrb[0].mxu1 %v750_v25  ;;  %863 = vmatpush3.bf16.msra.mxu0 %v931_v26 }
  0x28   : > { %883 = vmatpush3.bf16.msra.mxu1 %v932_v27  ;;  %864 = vmatprep.subr.bf16.mxu0 %v958_v1 }
  0x29   : > { %884 = vmatprep.subr.bf16.mxu1 %v958_v1  ;;  %878 = vmatprep.mubr.msk.bf16.mxu0 %vm959_vm0, %v958_v1 }
  0x2a   : > { %898 = vmatprep.mubr.msk.bf16.mxu1 %vm959_vm0, %v958_v1 }
  0x2b   : > { %865 = vmatpush3.bf16.msra.mxu0 %v933_v28 }
  0x2c   : > { %885 = vmatpush3.bf16.msra.mxu1 %v934_v29  ;;  %866 = vmatprep.subr.bf16.mxu0 %v958_v1 }
  0x2d   : > { %886 = vmatprep.subr.bf16.mxu1 %v958_v1 }
  0x2f   : > { %867 = vmatpush3.bf16.msra.mxu0 %v935_v30 }
  0x30   : > { %887 = vmatpush3.bf16.msra.mxu1 %v936_v31  ;;  %868 = vmatprep.subr.bf16.mxu0 %v958_v1 }
  0x31   : > { %888 = vmatprep.subr.bf16.mxu1 %v958_v1 }
  0x33   : > { %869 = vmatpush3.bf16.msra.mxu0 %v937_v32 }
  0x34   : > { %889 = vmatpush3.bf16.msra.mxu1 %v938_v33  ;;  %870 = vmatprep.subr.bf16.mxu0 %v958_v1 }
  0x35   : > { %890 = vmatprep.subr.bf16.mxu1 %v958_v1 }
  0x37   : > { %871 = vmatpush3.bf16.msra.mxu0 %v939_v34 }
  0x38   : > { %891 = vmatpush3.bf16.msra.mxu1 %v940_v35  ;;  %872 = vmatprep.subr.bf16.mxu0 %v958_v1 }
  0x39   : > { %892 = vmatprep.subr.bf16.mxu1 %v958_v1 }
  0x3b   : > { %873 = vmatpush3.bf16.msra.mxu0 %v941_v37 }
  0x3c   : > { %893 = vmatpush3.bf16.msra.mxu1 %v942_v38  ;;  %874 = vmatprep.subr.bf16.mxu0 %v958_v1 }
  0x3d   : > { %894 = vmatprep.subr.bf16.mxu1 %v958_v1 }
  0x3f   : > { %875 = vmatpush3.bf16.msra.mxu0 %v943_v42 }
  0x40   : > { %895 = vmatpush3.bf16.msra.mxu1 %v944_v43  ;;  %876 = vmatprep.subr.bf16.mxu0 %v958_v1 }
  0x41   : > { %896 = vmatprep.subr.bf16.mxu1 %v958_v1 }
  0x43   : > { %877 = vmatpush3.bf16.msra.mxu0 %v945_v48 }
  0x44   : > { %897 = vmatpush3.bf16.msra.mxu1 %v946_v49 }
  0x46   : > { %879 = vmatmul.mubr.bf16.vlgmr.msra.gmra.mrb[4].mxu0 %v425_v52 }
  0x47   : > { %899 = vmatmul.mubr.bf16.vlgmr.msra.gmra.mrb[4].mxu1 %v558_v53 }
  0xf9   : > { %v302_v54 = vpop.f32.mrb[0].mxu0 }
  0xfa   : > { %v395_v55 = vpop.f32.mrb[0].mxu1  ;;  %v840_v56 = vpop.f32.mrb[1].mxu0 }
  0xfb   : > { %v396_v57 = vadd.f32 %v395_v55, %v302_v54  ;;  %v860_v58 = vpop.f32.mrb[1].mxu1  ;;  %v305_v59 = vpop.f32.mrb[2].mxu0 }
  0xfc   : > { %v398_v60 = vpop.f32.mrb[2].mxu1  ;;  %v841_v61 = vpop.f32.mrb[3].mxu0 }
  0xfd   : > { %v399_v62 = vadd.f32 %v398_v60, %v305_v59  ;;  %v861_v63 = vpop.f32.mrb[3].mxu1 }
 0x119   : > { %v509_v0 = vpop.f32.mrb[4].mxu0 }
 0x11a   : > { %v516_v1 = vadd.f32 %v509_v0, %v396_v57  ;;  %v642_v2 = vpop.f32.mrb[4].mxu1  ;;  %v880_v3 = vpop.f32.mrb[5].mxu0 }
 0x11b   : > { %v900_v5 = vpop.f32.mrb[5].mxu1  ;;  %v512_v6 = vpop.f32.mrb[6].mxu0 }
 0x11c   : > { %v649_v7 = vadd.f32 %v642_v2, %v516_v1  ;;  %v517_v8 = vadd.f32 %v512_v6, %v399_v62  ;;  %v645_v9 = vpop.f32.mrb[6].mxu1  ;;  %v881_v10 = vpop.f32.mrb[7].mxu0 }
 0x11d   : > { %v901_v11 = vpop.f32.mrb[7].mxu1 }
 0x11e   : > { %v658_v12 = vadd.f32 %v778_v4, %v649_v7  ;;  %v650_v13 = vadd.f32 %v645_v9, %v517_v8 }
 0x120   : > { %vm660_vm2 = vcmp.ge.f32.partialorder %v658_v12, 0.0  ;;  %v662_v14 = vmul.f32 0.2, %v658_v12  ;;  %v659_v15 = vadd.f32 %v778_v4, %v650_v13 }
 0x122   : > { %v664_v16 = vsel %vm660_vm2, %v658_v12, %v662_v14  ;;  %vm661_vm4 = vcmp.ge.f32.partialorder %v659_v15, 0.0  ;;  %v663_v17 = vmul.f32 0.2, %v659_v15 }
 0x123   : > { %v784_v18 = vpack.c.bf16 %v664_v16, %v664_v16 }
 0x124   : > { %v665_v19 = vsel %vm661_vm4, %v659_v15, %v663_v17 }
 0x125   : > { %675 = vst.msk [vmem:[%s170_s11] sm:$0xf] %vm674_vm3, %v784_v18  ;;  %v785_v20 = vpack.c.bf16 %v665_v19, %v665_v19 }
 0x127   : > { %677 = vst.msk [vmem:[%s170_s11 + $0x4] sm:$0x3] %vm676_vm5, %v785_v20 }
 0x128 PF: > { %s13_s12 = sadd.s32 1, %s956_s12  }
 0x129   : > { %p10_p4 = scmp.ge.s32.totalorder %s13_s12, 4  }
 0x12b   :  { %12 = sbr.rel (!%p10_p4) target bundleno = 1 (0x1), region = 62 }

// kernel: multiscale_discriminator_forward.19
= control target key start
LH: loop header
LB: loop body
LE: loop exit
PB: predicated region body
PF: predicated region fallthrough
CT: control target
= control target key end

     0   :  { %s1258_s12 = smov 0   ;;  %s1485_s0 = inlined_call_operand.vmem [shape: bf16[2,16,256], index: 0, kind: input, shape index: {}]   ;;  %s1486_s1 = inlined_call_operand.vmem [shape: bf16[1024,128], index: 1, kind: input, shape index: {}]   ;;  %s1487_s2 = inlined_call_operand.vmem [shape: f32[1,128], index: 2, kind: input, shape index: {}]   ;;  %s1488_s3 = inlined_call_operand.vmem [shape: bf16[2,6,128], index: 3, kind: output, shape index: {}]  }
   0x1 LB: > { %s978_s13 = sadd.s32 4294967295, %s1236_s12   ;;  %p982_p0 = scmp.ge.s32.totalorder %s1236_s12, 1  ;;  %s1236_s12 = sphi %s1258_s12, %s13_s12  }
   0x2   : > { %p137_p1 = scmp.lt.s32.totalorder %s1236_s12, 3 }
   0x4   : > { %p138_p2 = pnand %p982_p0, %p137_p1 }
   0x5   : > { %v1158_v0 = vld [vmem:[%s1486_s1 + $0xc0] sm:$0xff] (!%p138_p2)   ;;  %v1162_v4 = vld [vmem:[%s1486_s1 + $0xc8] sm:$0xff] (!%p138_p2)   ;;  %v1166_v8 = vld [vmem:[%s1486_s1 + $0xd0] sm:$0xff] (!%p138_p2)   ;;  %p160_p3 = scmp.lt.s32.totalorder (!%p138_p2), %s978_s13, 1 }
   0x6   : > { %141 = sbr.rel (%p138_p2) target bundleno = 298 (0x12a), region = 32  ;;  %v1159_v1 = vld [vmem:[%s1486_s1 + $0x40] sm:$0xff] (!%p138_p2)   ;;  %1062 = vmatprep.subr.bf16.mxu0 (!%p138_p2), %v1158_v0  ;;  %v1163_v5 = vld [vmem:[%s1486_s1 + $0x48] sm:$0xff] (!%p138_p2)   ;;  %v1167_v9 = vld [vmem:[%s1486_s1 + $0x50] sm:$0xff] (!%p138_p2)  }
   0x7   : > { %v1160_v2 = vld [vmem:[%s1486_s1 + $0x80] sm:$0xff] (!%p138_p2)   ;;  %1084 = vmatprep.subr.bf16.mxu1 (!%p138_p2), %v1159_v1  ;;  %v1164_v6 = vld [vmem:[%s1486_s1 + $0x88] sm:$0xff] (!%p138_p2)   ;;  %v1168_v10 = vld [vmem:[%s1486_s1 + $0x90] sm:$0xff] (!%p138_p2)  }
   0x8   : > { %v1161_v3 = vld [vmem:[%s1486_s1] sm:$0xff] (!%p138_p2)   ;;  %1063 = vmatpush3.bf16.msra.mxu0 (!%p138_p2), %v1160_v2  ;;  %v1165_v7 = vld [vmem:[%s1486_s1 + $0x8] sm:$0xff] (!%p138_p2)   ;;  %v1169_v11 = vld [vmem:[%s1486_s1 + $0x10] sm:$0xff] (!%p138_p2)  }
   0x9   : > { %1085 = vmatpush3.bf16.msra.mxu1 (!%p138_p2), %v1161_v3  ;;  %1064 = vmatprep.subr.bf16.mxu0 (!%p138_p2), %v1162_v4  ;;  %v1170_v12 = vld [vmem:[%s1486_s1 + $0xd8] sm:$0xff] (!%p138_p2)   ;;  %v1174_v16 = vld [vmem:[%s1486_s1 + $0xe0] sm:$0xff] (!%p138_p2)   ;;  %v1178_v20 = vld [vmem:[%s1486_s1 + $0xe8] sm:$0xff] (!%p138_p2)  }
   0xa   : > { %1086 = vmatprep.subr.bf16.mxu1 (!%p138_p2), %v1163_v5  ;;  %v1171_v13 = vld [vmem:[%s1486_s1 + $0x58] sm:$0xff] (!%p138_p2)   ;;  %v1175_v17 = vld [vmem:[%s1486_s1 + $0x60] sm:$0xff] (!%p138_p2)   ;;  %v1179_v21 = vld [vmem:[%s1486_s1 + $0x68] sm:$0xff] (!%p138_p2)  }
   0xb   : > { %v1172_v14 = vld [vmem:[%s1486_s1 + $0x98] sm:$0xff] (!%p138_p2)   ;;  %v1176_v18 = vld [vmem:[%s1486_s1 + $0xa0] sm:$0xff] (!%p138_p2)   ;;  %v1180_v22 = vld [vmem:[%s1486_s1 + $0xa8] sm:$0xff] (!%p138_p2)  }
   0xc   : > { %1065 = vmatpush3.bf16.msra.mxu0 (!%p138_p2), %v1164_v6  ;;  %v1173_v15 = vld [vmem:[%s1486_s1 + $0x18] sm:$0xff] (!%p138_p2)   ;;  %v1177_v19 = vld [vmem:[%s1486_s1 + $0x20] sm:$0xff] (!%p138_p2)   ;;  %v1181_v23 = vld [vmem:[%s1486_s1 + $0x28] sm:$0xff] (!%p138_p2)  }
   0xd   : > { %1087 = vmatpush3.bf16.msra.mxu1 %v1165_v7  ;;  %1066 = vmatprep.subr.bf16.mxu0 %v1166_v8  ;;  %s1490_s13 = smov (!%p160_p3, %s978_s13), 1  ;;  %v1182_v24 = vld [vmem:[%s1486_s1 + $0xf0] sm:$0xff]   ;;  %v1186_v28 = vld [vmem:[%s1486_s1 + $0xf8] sm:$0xff]   ;;  %v1194_v38 = vld [vmem:[%s1486_s1 + $0x140] sm:$0xff]  }
   0xe   : > { %1088 = vmatprep.subr.bf16.mxu1 %v1167_v9  ;;  %v1183_v25 = vld [vmem:[%s1486_s1 + $0x70] sm:$0xff]   ;;  %s1061_s18 = sshll.u32 %s1490_s13, 4  ;;  %v1187_v29 = vld [vmem:[%s1486_s1 + $0x78] sm:$0xff]   ;;  %v1195_v39 = vld [vmem:[%s1486_s1 + $0x1c0] sm:$0xff]   ;;  %s985_s24 = sshll.u32 %s1490_s13, 2 }
   0xf   : > { %v1184_v26 = vld [vmem:[%s1486_s1 + $0xb0] sm:$0xff]   ;;  %s1366_s27 = scalar_lea.vmem %s1485_s0, %s1061_s18  ;;  %v1188_v30 = vld [vmem:[%s1486_s1 + $0xb8] sm:$0xff]   ;;  %v1196_v46 = vld [vmem:[%s1486_s1 + $0x100] sm:$0xff]   ;;  %s168_s28 = scalar_lea.vmem %s1488_s3, %s985_s24 }
  0x10   : > { %1067 = vmatpush3.bf16.msra.mxu0 %v1168_v10  ;;  %v1185_v27 = vld [vmem:[%s1486_s1 + $0x30] sm:$0xff]   ;;  %v1189_v31 = vld [vmem:[%s1486_s1 + $0x38] sm:$0xff]   ;;  %v203_v32 = vld [vmem:[%s1366_s27] sm:$0xff] }
  0x11   : > { %1089 = vmatpush3.bf16.msra.mxu1 %v1169_v11  ;;  %1068 = vmatprep.subr.bf16.mxu0 %v1170_v12  ;;  %v170_v33 = vld [vmem:[%s1366_s27] sm:$0x77]  ;;  %v986_v34 = vcombine.low %v203_v32, %v203_v32  ;;  %v987_v35 = vcombine.high %v203_v32, %v203_v32  ;;  %v1199_v50 = vld [vmem:[%s1486_s1 + $0x1c8] sm:$0xff]   ;;  %v1203_v54 = vld [vmem:[%s1486_s1 + $0x1d0] sm:$0xff]  }
  0x12   : > { %1090 = vmatprep.subr.bf16.mxu1 %v1171_v13  ;;  %v1004_v36 = vcombine.low %v170_v33, %v170_v33  ;;  %v1005_v37 = vcombine.high %v170_v33, %v170_v33  ;;  %v1197_v47 = vld [vmem:[%s1486_s1 + $0x180] sm:$0xff]   ;;  %v1198_v51 = vld [vmem:[%s1486_s1 + $0x148] sm:$0xff]   ;;  %v1202_v55 = vld [vmem:[%s1486_s1 + $0x150] sm:$0xff]  }
  0x13   : > { %v249_v40 = vshrl.u32 %v987_v35, 16  ;;  %v251_v41 = vshll.u32 %v987_v35, 16  ;;  %v242_v42 = vshrl.u32 %v986_v34, 16  ;;  %v244_v43 = vshll.u32 %v986_v34, 16  ;;  %v1201_v52 = vld [vmem:[%s1486_s1 + $0x188] sm:$0xff]   ;;  %v1205_v56 = vld [vmem:[%s1486_s1 + $0x190] sm:$0xff]  }
  0x14   : > { %1069 = vmatpush3.bf16.msra.mxu0 %v1172_v14  ;;  %528 = vmatprep.mubr.bf16.mxu1 %v1005_v37  ;;  %v1200_v53 = vld [vmem:[%s1486_s1 + $0x108] sm:$0xff]   ;;  %v1204_v57 = vld [vmem:[%s1486_s1 + $0x110] sm:$0xff]   ;;  %v1207_v58 = vld [vmem:[%s1486_s1 + $0x1d8] sm:$0xff]  }
  0x15   : > { %1091 = vmatpush3.bf16.msra.mxu1 %v1173_v15  ;;  %1070 = vmatprep.subr.bf16.mxu0 %v1174_v16  ;;  %v253_v44 = vrot.slane %v251_v41, 1  ;;  %v246_v45 = vrot.slane %v244_v43, 1  ;;  %v1206_v59 = vld [vmem:[%s1486_s1 + $0x158] sm:$0xff]   ;;  %v1211_v62 = vld [vmem:[%s1486_s1 + $0x1e0] sm:$0xff]   ;;  %v1215_v2 = vld [vmem:[%s1486_s1 + $0x1e8] sm:$0xff]  }
  0x16   : > { %1092 = vmatprep.subr.bf16.mxu1 %v1175_v17  ;;  %v1209_v60 = vld [vmem:[%s1486_s1 + $0x198] sm:$0xff]   ;;  %v1210_v63 = vld [vmem:[%s1486_s1 + $0x160] sm:$0xff]   ;;  %v1214_v3 = vld [vmem:[%s1486_s1 + $0x168] sm:$0xff]  }
  0x17   : > { %v254_v48 = vor.u32 %v253_v44, %v249_v40  ;;  %v247_v49 = vor.u32 %v246_v45, %v242_v42  ;;  %v1208_v61 = vld [vmem:[%s1486_s1 + $0x118] sm:$0xff]   ;;  %v1213_v0 = vld [vmem:[%s1486_s1 + $0x1a0] sm:$0xff]   ;;  %v1217_v4 = vld [vmem:[%s1486_s1 + $0x1a8] sm:$0xff]  }
  0x18   : > { %1071 = vmatpush3.bf16.msra.mxu0 %v1176_v18  ;;  %v1212_v1 = vld [vmem:[%s1486_s1 + $0x120] sm:$0xff]   ;;  %v1216_v5 = vld [vmem:[%s1486_s1 + $0x128] sm:$0xff]   ;;  %v1219_v6 = vld [vmem:[%s1486_s1 + $0x1f0] sm:$0xff]  }
  0x19   : > { %1093 = vmatpush3.bf16.msra.mxu1 %v1177_v19  ;;  %1072 = vmatprep.subr.bf16.mxu0 %v1178_v20  ;;  %v1218_v7 = vld [vmem:[%s1486_s1 + $0x170] sm:$0xff]   ;;  %v1223_v10 = vld [vmem:[%s1486_s1 + $0x1f8] sm:$0xff]   ;;  %v536_v13 = vld [vmem:[%s1366_s27] sm:$0xee] }
  0x1a   : > { %1094 = vmatprep.subr.bf16.mxu1 %v1179_v21  ;;  %385 = vmatprep.mubr.bf16.mxu0 %v254_v48  ;;  %v1221_v8 = vld [vmem:[%s1486_s1 + $0x1b0] sm:$0xff]   ;;  %v1222_v11 = vld [vmem:[%s1486_s1 + $0x178] sm:$0xff]   ;;  %v537_v14 = vld [vmem:[%s1366_s27 + $0x8] sm:$0x11] }
  0x1b   : > { %v1220_v9 = vld [vmem:[%s1486_s1 + $0x130] sm:$0xff]   ;;  %v1225_v12 = vld [vmem:[%s1486_s1 + $0x1b8] sm:$0xff]   ;;  %v1022_v15 = vcombine.low %v536_v13, %v537_v14  ;;  %v1023_v16 = vcombine.high %v536_v13, %v537_v14  ;;  %v733_v17 = vld [vmem:[%s1366_s27] sm:$0xcc] }
  0x1c   : > { %1073 = vmatpush3.bf16.msra.mxu0 %v1180_v22  ;;  %v1224_v18 = vld [vmem:[%s1486_s1 + $0x138] sm:$0xff]   ;;  %v1040_v19 = vcombine.low %v733_v17, %v537_v14  ;;  %v1041_v20 = vcombine.high %v733_v17, %v537_v14 }
  0x1d   : > { %1095 = vmatpush3.bf16.msra.mxu1 %v1181_v23  ;;  %1074 = vmatprep.subr.bf16.mxu0 %v1182_v24  ;;  %v587_v21 = vshrl.u32 %v1023_v16, 16  ;;  %v590_v22 = vshll.u32 %v1023_v16, 16  ;;  %v579_v23 = vshrl.u32 %v1022_v15, 16  ;;  %v582_v24 = vshll.u32 %v1022_v15, 16 }
  0x1e   : > { %1096 = vmatprep.subr.bf16.mxu1 %v1183_v25  ;;  %v771_v25 = vrot.slane %v1040_v19, 2 }
  0x20   : > { %1075 = vmatpush3.bf16.msra.mxu0 %v1184_v26  ;;  %v772_v26 = vrot.slane %v1041_v20, 2 }
  0x21   : > { %1097 = vmatpush3.bf16.msra.mxu1 %v1185_v27  ;;  %1076 = vmatprep.subr.bf16.mxu0 %v1186_v28  ;;  %v589_v27 = vrot.slane %v587_v21, 1  ;;  %v592_v28 = vrot.slane %v590_v22, 2 }
  0x22   : > { %1098 = vmatprep.subr.bf16.mxu1 %v1187_v29  ;;  %v581_v29 = vrot.slane %v579_v23, 1 }
  0x24   : > { %1077 = vmatpush3.bf16.msra.mxu0 %v1188_v30  ;;  %v584_v30 = vrot.slane %v582_v24, 2 }
  0x25   : > { %1099 = vmatpush3.bf16.msra.mxu1 %v1189_v31  ;;  %1106 = vmatprep.subr.bf16.mxu0 %v1194_v38  ;;  %v593_v31 = vor.u32 %v592_v28, %v589_v27 }
  0x26   : > { %1128 = vmatprep.subr.bf16.mxu1 %v1195_v39  ;;  %v585_v32 = vor.u32 %v584_v30, %v581_v29 }
  0x27   : > { %386 = vmatmul.mubr.bf16.vlgmr.msra.gmra.mrb[0].mxu0 %v247_v49 }
  0x28   : > { %529 = vmatmul.mubr.bf16.vlgmr.msra.gmra.mrb[0].mxu1 %v1004_v36  ;;  %1107 = vmatpush3.bf16.msra.mxu0 %v1196_v46 }
  0x29   : > { %1129 = vmatpush3.bf16.msra.mxu1 %v1197_v47  ;;  %1108 = vmatprep.subr.bf16.mxu0 %v1198_v51 }
  0x2a   : > { %1130 = vmatprep.subr.bf16.mxu1 %v1199_v50  ;;  %903 = vmatprep.mubr.bf16.mxu1 %v772_v26 }
  0x2b   : > { %724 = vmatprep.mubr.bf16.mxu0 %v593_v31 }
  0x2c   : > { %1109 = vmatpush3.bf16.msra.mxu0 %v1200_v53 }
  0x2d   : > { %1131 = vmatpush3.bf16.msra.mxu1 %v1201_v52  ;;  %1110 = vmatprep.subr.bf16.mxu0 %v1202_v55  ;;  %v1058_v55 = vld [vmem:[%s1487_s2] ss:$0 sm:$0xff] }
  0x2e   : > { %1132 = vmatprep.subr.bf16.mxu1 %v1203_v54 }
  0x30   : > { %1111 = vmatpush3.bf16.msra.mxu0 %v1204_v57 }
  0x31   : > { %1133 = vmatpush3.bf16.msra.mxu1 %v1205_v56  ;;  %1112 = vmatprep.subr.bf16.mxu0 %v1206_v59 }
  0x32   : > { %1134 = vmatprep.subr.bf16.mxu1 %v1207_v58 }
  0x34   : > { %1113 = vmatpush3.bf16.msra.mxu0 %v1208_v61 }
  0x35   : > { %1135 = vmatpush3.bf16.msra.mxu1 %v1209_v60  ;;  %1114 = vmatprep.subr.bf16.mxu0 %v1210_v63 }
  0x36   : > { %1136 = vmatprep.subr.bf16.mxu1 %v1211_v62 }
  0x38   : > { %1115 = vmatpush3.bf16.msra.mxu0 %v1212_v1 }
  0x39   : > { %1137 = vmatpush3.bf16.msra.mxu1 %v1213_v0  ;;  %1116 = vmatprep.subr.bf16.mxu0 %v1214_v3 }
  0x3a   : > { %1138 = vmatprep.subr.bf16.mxu1 %v1215_v2 }
  0x3c   : > { %1117 = vmatpush3.bf16.msra.mxu0 %v1216_v5 }
  0x3d   : > { %1139 = vmatpush3.bf16.msra.mxu1 %v1217_v4  ;;  %1118 = vmatprep.subr.bf16.mxu0 %v1218_v7 }
  0x3e   : > { %1140 = vmatprep.subr.bf16.mxu1 %v1219_v6 }
  0x40   : > { %1119 = vmatpush3.bf16.msra.mxu0 %v1220_v9 }
  0x41   : > { %1141 = vmatpush3.bf16.msra.mxu1 %v1221_v8  ;;  %1120 = vmatprep.subr.bf16.mxu0 %v1222_v11 }
  0x42   : > { %1142 = vmatprep.subr.bf16.mxu1 %v1223_v10 }
  0x44   : > { %1121 = vmatpush3.bf16.msra.mxu0 %v1224_v18 }
  0x45   : > { %1143 = vmatpush3.bf16.msra.mxu1 %v1225_v12 }
  0x47   : > { %725 = vmatmul.mubr.bf16.vlgmr.msra.gmra.mrb[4].mxu0 %v585_v32 }
  0x48   : > { %904 = vmatmul.mubr.bf16.vlgmr.msra.gmra.mrb[4].mxu1 %v771_v25 }
  0xfa   : > { %v1078_v38 = vpop.f32.mrb[0].mxu0 }
  0xfb   : > { %v1100_v33 = vpop.f32.mrb[0].mxu1  ;;  %v1079_v39 = vpop.f32.mrb[1].mxu0 }
  0xfc   : > { %v1101_v34 = vpop.f32.mrb[1].mxu1  ;;  %v1080_v40 = vadd.f32 %v1079_v39, %v1078_v38  ;;  %v1081_v41 = vpop.f32.mrb[2].mxu0 }
  0xfd   : > { %v1102_v35 = vadd.f32 %v1101_v34, %v1100_v33  ;;  %v1103_v36 = vpop.f32.mrb[2].mxu1  ;;  %v1082_v42 = vpop.f32.mrb[3].mxu0 }
  0xfe   : > { %v1104_v37 = vpop.f32.mrb[3].mxu1 }
  0xff   : > { %v531_v43 = vadd.f32 %v1102_v35, %v1080_v40 }
 0x11a   : > { %v1122_v48 = vpop.f32.mrb[4].mxu0 }
 0x11b   : > { %v1144_v44 = vpop.f32.mrb[4].mxu1  ;;  %v1123_v50 = vpop.f32.mrb[5].mxu0 }
 0x11c   : > { %v1145_v45 = vpop.f32.mrb[5].mxu1  ;;  %v1124_v51 = vadd.f32 %v1123_v50, %v1122_v48  ;;  %v1125_v52 = vpop.f32.mrb[6].mxu0 }
 0x11d   : > { %v1146_v46 = vadd.f32 %v1145_v45, %v1144_v44  ;;  %v1147_v47 = vpop.f32.mrb[6].mxu1  ;;  %v1126_v53 = vpop.f32.mrb[7].mxu0 }
 0x11e   : > { %v1148_v49 = vpop.f32.mrb[7].mxu1  ;;  %v732_v54 = vadd.f32 %v1124_v51, %v531_v43 }
 0x120   : > { %v911_v56 = vadd.f32 %v1146_v46, %v732_v54 }
 0x122   : > { %v919_v57 = vadd.f32 %v1058_v55, %v911_v56 }
 0x124   : > { %vm920_vm0 = vcmp.ge.f32.partialorder %v919_v57, 0.0  ;;  %v921_v58 = vmul.f32 0.2, %v919_v57 }
 0x126   : > { %v922_v59 = vsel %vm920_vm0, %v919_v57, %v921_v58 }
 0x127   : > { %v923_v60 = vpack.c.bf16 %v922_v59, %v922_v59 }
 0x129   : > { %924 = vst [vmem:[%s168_s28] sm:$0x7] %v923_v60 }
 0x12a PF: > { %s13_s12 = sadd.s32 1, %s1236_s12  }
 0x12b   : > { %p10_p4 = scmp.ge.s32.totalorder %s13_s12, 4  }
 0x12d   :  { %12 = sbr.rel (!%p10_p4) target bundleno = 1 (0x1), region = 62 }

// kernel: multiscale_discriminator_forward.15
= control target key start
LH: loop header
LB: loop body
LE: loop exit
PB: predicated region body
PF: predicated region fallthrough
CT: control target
= control target key end

     0   :  { %s1062_s14 = smov 0   ;;  %s1378_s0 = inlined_call_operand.vmem [shape: bf16[2,6,6,256], index: 0, kind: input, shape index: {}]   ;;  %s1379_s1 = inlined_call_operand.vmem [shape: bf16[16,256], index: 1, kind: input, shape index: {}]   ;;  %s1380_s2 = inlined_call_operand.<no memory space> [shape: f32[1,1], index: 2, kind: input, shape index: {}]   ;;  %s1381_s3 = inlined_call_operand.vmem [shape: f32[2,3,3], index: 3, kind: output, shape index: {}]  }
   0x1   :  { %v8_v0 = vstv %s1380_s2 }
   0x2   :  { %9 = vst [vmem:[#allocation2] sm:$0x1] %v8_v0 }
   0x3 LB: > { %s990_s15 = sadd.s32 4294967295, %s1036_s14   ;;  %p994_p0 = scmp.ge.s32.totalorder %s1036_s14, 1  ;;  %s1036_s14 = sphi %s1062_s14, %s15_s14  }
   0x4   : > { %p139_p1 = scmp.lt.s32.totalorder %s1036_s14, 3 }
   0x6   : > { %p140_p2 = pnand %p994_p0, %p139_p1 }
   0x7   : > { %p162_p3 = scmp.lt.s32.totalorder (!%p140_p2), %s990_s15, 1  ;;  %v180_v1 = vld [vmem:[%s1379_s1] sm:$0x11] (!%p140_p2)  ;;  %v183_v2 = vlaneseq (!%p140_p2)  ;;  %v264_v3 = vld [vmem:[%s1379_s1] sm:$0x22] (!%p140_p2)  ;;  %vm227_vm0 = vcmask (!%p140_p2), 1043457  }
   0x8   : > { %143 = sbr.rel (%p140_p2) target bundleno = 411 (0x19b), region = 32  ;;  %v1079_v4 = vld [vmem:[%s1379_s1] sm:$0x44] (!%p140_p2)  ;;  %v181_v5 = vunpack.c.l.bf16 (!%p140_p2), %v180_v1  ;;  %v182_v6 = vunpack.c.h.bf16 (!%p140_p2), %v180_v1  ;;  %v1089_v8 = vld [vmem:[%s1379_s1] sm:$0x88] (!%p140_p2)  ;;  %v1038_v9 = vmov (!%p140_p2), 0   ;;  %v265_v10 = vunpack.c.l.bf16 (!%p140_p2), %v264_v3 }
   0x9   : > { %v1084_v7 = vshrl.u32 (!%p140_p2), %v183_v2, 7  ;;  %1028 = vset.pattern.permute.xlu0 (!%p140_p2), %v1038_v9  ;;  %1029 = vset.pattern.permute.xlu1 (!%p140_p2), %v1038_v9  ;;  %vm197_vm1 = vcmask (!%p140_p2), 1042432   ;;  %v266_v11 = vunpack.c.h.bf16 (!%p140_p2), %v264_v3  ;;  %v362_v12 = vunpack.c.l.bf16 (!%p140_p2), %v1079_v4 }
   0xa   : > { %v363_v17 = vunpack.c.h.bf16 (!%p140_p2), %v1079_v4  ;;  %v447_v19 = vunpack.c.l.bf16 (!%p140_p2), %v1089_v8  ;;  %v448_v20 = vunpack.c.h.bf16 (!%p140_p2), %v1089_v8  ;;  %vm281_vm2 = vcmask (!%p140_p2), 1044482  }
   0xb   : > { %v1094_v13 = vsub.s32 (!%p140_p2), 1, %v1084_v7  ;;  %v1097_v14 = vsub.s32 (!%p140_p2), 0, %v1084_v7  ;;  %v1100_v15 = vsub.s32 (!%p140_p2), 2, %v1084_v7  ;;  %v1103_v16 = vsub.s32 (!%p140_p2), 3, %v1084_v7 }
   0xc   : > { %v1107_v18 = vsub.s32 (!%p140_p2), 4, %v1084_v7  ;;  %vm323_vm3 = vcmask (!%p140_p2), 1045507   ;;  %vm930_vm4 = vcmask (!%p140_p2), 1041409   ;;  %vm932_vm5 = vcmask (!%p140_p2), 1042434  }
   0xd   : > { %v216_v21 = vrot.slane (!%p140_p2), %v181_v5, %v1094_v13  ;;  %v220_v22 = vrot.slane (!%p140_p2), %v182_v6, %v1094_v13  ;;  %v186_v23 = vrot.slane (!%p140_p2), %v181_v5, %v1097_v14  ;;  %v190_v24 = vrot.slane (!%p140_p2), %v182_v6, %v1097_v14 }
   0xe   : > { %v1124_v28 = vrot.slane (!%p140_p2), %v265_v10, %v1100_v15  ;;  %v1127_v29 = vrot.slane (!%p140_p2), %v266_v11, %v1100_v15  ;;  %v1130_v30 = vrot.slane (!%p140_p2), %v265_v10, %v1103_v16  ;;  %v1133_v31 = vrot.slane (!%p140_p2), %v266_v11, %v1103_v16 }
   0xf   : > { %s1383_s15 = smov (!%p162_p3, %s990_s15), 1  ;;  %vm935_vm6 = vcmask 18432  }
  0x10   : > { %s1018_s23 = smul.u32 48, %s1383_s15  ;;  %s996_s8 = sshll.u32 %s1383_s15, 2 }
  0x11   : > { %s170_s11 = scalar_lea.vmem %s1381_s3, %s996_s8 }
  0x12   : > { %s1114_s26 = scalar_lea.vmem %s1378_s0, %s1018_s23 }
  0x13   : > { %v173_v25 = vld [vmem:[%s1114_s26 + $0x10] sm:$0x33]  ;;  %v171_v26 = vld [vmem:[%s1114_s26] sm:$0x33]  ;;  %v172_v27 = vld [vmem:[%s1114_s26 + $0x8] sm:$0x33] }
  0x14   : > { %v178_v32 = vunpack.c.l.bf16 %v173_v25  ;;  %v179_v33 = vunpack.c.h.bf16 %v173_v25  ;;  %v174_v34 = vunpack.c.l.bf16 %v171_v26  ;;  %v175_v35 = vunpack.c.h.bf16 %v171_v26  ;;  %v255_v36 = vld [vmem:[%s1114_s26] sm:$0x66]  ;;  %v256_v53 = vld [vmem:[%s1114_s26 + $0x8] sm:$0x66]  ;;  %v257_v10 = vld [vmem:[%s1114_s26 + $0x10] sm:$0x66] }
  0x15   : > { %v176_v37 = vunpack.c.l.bf16 %v172_v27  ;;  %v177_v38 = vunpack.c.h.bf16 %v172_v27  ;;  %v258_v39 = vunpack.c.l.bf16 %v255_v36  ;;  %v259_v40 = vunpack.c.h.bf16 %v255_v36 }
  0x16   : > { %v225_v41 = vmul.f32 %v216_v21, %v178_v32  ;;  %v226_v42 = vmul.f32 %v220_v22, %v179_v33  ;;  %v221_v43 = vmul.f32 %v216_v21, %v174_v34  ;;  %v222_v44 = vmul.f32 %v220_v22, %v175_v35 }
  0x17   : > { %v223_v45 = vmul.f32 %v216_v21, %v176_v37  ;;  %v224_v46 = vmul.f32 %v220_v22, %v177_v38  ;;  %v191_v47 = vmul.f32 %v186_v23, %v174_v34  ;;  %v192_v48 = vmul.f32 %v190_v24, %v175_v35 }
  0x18   : > { %v238_v49 = vsel %vm227_vm0, %v225_v41, 0.0  ;;  %v239_v50 = vsel %vm227_vm0, %v226_v42, 0.0  ;;  %v228_v51 = vsel %vm227_vm0, %v221_v43, 0.0  ;;  %v229_v52 = vsel %vm227_vm0, %v222_v44, 0.0 }
  0x19   : > { %v240_v54 = vadd.f32 %v239_v50, %v238_v49  ;;  %v230_v55 = vadd.f32 %v229_v52, %v228_v51  ;;  %v233_v56 = vsel %vm227_vm0, %v223_v45, 0.0  ;;  %v234_v57 = vsel %vm227_vm0, %v224_v46, 0.0  ;;  %v997_v50 = vld [vmem:[%s1114_s26 + $0x8] sm:$0x33] }
  0x1a   : > { %v235_v58 = vadd.f32 %v234_v57, %v233_v56  ;;  %v198_v59 = vsel %vm197_vm1, %v191_v47, 0.0  ;;  %v199_v60 = vsel %vm197_vm1, %v192_v48, 0.0  ;;  %v193_v61 = vmul.f32 %v186_v23, %v176_v37 }
  0x1b   : > { %241 = vadd.xlane.f32.xlu1 %v240_v54  ;;  %231 = vadd.xlane.f32.xlu0 %v230_v55  ;;  %v200_v62 = vadd.f32 %v199_v60, %v198_v59  ;;  %v194_v63 = vmul.f32 %v190_v24, %v177_v38  ;;  %v275_v0 = vmul.f32 %v1124_v28, %v258_v39  ;;  %v260_v1 = vunpack.c.l.bf16 %v256_v53  ;;  %v998_v54 = vld [vmem:[%s1114_s26 + $0x10] sm:$0x33]  ;;  %v999_v59 = vld [vmem:[%s1114_s26 + $0x18] sm:$0x33] }
  0x1c   : > { %v203_v3 = vsel %vm197_vm1, %v193_v61, 0.0  ;;  %v276_v5 = vmul.f32 %v1127_v29, %v259_v40  ;;  %v261_v6 = vunpack.c.h.bf16 %v256_v53  ;;  %v195_v9 = vmul.f32 %v186_v23, %v178_v32 }
  0x1d   : > { %v204_v11 = vsel %vm197_vm1, %v194_v63, 0.0  ;;  %v282_v21 = vsel %vm281_vm2, %v275_v0, 0.0  ;;  %v277_v22 = vmul.f32 %v1124_v28, %v260_v1  ;;  %v196_v25 = vmul.f32 %v190_v24, %v179_v33 }
  0x1e   : > { %v283_v26 = vsel %vm281_vm2, %v276_v5, 0.0  ;;  %v278_v27 = vmul.f32 %v1127_v29, %v261_v6  ;;  %v208_v34 = vsel %vm197_vm1, %v195_v9, 0.0  ;;  %v1156_v35 = vsub.s32 5, %v1084_v7 }
  0x1f   : > { %236 = vadd.xlane.f32.xlu0 %v235_v58  ;;  %201 = vadd.xlane.f32.xlu1 %v200_v62  ;;  %v205_v23 = vadd.f32 %v204_v11, %v203_v3  ;;  %v284_v32 = vadd.f32 %v283_v26, %v282_v21  ;;  %v209_v36 = vsel %vm197_vm1, %v196_v25, 0.0  ;;  %v262_v37 = vunpack.c.l.bf16 %v257_v10 }
  0x20   : > { %v287_v38 = vsel %vm281_vm2, %v277_v22, 0.0  ;;  %v288_v24 = vsel %vm281_vm2, %v278_v27, 0.0  ;;  %v263_v33 = vunpack.c.h.bf16 %v257_v10  ;;  %v317_v41 = vmul.f32 %v1130_v30, %v258_v39 }
  0x21   : > { %v210_v42 = vadd.f32 %v209_v36, %v208_v34  ;;  %v279_v43 = vmul.f32 %v1124_v28, %v262_v37  ;;  %v318_v44 = vmul.f32 %v1133_v31, %v259_v40  ;;  %v319_v45 = vmul.f32 %v1130_v30, %v260_v1  ;;  %v1000_v36 = vld [vmem:[%s1114_s26 + $0x8] sm:$0x66] }
  0x22   : > { %v280_v46 = vmul.f32 %v1127_v29, %v263_v33  ;;  %v324_v47 = vsel %vm323_vm3, %v317_v41, 0.0  ;;  %v320_v48 = vmul.f32 %v1133_v31, %v261_v6  ;;  %v321_v49 = vmul.f32 %v1130_v30, %v262_v37 }
  0x23   : > { %206 = vadd.xlane.f32.xlu0 %v205_v23  ;;  %285 = vadd.xlane.f32.xlu1 %v284_v32  ;;  %v289_v39 = vadd.f32 %v288_v24, %v287_v38  ;;  %v292_v28 = vsel %vm281_vm2, %v279_v43, 0.0  ;;  %v325_v40 = vsel %vm323_vm3, %v318_v44, 0.0  ;;  %v322_v51 = vmul.f32 %v1133_v31, %v263_v33  ;;  %v1001_v44 = vld [vmem:[%s1114_s26 + $0x10] sm:$0x66] }
  0x24   : > { %v293_v52 = vsel %vm281_vm2, %v280_v46, 0.0  ;;  %v326_v29 = vadd.f32 %v325_v40, %v324_v47  ;;  %v329_v53 = vsel %vm323_vm3, %v319_v45, 0.0  ;;  %v1177_v55 = vsub.s32 6, %v1084_v7 }
  0x25   : > { %v294_v30 = vadd.f32 %v293_v52, %v292_v28  ;;  %v330_v56 = vsel %vm323_vm3, %v320_v48, 0.0  ;;  %v334_v57 = vsel %vm323_vm3, %v321_v49, 0.0  ;;  %v355_v58 = vunpack.c.l.bf16 %v997_v50  ;;  %v1002_v28 = vld [vmem:[%s1114_s26 + $0x18] sm:$0x66] }
  0x26   : > { %v335_v60 = vsel %vm323_vm3, %v322_v51, 0.0  ;;  %v356_v61 = vunpack.c.h.bf16 %v997_v50  ;;  %v367_v31 = vrot.slane %v362_v12, %v1107_v18  ;;  %v371_v62 = vrot.slane %v363_v17, %v1107_v18 }
  0x27   : > { %290 = vadd.xlane.f32.xlu0 %v289_v39  ;;  %211 = vadd.xlane.f32.xlu1 %v210_v42  ;;  %v357_v63 = vunpack.c.l.bf16 %v998_v54  ;;  %v358_v0 = vunpack.c.h.bf16 %v998_v54  ;;  %v399_v1 = vrot.slane %v362_v12, %v1156_v35  ;;  %v403_v3 = vrot.slane %v363_v17, %v1156_v35 }
  0x28   : > { %v372_v5 = vmul.f32 %v367_v31, %v355_v58  ;;  %v373_v6 = vmul.f32 %v371_v62, %v356_v61  ;;  %v359_v9 = vunpack.c.l.bf16 %v999_v59  ;;  %v360_v10 = vunpack.c.h.bf16 %v999_v59 }
  0x29   : > { %v374_v11 = vmul.f32 %v367_v31, %v357_v63  ;;  %v375_v21 = vmul.f32 %v371_v62, %v358_v0  ;;  %v404_v22 = vmul.f32 %v399_v1, %v355_v58  ;;  %v405_v25 = vmul.f32 %v403_v3, %v356_v61 }
  0x2a   : > { %v378_v26 = vsel %vm197_vm1, %v372_v5, 0.0  ;;  %v379_v27 = vsel %vm197_vm1, %v373_v6, 0.0  ;;  %v406_v34 = vmul.f32 %v399_v1, %v357_v63  ;;  %v407_v12 = vmul.f32 %v403_v3, %v358_v0 }
  0x2b   : > { %295 = vadd.xlane.f32.xlu0 %v294_v30  ;;  %327 = vadd.xlane.f32.xlu1 %v326_v29  ;;  %v331_v4 = vadd.f32 %v330_v56, %v329_v53  ;;  %v336_v17 = vadd.f32 %v335_v60, %v334_v57  ;;  %v383_v23 = vsel %vm197_vm1, %v374_v11, 0.0  ;;  %v384_v32 = vsel %vm197_vm1, %v375_v21, 0.0 }
  0x2c   : > { %v380_v37 = vadd.f32 %v379_v27, %v378_v26  ;;  %v410_v38 = vsel %vm227_vm0, %v404_v22, 0.0  ;;  %v411_v24 = vsel %vm227_vm0, %v405_v25, 0.0  ;;  %v415_v33 = vsel %vm227_vm0, %v406_v34, 0.0  ;;  %v1003_v22 = vld [vmem:[%s1114_s26 + $0x10] sm:$0x33] }
  0x2d   : > { %v416_v41 = vsel %vm227_vm0, %v407_v12, 0.0  ;;  %v376_v42 = vmul.f32 %v367_v31, %v359_v9  ;;  %v377_v43 = vmul.f32 %v371_v62, %v360_v10  ;;  %v385_v45 = vadd.f32 %v384_v32, %v383_v23  ;;  %v1004_v27 = vld [vmem:[%s1114_s26 + $0x18] sm:$0x33] }
  0x2e   : > { %v408_v46 = vmul.f32 %v399_v1, %v359_v9  ;;  %v440_v47 = vunpack.c.l.bf16 %v1000_v36  ;;  %v441_v48 = vunpack.c.h.bf16 %v1000_v36  ;;  %v409_v49 = vmul.f32 %v403_v3, %v360_v10  ;;  %v541_v1 = vld [vmem:[%s1379_s1 + $0x8] sm:$0x11] }
  0x2f   : > { %332 = vadd.xlane.f32.xlu0 %v331_v4  ;;  %337 = vadd.xlane.f32.xlu1 %v336_v17  ;;  %v452_v50 = vrot.slane %v447_v19, %v1177_v55  ;;  %v456_v39 = vrot.slane %v448_v20, %v1177_v55  ;;  %v1213_v40 = vsub.s32 7, %v1084_v7  ;;  %v412_v51 = vadd.f32 %v411_v24, %v410_v38 }
  0x30   : > { %v417_v52 = vadd.f32 %v416_v41, %v415_v33  ;;  %v388_v29 = vsel %vm197_vm1, %v376_v42, 0.0  ;;  %v442_v53 = vunpack.c.l.bf16 %v1001_v44  ;;  %v389_v54 = vsel %vm197_vm1, %v377_v43, 0.0 }
  0x31   : > { %v457_v30 = vmul.f32 %v452_v50, %v440_v47  ;;  %v458_v56 = vmul.f32 %v456_v39, %v441_v48  ;;  %v443_v57 = vunpack.c.h.bf16 %v1001_v44  ;;  %v420_v58 = vsel %vm227_vm0, %v408_v46, 0.0 }
  0x32   : > { %v459_v59 = vmul.f32 %v452_v50, %v442_v53  ;;  %v444_v60 = vunpack.c.l.bf16 %v1002_v28  ;;  %v445_v61 = vunpack.c.h.bf16 %v1002_v28  ;;  %v421_v31 = vsel %vm227_vm0, %v409_v49, 0.0 }
  0x33   : > { %381 = vadd.xlane.f32.xlu0 %v380_v37  ;;  %386 = vadd.xlane.f32.xlu1 %v385_v45  ;;  %v460_v62 = vmul.f32 %v456_v39, %v443_v57  ;;  %v493_v63 = vrot.slane %v447_v19, %v1213_v40  ;;  %v497_v0 = vrot.slane %v448_v20, %v1213_v40  ;;  %v463_v3 = vsel %vm281_vm2, %v457_v30, 0.0 }
  0x34   : > { %v464_v5 = vsel %vm281_vm2, %v458_v56, 0.0  ;;  %v468_v6 = vsel %vm281_vm2, %v459_v59, 0.0  ;;  %v461_v10 = vmul.f32 %v452_v50, %v444_v60  ;;  %v390_v11 = vadd.f32 %v389_v54, %v388_v29  ;;  %v1005_v50 = vld [vmem:[%s1114_s26 + $0x20] sm:$0x33]  ;;  %v626_v56 = vld [vmem:[%s1379_s1 + $0x8] sm:$0x22] }
  0x35   : > { %v469_v9 = vsel %vm281_vm2, %v460_v62, 0.0  ;;  %v422_v19 = vadd.f32 %v421_v31, %v420_v58  ;;  %v462_v21 = vmul.f32 %v456_v39, %v445_v61  ;;  %v542_v8 = vunpack.c.l.bf16 %v541_v1 }
  0x36   : > { %v465_v20 = vadd.f32 %v464_v5, %v463_v3  ;;  %v498_v25 = vmul.f32 %v493_v63, %v440_v47  ;;  %v499_v26 = vmul.f32 %v497_v0, %v441_v48  ;;  %v470_v34 = vadd.f32 %v469_v9, %v468_v6 }
  0x37   : > { %413 = vadd.xlane.f32.xlu0 %v412_v51  ;;  %418 = vadd.xlane.f32.xlu1 %v417_v52  ;;  %v500_v12 = vmul.f32 %v493_v63, %v442_v53  ;;  %v501_v4 = vmul.f32 %v497_v0, %v443_v57  ;;  %v502_v17 = vmul.f32 %v493_v63, %v444_v60  ;;  %v473_v23 = vsel %vm281_vm2, %v461_v10, 0.0  ;;  %v1006_v63 = vld [vmem:[%s1114_s26 + $0x10] sm:$0x66] }
  0x38   : > { %v503_v32 = vmul.f32 %v497_v0, %v445_v61  ;;  %v535_v36 = vunpack.c.l.bf16 %v1003_v22  ;;  %v543_v37 = vunpack.c.h.bf16 %v541_v1  ;;  %v474_v38 = vsel %vm281_vm2, %v462_v21, 0.0  ;;  %v1007_v0 = vld [vmem:[%s1114_s26 + $0x18] sm:$0x66] }
  0x39   : > { %v536_v24 = vunpack.c.h.bf16 %v1003_v22  ;;  %v547_v33 = vrot.slane %v542_v8, %v1097_v14  ;;  %v537_v41 = vunpack.c.l.bf16 %v1004_v27  ;;  %v504_v42 = vsel %vm323_vm3, %v498_v25, 0.0 }
  0x3a   : > { %v505_v43 = vsel %vm323_vm3, %v499_v26, 0.0  ;;  %v551_v44 = vrot.slane %v543_v37, %v1097_v14  ;;  %v538_v45 = vunpack.c.h.bf16 %v1004_v27  ;;  %v509_v46 = vsel %vm323_vm3, %v500_v12, 0.0  ;;  %v1008_v12 = vld [vmem:[%s1114_s26 + $0x20] sm:$0x66] }
  0x3b   : > { %391 = vadd.xlane.f32.xlu0 %v390_v11  ;;  %423 = vadd.xlane.f32.xlu1 %v422_v19  ;;  %v510_v47 = vsel %vm323_vm3, %v501_v4, 0.0  ;;  %v514_v48 = vsel %vm323_vm3, %v502_v17, 0.0  ;;  %v579_v49 = vrot.slane %v542_v8, %v1094_v13  ;;  %v515_v39 = vsel %vm323_vm3, %v503_v32, 0.0 }
  0x3c   : > { %v552_v28 = vmul.f32 %v547_v33, %v535_v36  ;;  %v554_v51 = vmul.f32 %v547_v33, %v537_v41  ;;  %v583_v52 = vrot.slane %v543_v37, %v1094_v13  ;;  %v553_v29 = vmul.f32 %v551_v44, %v536_v24 }
  0x3d   : > { %v555_v53 = vmul.f32 %v551_v44, %v538_v45  ;;  %v475_v14 = vadd.f32 %v474_v38, %v473_v23  ;;  %v506_v54 = vadd.f32 %v505_v43, %v504_v42  ;;  %v539_v30 = vunpack.c.l.bf16 %v1005_v50 }
  0x3e   : > { %v511_v57 = vadd.f32 %v510_v47, %v509_v46  ;;  %v516_v58 = vadd.f32 %v515_v39, %v514_v48  ;;  %v584_v59 = vmul.f32 %v579_v49, %v535_v36  ;;  %v586_v60 = vmul.f32 %v579_v49, %v537_v41  ;;  %v1270_v39 = vld [vmem:[%s1114_s26 + $0x18] sm:$0x33] }
  0x3f   : > { %466 = vadd.xlane.f32.xlu0 %v465_v20  ;;  %471 = vadd.xlane.f32.xlu1 %v470_v34  ;;  %v558_v61 = vsel %vm197_vm1, %v552_v28, 0.0  ;;  %v563_v13 = vsel %vm197_vm1, %v554_v51, 0.0  ;;  %v585_v31 = vmul.f32 %v583_v52, %v536_v24  ;;  %v540_v62 = vunpack.c.h.bf16 %v1005_v50 }
  0x40   : > { %v559_v1 = vsel %vm197_vm1, %v553_v29, 0.0  ;;  %v564_v3 = vsel %vm197_vm1, %v555_v53, 0.0  ;;  %v587_v5 = vmul.f32 %v583_v52, %v538_v45  ;;  %v627_v6 = vunpack.c.l.bf16 %v626_v56  ;;  %v721_v53 = vld [vmem:[%s1379_s1 + $0x8] sm:$0x44] }
  0x41   : > { %v556_v9 = vmul.f32 %v547_v33, %v539_v30  ;;  %v557_v10 = vmul.f32 %v551_v44, %v540_v62  ;;  %v588_v11 = vmul.f32 %v579_v49, %v539_v30  ;;  %v628_v19 = vunpack.c.h.bf16 %v626_v56 }
  0x42   : > { %v589_v21 = vmul.f32 %v583_v52, %v540_v62  ;;  %v620_v22 = vunpack.c.l.bf16 %v1006_v63  ;;  %v632_v8 = vrot.slane %v627_v6, %v1100_v15  ;;  %v622_v20 = vunpack.c.l.bf16 %v1007_v0 }
  0x43   : > { %476 = vadd.xlane.f32.xlu0 %v475_v14  ;;  %507 = vadd.xlane.f32.xlu1 %v506_v54  ;;  %v590_v25 = vsel %vm227_vm0, %v584_v59, 0.0  ;;  %v621_v26 = vunpack.c.h.bf16 %v1006_v63  ;;  %v636_v27 = vrot.slane %v628_v19, %v1100_v15  ;;  %v623_v34 = vunpack.c.h.bf16 %v1007_v0  ;;  %v1278_v14 = vld [vmem:[%s1114_s26 + $0x20] sm:$0x33] }
  0x44   : > { %v560_v4 = vadd.f32 %v559_v1, %v558_v61  ;;  %v565_v17 = vadd.f32 %v564_v3, %v563_v13  ;;  %v591_v23 = vsel %vm227_vm0, %v585_v31, 0.0  ;;  %v595_v32 = vsel %vm227_vm0, %v586_v60, 0.0 }
  0x45   : > { %v596_v36 = vsel %vm227_vm0, %v587_v5, 0.0  ;;  %v568_v37 = vsel %vm197_vm1, %v556_v9, 0.0  ;;  %v569_v38 = vsel %vm197_vm1, %v557_v10, 0.0  ;;  %v600_v24 = vsel %vm227_vm0, %v588_v11, 0.0  ;;  %v1011_v11 = vld [vmem:[%s1114_s26 + $0x28] sm:$0x33] }
  0x46   : > { %v601_v15 = vsel %vm227_vm0, %v589_v21, 0.0  ;;  %v637_v33 = vmul.f32 %v632_v8, %v620_v22  ;;  %v639_v41 = vmul.f32 %v632_v8, %v622_v20  ;;  %v624_v42 = vunpack.c.l.bf16 %v1008_v12 }
  0x47   : > { %512 = vadd.xlane.f32.xlu0 %v511_v57  ;;  %517 = vadd.xlane.f32.xlu1 %v516_v58  ;;  %v638_v43 = vmul.f32 %v636_v27, %v621_v26  ;;  %v640_v44 = vmul.f32 %v636_v27, %v623_v34  ;;  %v625_v45 = vunpack.c.h.bf16 %v1008_v12  ;;  %v673_v46 = vrot.slane %v627_v6, %v1103_v16 }
  0x48   : > { %v677_v47 = vrot.slane %v628_v19, %v1103_v16  ;;  %v592_v48 = vadd.f32 %v591_v23, %v590_v25  ;;  %v597_v49 = vadd.f32 %v596_v36, %v595_v32  ;;  %v570_v50 = vadd.f32 %v569_v38, %v568_v37 }
  0x49   : > { %v602_v28 = vadd.f32 %v601_v15, %v600_v24  ;;  %v643_v51 = vsel %vm281_vm2, %v637_v33, 0.0  ;;  %v648_v52 = vsel %vm281_vm2, %v639_v41, 0.0  ;;  %v641_v29 = vmul.f32 %v632_v8, %v624_v42 }
  0x4a   : > { %v644_v16 = vsel %vm281_vm2, %v638_v43, 0.0  ;;  %v649_v54 = vsel %vm281_vm2, %v640_v44, 0.0  ;;  %v642_v30 = vmul.f32 %v636_v27, %v625_v45  ;;  %v678_v56 = vmul.f32 %v673_v46, %v620_v22 }
  0x4b   : > { %561 = vadd.xlane.f32.xlu0 %v560_v4  ;;  %566 = vadd.xlane.f32.xlu1 %v565_v17  ;;  %v679_v57 = vmul.f32 %v677_v47, %v621_v26  ;;  %v680_v58 = vmul.f32 %v673_v46, %v622_v20  ;;  %v681_v59 = vmul.f32 %v677_v47, %v623_v34  ;;  %v715_v60 = vunpack.c.l.bf16 %v1270_v39 }
  0x4c   : > { %v716_v61 = vunpack.c.h.bf16 %v1270_v39  ;;  %v722_v13 = vunpack.c.l.bf16 %v721_v53  ;;  %v723_v31 = vunpack.c.h.bf16 %v721_v53  ;;  %v717_v62 = vunpack.c.l.bf16 %v1278_v14 }
  0x4d   : > { %v645_v63 = vadd.f32 %v644_v16, %v643_v51  ;;  %v653_v0 = vsel %vm281_vm2, %v641_v29, 0.0  ;;  %v682_v1 = vmul.f32 %v673_v46, %v624_v42  ;;  %v718_v3 = vunpack.c.h.bf16 %v1278_v14 }
  0x4e   : > { %v650_v5 = vadd.f32 %v649_v54, %v648_v52  ;;  %v654_v6 = vsel %vm281_vm2, %v642_v30, 0.0  ;;  %v727_v9 = vrot.slane %v722_v13, %v1107_v18  ;;  %v731_v10 = vrot.slane %v723_v31, %v1107_v18  ;;  %v1013_v54 = vld [vmem:[%s1114_s26 + $0x20] sm:$0x66] }
  0x4f   : > { %593 = vadd.xlane.f32.xlu0 %v592_v48  ;;  %598 = vadd.xlane.f32.xlu1 %v597_v49  ;;  %v684_v19 = vsel %vm323_vm3, %v678_v56, 0.0  ;;  %v685_v21 = vsel %vm323_vm3, %v679_v57, 0.0  ;;  %v689_v22 = vsel %vm323_vm3, %v680_v58, 0.0  ;;  %v683_v8 = vmul.f32 %v677_v47, %v625_v45  ;;  %v806_v45 = vld [vmem:[%s1379_s1 + $0x8] sm:$0x88] }
  0x50   : > { %v690_v20 = vsel %vm323_vm3, %v681_v59, 0.0  ;;  %v732_v25 = vmul.f32 %v727_v9, %v715_v60  ;;  %v733_v26 = vmul.f32 %v731_v10, %v716_v61  ;;  %v734_v27 = vmul.f32 %v727_v9, %v717_v62 }
  0x51   : > { %v694_v34 = vsel %vm323_vm3, %v682_v1, 0.0  ;;  %v735_v12 = vmul.f32 %v731_v10, %v718_v3  ;;  %v719_v4 = vunpack.c.l.bf16 %v1011_v11  ;;  %v720_v18 = vunpack.c.h.bf16 %v1011_v11 }
  0x52   : > { %v738_v17 = vsel %vm197_vm1, %v732_v25, 0.0  ;;  %v739_v23 = vsel %vm197_vm1, %v733_v26, 0.0  ;;  %v743_v32 = vsel %vm197_vm1, %v734_v27, 0.0  ;;  %v759_v36 = vrot.slane %v722_v13, %v1156_v35 }
  0x53   : > { %571 = vadd.xlane.f32.xlu0 %v570_v50  ;;  %603 = vadd.xlane.f32.xlu1 %v602_v28  ;;  %v695_v37 = vsel %vm323_vm3, %v683_v8, 0.0  ;;  %v740_v38 = vadd.f32 %v739_v23, %v738_v17  ;;  %v744_v24 = vsel %vm197_vm1, %v735_v12, 0.0  ;;  %v763_v15 = vrot.slane %v723_v31, %v1156_v35  ;;  %v1012_v28 = vld [vmem:[%s1114_s26 + $0x18] sm:$0x66]  ;;  %v1014_v31 = vld [vmem:[%s1114_s26 + $0x28] sm:$0x66] }
  0x54   : > { %v655_v33 = vadd.f32 %v654_v6, %v653_v0  ;;  %v686_v41 = vadd.f32 %v685_v21, %v684_v19  ;;  %v745_v42 = vadd.f32 %v744_v24, %v743_v32  ;;  %v736_v43 = vmul.f32 %v727_v9, %v719_v4 }
  0x55   : > { %v737_v44 = vmul.f32 %v731_v10, %v720_v18  ;;  %v691_v46 = vadd.f32 %v690_v20, %v689_v22  ;;  %v696_v47 = vadd.f32 %v695_v37, %v694_v34  ;;  %v764_v48 = vmul.f32 %v759_v36, %v715_v60 }
  0x56   : > { %v765_v49 = vmul.f32 %v763_v15, %v716_v61  ;;  %v766_v50 = vmul.f32 %v759_v36, %v717_v62  ;;  %v748_v35 = vsel %vm197_vm1, %v736_v43, 0.0  ;;  %v767_v51 = vmul.f32 %v763_v15, %v718_v3 }
  0x57   : > { %646 = vadd.xlane.f32.xlu0 %v645_v63  ;;  %651 = vadd.xlane.f32.xlu1 %v650_v5  ;;  %v749_v39 = vsel %vm197_vm1, %v737_v44, 0.0  ;;  %v807_v29 = vunpack.c.l.bf16 %v806_v45  ;;  %v808_v53 = vunpack.c.h.bf16 %v806_v45  ;;  %v800_v14 = vunpack.c.l.bf16 %v1012_v28 }
  0x58   : > { %v750_v52 = vadd.f32 %v749_v39, %v748_v35  ;;  %v801_v16 = vunpack.c.h.bf16 %v1012_v28  ;;  %v770_v30 = vsel %vm227_vm0, %v764_v48, 0.0  ;;  %v771_v56 = vsel %vm227_vm0, %v765_v49, 0.0  ;;  %v1015_v49 = vld [vmem:[#allocation2] ss:$0 sm:$0xff] }
  0x59   : > { %v775_v57 = vsel %vm227_vm0, %v766_v50, 0.0  ;;  %v768_v58 = vmul.f32 %v759_v36, %v719_v4  ;;  %v776_v59 = vsel %vm227_vm0, %v767_v51, 0.0  ;;  %v769_v60 = vmul.f32 %v763_v15, %v720_v18 }
  0x5a   : > { %v812_v61 = vrot.slane %v807_v29, %v1177_v55  ;;  %v816_v13 = vrot.slane %v808_v53, %v1177_v55  ;;  %v802_v62 = vunpack.c.l.bf16 %v1013_v54  ;;  %v803_v63 = vunpack.c.h.bf16 %v1013_v54 }
  0x5b   : > { %656 = vadd.xlane.f32.xlu0 %v655_v33  ;;  %687 = vadd.xlane.f32.xlu1 %v686_v41  ;;  %v772_v0 = vadd.f32 %v771_v56, %v770_v30  ;;  %v777_v1 = vadd.f32 %v776_v59, %v775_v57  ;;  %v780_v3 = vsel %vm227_vm0, %v768_v58, 0.0  ;;  %v804_v5 = vunpack.c.l.bf16 %v1014_v31 }
  0x5c   : > { %v781_v6 = vsel %vm227_vm0, %v769_v60, 0.0  ;;  %v817_v9 = vmul.f32 %v812_v61, %v800_v14  ;;  %v818_v10 = vmul.f32 %v816_v13, %v801_v16  ;;  %v805_v11 = vunpack.c.h.bf16 %v1014_v31 }
  0x5d   : > { %v819_v19 = vmul.f32 %v812_v61, %v802_v62  ;;  %v820_v21 = vmul.f32 %v816_v13, %v803_v63  ;;  %v853_v22 = vrot.slane %v807_v29, %v1213_v40  ;;  %v857_v55 = vrot.slane %v808_v53, %v1213_v40 }
  0x5e   : > { %v821_v8 = vmul.f32 %v812_v61, %v804_v5  ;;  %v782_v20 = vadd.f32 %v781_v6, %v780_v3  ;;  %v823_v25 = vsel %vm281_vm2, %v817_v9, 0.0  ;;  %v824_v26 = vsel %vm281_vm2, %v818_v10, 0.0 }
  0x5f   : > { %692 = vadd.xlane.f32.xlu0 %v691_v46  ;;  %697 = vadd.xlane.f32.xlu1 %v696_v47  ;;  %v822_v27 = vmul.f32 %v816_v13, %v805_v11  ;;  %v828_v34 = vsel %vm281_vm2, %v819_v19, 0.0  ;;  %v829_v12 = vsel %vm281_vm2, %v820_v21, 0.0  ;;  %v858_v4 = vmul.f32 %v853_v22, %v800_v14 }
  0x60   : > { %v859_v18 = vmul.f32 %v857_v55, %v801_v16  ;;  %v825_v17 = vadd.f32 %v824_v26, %v823_v25  ;;  %v833_v23 = vsel %vm281_vm2, %v821_v8, 0.0  ;;  %v830_v40 = vadd.f32 %v829_v12, %v828_v34 }
  0x61   : > { %v834_v32 = vsel %vm281_vm2, %v822_v27, 0.0  ;;  %v860_v36 = vmul.f32 %v853_v22, %v802_v62  ;;  %v862_v37 = vmul.f32 %v853_v22, %v804_v5  ;;  %v861_v15 = vmul.f32 %v857_v55, %v803_v63 }
  0x62   : > { %v865_v24 = vsel %vm323_vm3, %v859_v18, 0.0  ;;  %v863_v33 = vmul.f32 %v857_v55, %v805_v11  ;;  %v835_v41 = vadd.f32 %v834_v32, %v833_v23 }
  0x63   : > { %741 = vadd.xlane.f32.xlu0 %v740_v38  ;;  %746 = vadd.xlane.f32.xlu1 %v745_v42  ;;  %v864_v38 = vsel %vm323_vm3, %v858_v4, 0.0  ;;  %v869_v43 = vsel %vm323_vm3, %v860_v36, 0.0  ;;  %v870_v44 = vsel %vm323_vm3, %v861_v15, 0.0  ;;  %v874_v45 = vsel %vm323_vm3, %v862_v37, 0.0 }
  0x64   : > { %v866_v42 = vadd.f32 %v865_v24, %v864_v38  ;;  %v875_v46 = vsel %vm323_vm3, %v863_v33, 0.0  ;;  %v871_v47 = vadd.f32 %v870_v44, %v869_v43 }
  0x65   : > { %v876_v48 = vadd.f32 %v875_v46, %v874_v45 }
  0x67   : > { %773 = vadd.xlane.f32.xlu0 %v772_v0  ;;  %778 = vadd.xlane.f32.xlu1 %v777_v1 }
  0x6b   : > { %751 = vadd.xlane.f32.xlu0 %v750_v52  ;;  %783 = vadd.xlane.f32.xlu1 %v782_v20 }
  0x6f   : > { %826 = vadd.xlane.f32.xlu0 %v825_v17  ;;  %831 = vadd.xlane.f32.xlu1 %v830_v40 }
  0x73   : > { %836 = vadd.xlane.f32.xlu0 %v835_v41  ;;  %867 = vadd.xlane.f32.xlu1 %v866_v42 }
  0x77   : > { %872 = vadd.xlane.f32.xlu0 %v871_v47  ;;  %877 = vadd.xlane.f32.xlu1 %v876_v48 }
  0x8d   : > { %898 = vperm.xlu0 %1028, %v1015_v49  }
  0xa8   : > { %v242_v50 = vpop.xlane.xlu1 %241  ;;  %v232_v35 = vpop.xlane.xlu0 %231 }
  0xa9   : > { %v246_v12 = vrot.slane %v232_v35, 1  ;;  %v248_v17 = vrot.slane %v242_v50, 1 }
  0xac   : > { %v237_v39 = vpop.xlane.xlu0 %236  ;;  %v202_v28 = vpop.xlane.xlu1 %201 }
  0xad   : > { %v247_v8 = vrot.slane %v237_v39, 1  ;;  %v252_v23 = vadd.f32 %v246_v12, %v202_v28 }
  0xb0   : > { %v207_v51 = vpop.xlane.xlu0 %206  ;;  %v286_v52 = vpop.xlane.xlu1 %285 }
  0xb1   : > { %v253_v25 = vadd.f32 %v247_v8, %v207_v51  ;;  %v300_v4 = vrot.slane %v286_v52, 2 }
  0xb3   : > { %v306_v24 = vadd.f32 %v300_v4, %v252_v23 }
  0xb4   : > { %v291_v29 = vpop.xlane.xlu0 %290  ;;  %v212_v53 = vpop.xlane.xlu1 %211 }
  0xb5   : > { %v301_v20 = vrot.slane %v291_v29, 2  ;;  %v254_v15 = vadd.f32 %v248_v17, %v212_v53 }
  0xb7   : > { %v307_v18 = vadd.f32 %v301_v20, %v253_v25 }
  0xb8   : > { %v296_v14 = vpop.xlane.xlu0 %295  ;;  %v328_v16 = vpop.xlane.xlu1 %327 }
  0xb9   : > { %v302_v40 = vrot.slane %v296_v14, 2  ;;  %v342_v32 = vrot.slane %v328_v16, 3 }
  0xbb   : > { %v308_v42 = vadd.f32 %v302_v40, %v254_v15  ;;  %v348_v43 = vadd.f32 %v342_v32, %v306_v24 }
  0xbc   : > { %v333_v54 = vpop.xlane.xlu0 %332  ;;  %v338_v30 = vpop.xlane.xlu1 %337 }
  0xbd   : > { %v343_v26 = vrot.slane %v333_v54, 3  ;;  %v344_v33 = vrot.slane %v338_v30, 3 }
  0xbf   : > { %v349_v36 = vadd.f32 %v343_v26, %v307_v18  ;;  %v350_v35 = vadd.f32 %v344_v33, %v308_v42 }
  0xc0   : > { %v382_v56 = vpop.xlane.xlu0 %381  ;;  %v387_v57 = vpop.xlane.xlu1 %386 }
  0xc1   : > { %v394_v45 = vadd.f32 %v387_v57, %v349_v36  ;;  %v393_v49 = vadd.f32 %v382_v56, %v348_v43 }
  0xc4   : > { %v414_v58 = vpop.xlane.xlu0 %413  ;;  %v419_v59 = vpop.xlane.xlu1 %418 }
  0xc5   : > { %v429_v41 = vrot.slane %v419_v59, 1  ;;  %v428_v44 = vrot.slane %v414_v58, 1 }
  0xc7   : > { %v435_v39 = vadd.f32 %v429_v41, %v394_v45  ;;  %v434_v51 = vadd.f32 %v428_v44, %v393_v49 }
  0xc8   : > { %v392_v60 = vpop.xlane.xlu0 %391  ;;  %v424_v61 = vpop.xlane.xlu1 %423 }
  0xc9   : > { %v395_v52 = vadd.f32 %v392_v60, %v350_v35  ;;  %v430_v29 = vrot.slane %v424_v61, 1 }
  0xcb   : > { %v436_v57 = vadd.f32 %v430_v29, %v395_v52 }
  0xcc   : > { %v467_v13 = vpop.xlane.xlu0 %466  ;;  %v472_v31 = vpop.xlane.xlu1 %471 }
  0xcd   : > { %v482_v46 = vrot.slane %v472_v31, 2  ;;  %v481_v50 = vrot.slane %v467_v13, 2 }
  0xcf   : > { %v488_v16 = vadd.f32 %v482_v46, %v435_v39  ;;  %v487_v30 = vadd.f32 %v481_v50, %v434_v51 }
  0xd0   : > { %v1333_v62 = vpop.xlane.xlu0 %476  ;;  %v508_v63 = vpop.xlane.xlu1 %507 }
  0xd1   : > { %v522_v14 = vrot.slane %v508_v63, 3  ;;  %v483_v59 = vrot.slane %v1333_v62, 2 }
  0xd3   : > { %v528_v8 = vadd.f32 %v522_v14, %v487_v30  ;;  %v489_v20 = vadd.f32 %v483_v59, %v436_v57 }
  0xd4   : > { %v513_v0 = vpop.xlane.xlu0 %512  ;;  %v1335_v1 = vpop.xlane.xlu1 %517 }
  0xd5   : > { %v523_v28 = vrot.slane %v513_v0, 3  ;;  %v524_v31 = vrot.slane %v1335_v1, 3 }
  0xd7   : > { %v529_v58 = vadd.f32 %v523_v28, %v488_v16  ;;  %v530_v62 = vadd.f32 %v524_v31, %v489_v20 }
  0xd8   : > { %v562_v3 = vpop.xlane.xlu0 %561  ;;  %v567_v5 = vpop.xlane.xlu1 %566 }
  0xd9   : > { %v573_v60 = vadd.f32 %v562_v3, %v528_v8  ;;  %v574_v63 = vadd.f32 %v567_v5, %v529_v58 }
  0xdc   : > { %v1337_v6 = vpop.xlane.xlu0 %593  ;;  %v1339_v9 = vpop.xlane.xlu1 %598 }
  0xdd   : > { %v608_v56 = vrot.slane %v1337_v6, 1  ;;  %v609_v13 = vrot.slane %v1339_v9, 1 }
  0xdf   : > { %v614_v12 = vadd.f32 %v608_v56, %v573_v60  ;;  %v615_v18 = vadd.f32 %v609_v13, %v574_v63 }
  0xe0   : > { %v1341_v10 = vpop.xlane.xlu0 %571  ;;  %v1343_v11 = vpop.xlane.xlu1 %603 }
  0xe1   : > { %v575_v6 = vadd.f32 %v1341_v10, %v530_v62  ;;  %v610_v9 = vrot.slane %v1343_v11, 1 }
  0xe3   : > { %v616_v36 = vadd.f32 %v610_v9, %v575_v6 }
  0xe4   : > { %v1345_v19 = vpop.xlane.xlu0 %646  ;;  %v1347_v21 = vpop.xlane.xlu1 %651 }
  0xe5   : > { %v661_v61 = vrot.slane %v1345_v19, 2  ;;  %v662_v25 = vrot.slane %v1347_v21, 2 }
  0xe7   : > { %v667_v17 = vadd.f32 %v661_v61, %v614_v12  ;;  %v668_v23 = vadd.f32 %v662_v25, %v615_v18 }
  0xe8   : > { %v1349_v22 = vpop.xlane.xlu0 %656  ;;  %v1351_v55 = vpop.xlane.xlu1 %687 }
  0xe9   : > { %v702_v4 = vrot.slane %v1351_v55, 3  ;;  %v663_v19 = vrot.slane %v1349_v22, 2 }
  0xeb   : > { %v708_v5 = vadd.f32 %v702_v4, %v667_v17 }
  0xec   : > { %v1353_v27 = vpop.xlane.xlu0 %692  ;;  %v1355_v34 = vpop.xlane.xlu1 %697 }
  0xed   : > { %v703_v1 = vrot.slane %v1353_v27, 3  ;;  %v704_v24 = vrot.slane %v1355_v34, 3  ;;  %v669_v27 = vadd.f32 %v663_v19, %v616_v36 }
  0xef   : > { %v709_v21 = vadd.f32 %v703_v1, %v668_v23  ;;  %v710_v43 = vadd.f32 %v704_v24, %v669_v27 }
  0xf0   : > { %v742_v37 = vpop.xlane.xlu0 %741  ;;  %v747_v38 = vpop.xlane.xlu1 %746 }
  0xf1   : > { %v753_v55 = vadd.f32 %v742_v37, %v708_v5  ;;  %v754_v42 = vadd.f32 %v747_v38, %v709_v21 }
  0xf4   : > { %v774_v47 = vpop.xlane.xlu0 %773  ;;  %v779_v48 = vpop.xlane.xlu1 %778 }
  0xf5   : > { %v788_v40 = vrot.slane %v774_v47, 1  ;;  %v789_v33 = vrot.slane %v779_v48, 1 }
  0xf7   : > { %v794_v41 = vadd.f32 %v788_v40, %v753_v55  ;;  %v795_v46 = vadd.f32 %v789_v33, %v754_v42 }
  0xf8   : > { %v752_v53 = vpop.xlane.xlu0 %751  ;;  %v784_v54 = vpop.xlane.xlu1 %783 }
  0xf9   : > { %v755_v22 = vadd.f32 %v752_v53, %v710_v43  ;;  %v790_v49 = vrot.slane %v784_v54, 1  ;;  %v917_v53 = vand.u32 127, %v183_v2 }
  0xfb   : > { %v796_v48 = vadd.f32 %v790_v49, %v755_v22  ;;  %v920_v30 = vsub.s32 %v917_v53, %v1084_v7 }
  0xfc   : > { %v827_v0 = vpop.xlane.xlu0 %826  ;;  %v832_v26 = vpop.xlane.xlu1 %831 }
  0xfd   : > { %v841_v15 = vrot.slane %v827_v0, 2  ;;  %v842_v45 = vrot.slane %v832_v26, 2 }
  0xff   : > { %v847_v44 = vadd.f32 %v841_v15, %v794_v41  ;;  %v848_v28 = vadd.f32 %v842_v45, %v795_v46 }
 0x100   : > { %v837_v3 = vpop.xlane.xlu0 %836  ;;  %v868_v32 = vpop.xlane.xlu1 %867 }
 0x101   : > { %v882_v10 = vrot.slane %v868_v32, 3  ;;  %v843_v34 = vrot.slane %v837_v3, 2 }
 0x103   : > { %v888_v47 = vadd.f32 %v882_v10, %v847_v44  ;;  %v849_v38 = vadd.f32 %v843_v34, %v796_v48 }
 0x104   : > { %v873_v11 = vpop.xlane.xlu0 %872  ;;  %v878_v50 = vpop.xlane.xlu1 %877 }
 0x105   : > { %v883_v35 = vrot.slane %v873_v11, 3  ;;  %v884_v52 = vrot.slane %v878_v50, 3 }
 0x107   : > { %v889_v51 = vadd.f32 %v883_v35, %v848_v28  ;;  %v890_v14 = vadd.f32 %v884_v52, %v849_v38 }
 0x10c   : > { %v899_v39 = vpop.permute.xlu0 %898 }
 0x10d   : > { %v901_v37 = vadd.f32 %v899_v39, %v888_v47  ;;  %v902_v29 = vadd.f32 %v899_v39, %v889_v51  ;;  %v903_v16 = vadd.f32 %v899_v39, %v890_v14 }
 0x10f   : > { %908 = vperm.xlu1 %1029, %v901_v37  }
 0x113   : > { %911 = vperm.xlu1 %1029, %v902_v29  }
 0x117   : > { %914 = vperm.xlu1 %1029, %v903_v16  }
 0x18e   : > { %v909_v54 = vpop.permute.xlu1 %908 }
 0x18f   : > { %v921_v57 = vrot.slane %v909_v54, %v920_v30 }
 0x192   : > { %v912_v59 = vpop.permute.xlu1 %911 }
 0x193   : > { %v925_v58 = vrot.slane %v912_v59, %v920_v30 }
 0x195   : > { %v931_v56 = vsel %vm930_vm4, %v925_v58, %v921_v57 }
 0x196   : > { %v915_v31 = vpop.permute.xlu1 %914 }
 0x197   : > { %v929_v8 = vrot.slane %v915_v31, %v920_v30 }
 0x199   : > { %v933_v13 = vsel %vm932_vm5, %v929_v8, %v931_v56 }
 0x19a   : > { %936 = vst.msk [vmem:[%s170_s11] sm:$0x7] %vm935_vm6, %v933_v13 }
 0x19b PF: > { %s15_s14 = sadd.s32 1, %s1036_s14  }
 0x19c   : > { %p12_p4 = scmp.ge.s32.totalorder %s15_s14, 4  }
 0x19e   :  { %14 = sbr.rel (!%p12_p4) target bundleno = 3 (0x3), region = 65 }

</bundles_post_ra>
